<compile_context>
chip_gen: v7x
topology: tpu7x:2x2x1
jax: 0.10.0
libtpu: 0.0.40
codegen_flags: <defaults>
</compile_context>

<pallas_src>
import functools

import numpy as np
import jax
import jax.numpy as jnp
from jax.experimental import pallas as pl
from jax.experimental.pallas import tpu as pltpu

NUM_CLASSES = 32      # hard-coded num_classes=32 in the PyTorch forward
PAD_Y = 5             # top/bottom zero padding (max dilation = 5)
PAD_X = 8             # left/right zero padding (>= 5; 8 keeps the interior store aligned)
DILATIONS = (1, 3, 5)


def _fusion_kernel(feat_ref, sem_ref, w1_ref, wd_ref, out_ref, pad_ref, *, H, W, pack):
    # feat_ref : (1, H*W, Cin)  bf16   one stacked-batch element, spatially flattened
    # sem_ref  : (1, 1, H*W)    int32  semantic class ids (one-hot built in-kernel)
    # w1_ref   : (Cin+32, Cout) bf16   1x1 weight, bias folded into the class rows
    # wd_ref   : (27, Cout, Cout) bf16 3x3 tap weights, tap-major (d=1 taps, d=3, d=5)
    # out_ref  : (1, H*W//pack, pack*Cout) f32  lane-dense output slab
    # pad_ref  : (H+2*PAD_Y, W+2*PAD_X, Cout) f32  zero-padded 1x1 output (scratch)
    HW = feat_ref.shape[1]
    cout = wd_ref.shape[-1]
    Wp = W + 2 * PAD_X

    # ---- 1x1 conv: one MXU matmul on [features | one_hot(sem)] (bias pre-folded) ----
    cls = jax.lax.broadcasted_iota(jnp.int32, (HW, NUM_CLASSES), 1)
    onehot = (sem_ref[0, 0][:, None] == cls).astype(jnp.bfloat16)        # exact in bf16
    lhs = jnp.concatenate([feat_ref[0], onehot], axis=-1)                # (HW, Cin+32)
    x1 = jnp.dot(lhs, w1_ref[...], preferred_element_type=jnp.float32)   # (HW, Cout) f32

    # ---- refresh the zero border every step (interior is fully overwritten).
    #      Required under "parallel": each core's first step starts from
    #      uninitialized scratch, so do NOT gate this on program_id == 0. ----
    pad_ref[0:PAD_Y, :, :] = jnp.zeros((PAD_Y, Wp, cout), jnp.float32)
    pad_ref[PAD_Y + H:2 * PAD_Y + H, :, :] = jnp.zeros((PAD_Y, Wp, cout), jnp.float32)
    pad_ref[PAD_Y:PAD_Y + H, 0:PAD_X, :] = jnp.zeros((H, PAD_X, cout), jnp.float32)
    pad_ref[PAD_Y:PAD_Y + H, PAD_X + W:2 * PAD_X + W, :] = jnp.zeros((H, PAD_X, cout),
                                                                     jnp.float32)
    pad_ref[PAD_Y:PAD_Y + H, PAD_X:PAD_X + W, :] = x1.reshape(H, W, cout)

    # ---- conv_d1 + conv_d3 + conv_d5: 27 accumulating dots straight off the padded
    #      scratch (no patch buffer -> no masked lane-offset packing stores). ----
    acc = jnp.zeros((HW, cout), jnp.float32)
    t = 0
    for d in DILATIONS:
        for ky in range(3):
            for kx in range(3):
                oy = PAD_Y + (ky - 1) * d
                ox = PAD_X + (kx - 1) * d
                win = pad_ref[oy:oy + H, ox:ox + W, :].reshape(HW, cout)
                acc = acc + jnp.dot(win, wd_ref[t],
                                    preferred_element_type=jnp.float32)
                t += 1

    # ---- lane-dense store: pack `pack` pixels per 128-lane output row ----
    if pack > 1:
        q = HW // pack
        packed = jnp.concatenate([acc[j * q:(j + 1) * q, :] for j in range(pack)],
                                 axis=1)
        out_ref[0] = packed.astype(out_ref.dtype)
    else:
        out_ref[0] = acc.astype(out_ref.dtype)


def _fusion_group(feat, sem, w1, wd, H, W, cout):
    """One pallas_call for all batch elements / levels sharing one spatial shape."""
    Bg, HW, cin = feat.shape
    pack = 128 // cout if (0 < cout <= 128 and 128 % cout == 0) else 1
    if HW % pack != 0:
        pack = 1

    if pack > 1:
        out_shape = jax.ShapeDtypeStruct((Bg, HW // pack, pack * cout), jnp.float32)
        out_spec = pl.BlockSpec((1, HW // pack, pack * cout), lambda b: (b, 0, 0))
    else:
        out_shape = jax.ShapeDtypeStruct((Bg, HW, cout), jnp.float32)
        out_spec = pl.BlockSpec((1, HW, cout), lambda b: (b, 0, 0))

    flops = 2 * Bg * HW * ((cin + NUM_CLASSES) * cout + 27 * cout * cout)
    bytes_accessed = (feat.size * feat.dtype.itemsize + sem.size * 4
                      + w1.size * 2 + wd.size * 2 + Bg * HW * cout * 4)

    out = pl.pallas_call(
        functools.partial(_fusion_kernel, H=H, W=W, pack=pack),
        out_shape=out_shape,
        grid_spec=pltpu.PrefetchScalarGridSpec(
            num_scalar_prefetch=0,
            grid=(Bg,),
            in_specs=[
                pl.BlockSpec((1, HW, cin), lambda b: (b, 0, 0)),
                pl.BlockSpec((1, 1, HW), lambda b: (b, 0, 0)),
                pl.BlockSpec((cin + NUM_CLASSES, cout), lambda b: (0, 0)),
                pl.BlockSpec((27, cout, cout), lambda b: (0, 0, 0)),
            ],
            out_specs=out_spec,
            scratch_shapes=[
                pltpu.VMEM((H + 2 * PAD_Y, W + 2 * PAD_X, cout), jnp.float32),
            ],
        ),
        compiler_params=pltpu.CompilerParams(dimension_semantics=("parallel",)),
        cost_estimate=pl.CostEstimate(flops=flops, transcendentals=0,
                                      bytes_accessed=bytes_accessed),
    )(feat, sem, w1, wd)

    if pack > 1:
        out = out.reshape(Bg, HW // pack, pack, cout)
        out = jnp.swapaxes(out, 1, 2).reshape(Bg, H, W, cout)
    else:
        out = out.reshape(Bg, H, W, cout)
    return out


def fusion_forward(x_list, sp_list, params, min_level, levels):
    """Mirrors FusionModule.forward.  x_list: list of NHWC feature maps.
    sp_list: list (per used level) of lists of per-image (H, W) int class maps
    (the `i._tensors` of the PackedSequence-like objects).  Returns NHWC outputs."""
    x_used = x_list[min_level:min_level + levels]
    cin = x_used[0].shape[-1]
    cout = params["b1"].shape[-1]

    # fold the 1x1 bias into the class rows (exactly one one-hot lane is 1 per pixel)
    w1 = params["w1"]
    w1_folded = jnp.concatenate([w1[:cin], w1[cin:] + params["b1"]],
                                axis=0).astype(jnp.bfloat16)
    wd = params["wd"].astype(jnp.bfloat16)            # (27, cout, cout), tap-major

    # group levels sharing a spatial shape -> one fused pallas_call per group
    groups = {}
    for idx, xl in enumerate(x_used):
        groups.setdefault((xl.shape[1], xl.shape[2]), []).append(idx)

    outs = [None] * len(x_used)
    for (H, W), idxs in groups.items():
        B = x_used[idxs[0]].shape[0]
        feat = jnp.concatenate([x_used[i] for i in idxs], axis=0)
        feat = feat.astype(jnp.bfloat16).reshape(len(idxs) * B, H * W, cin)
        sem = jnp.concatenate(
            [jnp.stack(sp_list[i]).astype(jnp.int32) for i in idxs], axis=0)
        sem = sem.reshape(len(idxs) * B, 1, H * W)
        o = _fusion_group(feat, sem, w1_folded, wd, H, W, cout)
        for k, i in enumerate(idxs):
            outs[i] = o[k * B:(k + 1) * B]
    return outs


# ---------------- pure-JAX reference (for correctness check) ----------------
def _ref_level(fx, w1, b1, wd):
    cout = w1.shape[1]
    x1 = jnp.einsum("bhwc,cd->bhwd", fx, w1,
                    precision=jax.lax.Precision.HIGHEST) + b1[0]
    out = jnp.zeros(x1.shape[:3] + (cout,), jnp.float32)
    for di, d in enumerate(DILATIONS):
        w = wd[di * 9:(di + 1) * 9].reshape(3, 3, cout, cout)   # HWIO
        out = out + jax.lax.conv_general_dilated(
            x1, w, window_strides=(1, 1), padding=[(d, d), (d, d)],
            rhs_dilation=(d, d), dimension_numbers=("NHWC", "HWIO", "NHWC"),
            precision=jax.lax.Precision.HIGHEST)
    return out


if __name__ == "__main__":
    key = jax.random.PRNGKey(0)
    keys = jax.random.split(key, 20)

    in_channels, out_channels = 32, 32
    min_level, levels = 1, 4
    B = 2
    # 6 pyramid levels; forward slices levels [1 .. 4]
    spatial = [(32, 32), (16, 16), (16, 16), (8, 8), (8, 8), (4, 4)]

    # feature pyramid x (NHWC)
    x_all = [jax.random.normal(keys[i], (B, h, w, in_channels), jnp.float32)
             for i, (h, w) in enumerate(spatial)]

    # sp: per used level, a list of B per-image (H, W) int32 class maps (._tensors)
    used = spatial[min_level:min_level + levels]
    sp = []
    for j, (h, w) in enumerate(used):
        per_img = [jax.random.randint(keys[6 + 2 * j + bi], (h, w), 0, NUM_CLASSES,
                                      dtype=jnp.int32) for bi in range(B)]
        sp.append(per_img)

    # deterministic parameters (synthetic init, not a checkpoint)
    cin_tot = in_channels + out_channels
    params = {
        "w1": 0.1 * jax.random.normal(keys[14], (cin_tot, out_channels), jnp.float32),
        "b1": 0.1 * jax.random.normal(keys[15], (1, out_channels), jnp.float32),
        "wd": 0.1 * jax.random.normal(keys[16], (27, out_channels, out_channels),
                                      jnp.float32),
    }

    outs = fusion_forward(x_all, sp, params, min_level, levels)
    outs = [jax.block_until_ready(o) for o in outs]

    # verify against a pure-JAX reference; tolerance covers bf16 operands + bf16 MXU
    x_used = x_all[min_level:min_level + levels]
    for xl, spl, o in zip(x_used, sp, outs):
        sem = jnp.stack(spl)
        fx = jnp.concatenate([xl, jax.nn.one_hot(sem, NUM_CLASSES, dtype=jnp.float32)],
                             axis=-1)
        ref = _ref_level(fx, params["w1"], params["b1"], params["wd"])
        np.testing.assert_allclose(np.asarray(o), np.asarray(ref),
                                   rtol=1e-1, atol=1e-1)

    print("KERNEL_OK")
</pallas_src>

<mosaic_0001>
module attributes {stable_mosaic.version = 11 : i64} {
  func.func @_fusion_kernel(%arg0: i32, %arg1: memref<1x256x32xbf16, #tpu.memory_space<vmem>>, %arg2: memref<1x1x256xi32, #tpu.memory_space<vmem>>, %arg3: memref<64x32xbf16, #tpu.memory_space<vmem>>, %arg4: memref<27x32x32xbf16, #tpu.memory_space<vmem>>, %arg5: memref<1x64x128xf32, #tpu.memory_space<vmem>>, %arg6: memref<26x32x32xf32, #tpu.memory_space<vmem>>) attributes {dimension_semantics = [#tpu.dimension_semantics<parallel>], iteration_bounds = array<i64: 4>, scalar_prefetch = 0 : i64, scratch_operands = 1 : i64, tpu.core_type = #tpu.core_type<tc>, window_params = [{transform_indices = @transform_0, window_bounds = array<i64: 1, 256, 32>}, {transform_indices = @transform_1, window_bounds = array<i64: 1, 1, 256>}, {pipeline_mode = #tpu.pipeline_mode<synchronous>, transform_indices = @transform_2, window_bounds = array<i64: 64, 32>}, {pipeline_mode = #tpu.pipeline_mode<synchronous>, transform_indices = @transform_3, window_bounds = array<i64: 27, 32, 32>}, {transform_indices = @transform_4, window_bounds = array<i64: 1, 64, 128>}]} {
    %0 = tpu.iota {dimensions = array<i32: 1>} : vector<256x32xi32>
    %c0 = arith.constant 0 : index
    %c0_0 = arith.constant 0 : index
    %c0_1 = arith.constant 0 : index
    %1 = vector.load %arg2[%c0, %c0_0, %c0_1] : memref<1x1x256xi32, #tpu.memory_space<vmem>>, vector<1x1x256xi32>
    %2 = vector.shape_cast %1 : vector<1x1x256xi32> to vector<256xi32>
    %3 = vector.shape_cast %2 : vector<256xi32> to vector<256x1xi32>
    %4 = vector.broadcast %3 : vector<256x1xi32> to vector<256x32xi32>
    %5 = arith.cmpi eq, %4, %0 : vector<256x32xi32>
    %6 = arith.extui %5 : vector<256x32xi1> to vector<256x32xi32>
    %7 = arith.sitofp %6 : vector<256x32xi32> to vector<256x32xf32>
    %8 = arith.truncf %7 : vector<256x32xf32> to vector<256x32xbf16>
    %c0_2 = arith.constant 0 : index
    %c0_3 = arith.constant 0 : index
    %c0_4 = arith.constant 0 : index
    %9 = vector.load %arg1[%c0_2, %c0_3, %c0_4] : memref<1x256x32xbf16, #tpu.memory_space<vmem>>, vector<1x256x32xbf16>
    %10 = vector.shape_cast %9 : vector<1x256x32xbf16> to vector<256x32xbf16>
    %11 = tpu.concatenate %10, %8 in 1 : vector<256x32xbf16>, vector<256x32xbf16> -> vector<256x64xbf16>
    %c0_5 = arith.constant 0 : index
    %c0_6 = arith.constant 0 : index
    %12 = vector.load %arg3[%c0_5, %c0_6] : memref<64x32xbf16, #tpu.memory_space<vmem>>, vector<64x32xbf16>
    %cst = arith.constant dense<0.000000e+00> : vector<256x32xf32>
    %13 = tpu.matmul %11, %12, %cst {dimension_numbers = #tpu.dot_dimension_numbers<[1], [0], [0], [1], [0, 0, 1, 1], [], []>} : vector<256x64xbf16>, vector<64x32xbf16>, vector<256x32xf32> -> vector<256x32xf32>
    %cst_7 = arith.constant 0.000000e+00 : f32
    %14 = vector.broadcast %cst_7 : f32 to vector<5x32x32xf32>
    %c0_8 = arith.constant 0 : index
    %c0_9 = arith.constant 0 : index
    %c0_10 = arith.constant 0 : index
    %15 = vector.load %arg6[%c0_8, %c0_9, %c0_10] : memref<26x32x32xf32, #tpu.memory_space<vmem>>, vector<5x32x32xf32>
    tpu.vector_store %arg6[%c0_8, %c0_9, %c0_10], %14 {strides = array<i32>} : memref<26x32x32xf32, #tpu.memory_space<vmem>>, vector<5x32x32xf32>,
    %cst_11 = arith.constant 0.000000e+00 : f32
    %16 = vector.broadcast %cst_11 : f32 to vector<5x32x32xf32>
    %c21 = arith.constant 21 : index
    %c0_12 = arith.constant 0 : index
    %c0_13 = arith.constant 0 : index
    %17 = vector.load %arg6[%c21, %c0_12, %c0_13] : memref<26x32x32xf32, #tpu.memory_space<vmem>>, vector<5x32x32xf32>
    tpu.vector_store %arg6[%c21, %c0_12, %c0_13], %16 {strides = array<i32>} : memref<26x32x32xf32, #tpu.memory_space<vmem>>, vector<5x32x32xf32>,
    %cst_14 = arith.constant 0.000000e+00 : f32
    %18 = vector.broadcast %cst_14 : f32 to vector<16x8x32xf32>
    %c5 = arith.constant 5 : index
    %c0_15 = arith.constant 0 : index
    %c0_16 = arith.constant 0 : index
    %19 = vector.load %arg6[%c5, %c0_15, %c0_16] : memref<26x32x32xf32, #tpu.memory_space<vmem>>, vector<16x8x32xf32>
    tpu.vector_store %arg6[%c5, %c0_15, %c0_16], %18 {strides = array<i32>} : memref<26x32x32xf32, #tpu.memory_space<vmem>>, vector<16x8x32xf32>,
    %cst_17 = arith.constant 0.000000e+00 : f32
    %20 = vector.broadcast %cst_17 : f32 to vector<16x8x32xf32>
    %c5_18 = arith.constant 5 : index
    %c24 = arith.constant 24 : index
    %c0_19 = arith.constant 0 : index
    %21 = vector.load %arg6[%c5_18, %c24, %c0_19] : memref<26x32x32xf32, #tpu.memory_space<vmem>>, vector<16x8x32xf32>
    tpu.vector_store %arg6[%c5_18, %c24, %c0_19], %20 {strides = array<i32>} : memref<26x32x32xf32, #tpu.memory_space<vmem>>, vector<16x8x32xf32>,
    %22 = vector.shape_cast %13 : vector<256x32xf32> to vector<16x16x32xf32>
    %c5_20 = arith.constant 5 : index
    %c8 = arith.constant 8 : index
    %c0_21 = arith.constant 0 : index
    %23 = vector.load %arg6[%c5_20, %c8, %c0_21] : memref<26x32x32xf32, #tpu.memory_space<vmem>>, vector<16x16x32xf32>
    tpu.vector_store %arg6[%c5_20, %c8, %c0_21], %22 {strides = array<i32>} : memref<26x32x32xf32, #tpu.memory_space<vmem>>, vector<16x16x32xf32>,
    %cst_22 = arith.constant 0.000000e+00 : f32
    %24 = vector.broadcast %cst_22 : f32 to vector<256x32xf32>
    %c4 = arith.constant 4 : index
    %c7 = arith.constant 7 : index
    %c0_23 = arith.constant 0 : index
    %25 = vector.load %arg6[%c4, %c7, %c0_23] : memref<26x32x32xf32, #tpu.memory_space<vmem>>, vector<16x16x32xf32>
    %26 = vector.shape_cast %25 : vector<16x16x32xf32> to vector<256x32xf32>
    %c0_24 = arith.constant 0 : index
    %c0_25 = arith.constant 0 : index
    %c0_26 = arith.constant 0 : index
    %27 = vector.load %arg4[%c0_24, %c0_25, %c0_26] : memref<27x32x32xbf16, #tpu.memory_space<vmem>>, vector<1x32x32xbf16>
    %28 = vector.shape_cast %27 : vector<1x32x32xbf16> to vector<32x32xbf16>
    %cst_27 = arith.constant dense<0.000000e+00> : vector<256x32xf32>
    %29 = tpu.matmul %26, %28, %cst_27 {dimension_numbers = #tpu.dot_dimension_numbers<[1], [0], [0], [1], [0, 0, 1, 1], [], []>} : vector<256x32xf32>, vector<32x32xbf16>, vector<256x32xf32> -> vector<256x32xf32>
    %30 = arith.addf %24, %29 : vector<256x32xf32>
    %c4_28 = arith.constant 4 : index
    %c8_29 = arith.constant 8 : index
    %c0_30 = arith.constant 0 : index
    %31 = vector.load %arg6[%c4_28, %c8_29, %c0_30] : memref<26x32x32xf32, #tpu.memory_space<vmem>>, vector<16x16x32xf32>
    %32 = vector.shape_cast %31 : vector<16x16x32xf32> to vector<256x32xf32>
    %c1 = arith.constant 1 : index
    %c0_31 = arith.constant 0 : index
    %c0_32 = arith.constant 0 : index
    %33 = vector.load %arg4[%c1, %c0_31, %c0_32] : memref<27x32x32xbf16, #tpu.memory_space<vmem>>, vector<1x32x32xbf16>
    %34 = vector.shape_cast %33 : vector<1x32x32xbf16> to vector<32x32xbf16>
    %cst_33 = arith.constant dense<0.000000e+00> : vector<256x32xf32>
    %35 = tpu.matmul %32, %34, %cst_33 {dimension_numbers = #tpu.dot_dimension_numbers<[1], [0], [0], [1], [0, 0, 1, 1], [], []>} : vector<256x32xf32>, vector<32x32xbf16>, vector<256x32xf32> -> vector<256x32xf32>
    %36 = arith.addf %30, %35 : vector<256x32xf32>
    %c4_34 = arith.constant 4 : index
    %c9 = arith.constant 9 : index
    %c0_35 = arith.constant 0 : index
    %37 = vector.load %arg6[%c4_34, %c9, %c0_35] : memref<26x32x32xf32, #tpu.memory_space<vmem>>, vector<16x16x32xf32>
    %38 = vector.shape_cast %37 : vector<16x16x32xf32> to vector<256x32xf32>
    %c2 = arith.constant 2 : index
    %c0_36 = arith.constant 0 : index
    %c0_37 = arith.constant 0 : index
    %39 = vector.load %arg4[%c2, %c0_36, %c0_37] : memref<27x32x32xbf16, #tpu.memory_space<vmem>>, vector<1x32x32xbf16>
    %40 = vector.shape_cast %39 : vector<1x32x32xbf16> to vector<32x32xbf16>
    %cst_38 = arith.constant dense<0.000000e+00> : vector<256x32xf32>
    %41 = tpu.matmul %38, %40, %cst_38 {dimension_numbers = #tpu.dot_dimension_numbers<[1], [0], [0], [1], [0, 0, 1, 1], [], []>} : vector<256x32xf32>, vector<32x32xbf16>, vector<256x32xf32> -> vector<256x32xf32>
    %42 = arith.addf %36, %41 : vector<256x32xf32>
    %c5_39 = arith.constant 5 : index
    %c7_40 = arith.constant 7 : index
    %c0_41 = arith.constant 0 : index
    %43 = vector.load %arg6[%c5_39, %c7_40, %c0_41] : memref<26x32x32xf32, #tpu.memory_space<vmem>>, vector<16x16x32xf32>
    %44 = vector.shape_cast %43 : vector<16x16x32xf32> to vector<256x32xf32>
    %c3 = arith.constant 3 : index
    %c0_42 = arith.constant 0 : index
    %c0_43 = arith.constant 0 : index
    %45 = vector.load %arg4[%c3, %c0_42, %c0_43] : memref<27x32x32xbf16, #tpu.memory_space<vmem>>, vector<1x32x32xbf16>
    %46 = vector.shape_cast %45 : vector<1x32x32xbf16> to vector<32x32xbf16>
    %cst_44 = arith.constant dense<0.000000e+00> : vector<256x32xf32>
    %47 = tpu.matmul %44, %46, %cst_44 {dimension_numbers = #tpu.dot_dimension_numbers<[1], [0], [0], [1], [0, 0, 1, 1], [], []>} : vector<256x32xf32>, vector<32x32xbf16>, vector<256x32xf32> -> vector<256x32xf32>
    %48 = arith.addf %42, %47 : vector<256x32xf32>
    %c5_45 = arith.constant 5 : index
    %c8_46 = arith.constant 8 : index
    %c0_47 = arith.constant 0 : index
    %49 = vector.load %arg6[%c5_45, %c8_46, %c0_47] : memref<26x32x32xf32, #tpu.memory_space<vmem>>, vector<16x16x32xf32>
    %50 = vector.shape_cast %49 : vector<16x16x32xf32> to vector<256x32xf32>
    %c4_48 = arith.constant 4 : index
    %c0_49 = arith.constant 0 : index
    %c0_50 = arith.constant 0 : index
    %51 = vector.load %arg4[%c4_48, %c0_49, %c0_50] : memref<27x32x32xbf16, #tpu.memory_space<vmem>>, vector<1x32x32xbf16>
    %52 = vector.shape_cast %51 : vector<1x32x32xbf16> to vector<32x32xbf16>
    %cst_51 = arith.constant dense<0.000000e+00> : vector<256x32xf32>
    %53 = tpu.matmul %50, %52, %cst_51 {dimension_numbers = #tpu.dot_dimension_numbers<[1], [0], [0], [1], [0, 0, 1, 1], [], []>} : vector<256x32xf32>, vector<32x32xbf16>, vector<256x32xf32> -> vector<256x32xf32>
    %54 = arith.addf %48, %53 : vector<256x32xf32>
    %c5_52 = arith.constant 5 : index
    %c9_53 = arith.constant 9 : index
    %c0_54 = arith.constant 0 : index
    %55 = vector.load %arg6[%c5_52, %c9_53, %c0_54] : memref<26x32x32xf32, #tpu.memory_space<vmem>>, vector<16x16x32xf32>
    %56 = vector.shape_cast %55 : vector<16x16x32xf32> to vector<256x32xf32>
    %c5_55 = arith.constant 5 : index
    %c0_56 = arith.constant 0 : index
    %c0_57 = arith.constant 0 : index
    %57 = vector.load %arg4[%c5_55, %c0_56, %c0_57] : memref<27x32x32xbf16, #tpu.memory_space<vmem>>, vector<1x32x32xbf16>
    %58 = vector.shape_cast %57 : vector<1x32x32xbf16> to vector<32x32xbf16>
    %cst_58 = arith.constant dense<0.000000e+00> : vector<256x32xf32>
    %59 = tpu.matmul %56, %58, %cst_58 {dimension_numbers = #tpu.dot_dimension_numbers<[1], [0], [0], [1], [0, 0, 1, 1], [], []>} : vector<256x32xf32>, vector<32x32xbf16>, vector<256x32xf32> -> vector<256x32xf32>
    %60 = arith.addf %54, %59 : vector<256x32xf32>
    %c6 = arith.constant 6 : index
    %c7_59 = arith.constant 7 : index
    %c0_60 = arith.constant 0 : index
    %61 = vector.load %arg6[%c6, %c7_59, %c0_60] : memref<26x32x32xf32, #tpu.memory_space<vmem>>, vector<16x16x32xf32>
    %62 = vector.shape_cast %61 : vector<16x16x32xf32> to vector<256x32xf32>
    %c6_61 = arith.constant 6 : index
    %c0_62 = arith.constant 0 : index
    %c0_63 = arith.constant 0 : index
    %63 = vector.load %arg4[%c6_61, %c0_62, %c0_63] : memref<27x32x32xbf16, #tpu.memory_space<vmem>>, vector<1x32x32xbf16>
    %64 = vector.shape_cast %63 : vector<1x32x32xbf16> to vector<32x32xbf16>
    %cst_64 = arith.constant dense<0.000000e+00> : vector<256x32xf32>
    %65 = tpu.matmul %62, %64, %cst_64 {dimension_numbers = #tpu.dot_dimension_numbers<[1], [0], [0], [1], [0, 0, 1, 1], [], []>} : vector<256x32xf32>, vector<32x32xbf16>, vector<256x32xf32> -> vector<256x32xf32>
    %66 = arith.addf %60, %65 : vector<256x32xf32>
    %c6_65 = arith.constant 6 : index
    %c8_66 = arith.constant 8 : index
    %c0_67 = arith.constant 0 : index
    %67 = vector.load %arg6[%c6_65, %c8_66, %c0_67] : memref<26x32x32xf32, #tpu.memory_space<vmem>>, vector<16x16x32xf32>
    %68 = vector.shape_cast %67 : vector<16x16x32xf32> to vector<256x32xf32>
    %c7_68 = arith.constant 7 : index
    %c0_69 = arith.constant 0 : index
    %c0_70 = arith.constant 0 : index
    %69 = vector.load %arg4[%c7_68, %c0_69, %c0_70] : memref<27x32x32xbf16, #tpu.memory_space<vmem>>, vector<1x32x32xbf16>
    %70 = vector.shape_cast %69 : vector<1x32x32xbf16> to vector<32x32xbf16>
    %cst_71 = arith.constant dense<0.000000e+00> : vector<256x32xf32>
    %71 = tpu.matmul %68, %70, %cst_71 {dimension_numbers = #tpu.dot_dimension_numbers<[1], [0], [0], [1], [0, 0, 1, 1], [], []>} : vector<256x32xf32>, vector<32x32xbf16>, vector<256x32xf32> -> vector<256x32xf32>
    %72 = arith.addf %66, %71 : vector<256x32xf32>
    %c6_72 = arith.constant 6 : index
    %c9_73 = arith.constant 9 : index
    %c0_74 = arith.constant 0 : index
    %73 = vector.load %arg6[%c6_72, %c9_73, %c0_74] : memref<26x32x32xf32, #tpu.memory_space<vmem>>, vector<16x16x32xf32>
    %74 = vector.shape_cast %73 : vector<16x16x32xf32> to vector<256x32xf32>
    %c8_75 = arith.constant 8 : index
    %c0_76 = arith.constant 0 : index
    %c0_77 = arith.constant 0 : index
    %75 = vector.load %arg4[%c8_75, %c0_76, %c0_77] : memref<27x32x32xbf16, #tpu.memory_space<vmem>>, vector<1x32x32xbf16>
    %76 = vector.shape_cast %75 : vector<1x32x32xbf16> to vector<32x32xbf16>
    %cst_78 = arith.constant dense<0.000000e+00> : vector<256x32xf32>
    %77 = tpu.matmul %74, %76, %cst_78 {dimension_numbers = #tpu.dot_dimension_numbers<[1], [0], [0], [1], [0, 0, 1, 1], [], []>} : vector<256x32xf32>, vector<32x32xbf16>, vector<256x32xf32> -> vector<256x32xf32>
    %78 = arith.addf %72, %77 : vector<256x32xf32>
    %c2_79 = arith.constant 2 : index
    %c5_80 = arith.constant 5 : index
    %c0_81 = arith.constant 0 : index
    %79 = vector.load %arg6[%c2_79, %c5_80, %c0_81] : memref<26x32x32xf32, #tpu.memory_space<vmem>>, vector<16x16x32xf32>
    %80 = vector.shape_cast %79 : vector<16x16x32xf32> to vector<256x32xf32>
    %c9_82 = arith.constant 9 : index
    %c0_83 = arith.constant 0 : index
    %c0_84 = arith.constant 0 : index
    %81 = vector.load %arg4[%c9_82, %c0_83, %c0_84] : memref<27x32x32xbf16, #tpu.memory_space<vmem>>, vector<1x32x32xbf16>
    %82 = vector.shape_cast %81 : vector<1x32x32xbf16> to vector<32x32xbf16>
    %cst_85 = arith.constant dense<0.000000e+00> : vector<256x32xf32>
    %83 = tpu.matmul %80, %82, %cst_85 {dimension_numbers = #tpu.dot_dimension_numbers<[1], [0], [0], [1], [0, 0, 1, 1], [], []>} : vector<256x32xf32>, vector<32x32xbf16>, vector<256x32xf32> -> vector<256x32xf32>
    %84 = arith.addf %78, %83 : vector<256x32xf32>
    %c2_86 = arith.constant 2 : index
    %c8_87 = arith.constant 8 : index
    %c0_88 = arith.constant 0 : index
    %85 = vector.load %arg6[%c2_86, %c8_87, %c0_88] : memref<26x32x32xf32, #tpu.memory_space<vmem>>, vector<16x16x32xf32>
    %86 = vector.shape_cast %85 : vector<16x16x32xf32> to vector<256x32xf32>
    %c10 = arith.constant 10 : index
    %c0_89 = arith.constant 0 : index
    %c0_90 = arith.constant 0 : index
    %87 = vector.load %arg4[%c10, %c0_89, %c0_90] : memref<27x32x32xbf16, #tpu.memory_space<vmem>>, vector<1x32x32xbf16>
    %88 = vector.shape_cast %87 : vector<1x32x32xbf16> to vector<32x32xbf16>
    %cst_91 = arith.constant dense<0.000000e+00> : vector<256x32xf32>
    %89 = tpu.matmul %86, %88, %cst_91 {dimension_numbers = #tpu.dot_dimension_numbers<[1], [0], [0], [1], [0, 0, 1, 1], [], []>} : vector<256x32xf32>, vector<32x32xbf16>, vector<256x32xf32> -> vector<256x32xf32>
    %90 = arith.addf %84, %89 : vector<256x32xf32>
    %c2_92 = arith.constant 2 : index
    %c11 = arith.constant 11 : index
    %c0_93 = arith.constant 0 : index
    %91 = vector.load %arg6[%c2_92, %c11, %c0_93] : memref<26x32x32xf32, #tpu.memory_space<vmem>>, vector<16x16x32xf32>
    %92 = vector.shape_cast %91 : vector<16x16x32xf32> to vector<256x32xf32>
    %c11_94 = arith.constant 11 : index
    %c0_95 = arith.constant 0 : index
    %c0_96 = arith.constant 0 : index
    %93 = vector.load %arg4[%c11_94, %c0_95, %c0_96] : memref<27x32x32xbf16, #tpu.memory_space<vmem>>, vector<1x32x32xbf16>
    %94 = vector.shape_cast %93 : vector<1x32x32xbf16> to vector<32x32xbf16>
    %cst_97 = arith.constant dense<0.000000e+00> : vector<256x32xf32>
    %95 = tpu.matmul %92, %94, %cst_97 {dimension_numbers = #tpu.dot_dimension_numbers<[1], [0], [0], [1], [0, 0, 1, 1], [], []>} : vector<256x32xf32>, vector<32x32xbf16>, vector<256x32xf32> -> vector<256x32xf32>
    %96 = arith.addf %90, %95 : vector<256x32xf32>
    %c5_98 = arith.constant 5 : index
    %c5_99 = arith.constant 5 : index
    %c0_100 = arith.constant 0 : index
    %97 = vector.load %arg6[%c5_98, %c5_99, %c0_100] : memref<26x32x32xf32, #tpu.memory_space<vmem>>, vector<16x16x32xf32>
    %98 = vector.shape_cast %97 : vector<16x16x32xf32> to vector<256x32xf32>
    %c12 = arith.constant 12 : index
    %c0_101 = arith.constant 0 : index
    %c0_102 = arith.constant 0 : index
    %99 = vector.load %arg4[%c12, %c0_101, %c0_102] : memref<27x32x32xbf16, #tpu.memory_space<vmem>>, vector<1x32x32xbf16>
    %100 = vector.shape_cast %99 : vector<1x32x32xbf16> to vector<32x32xbf16>
    %cst_103 = arith.constant dense<0.000000e+00> : vector<256x32xf32>
    %101 = tpu.matmul %98, %100, %cst_103 {dimension_numbers = #tpu.dot_dimension_numbers<[1], [0], [0], [1], [0, 0, 1, 1], [], []>} : vector<256x32xf32>, vector<32x32xbf16>, vector<256x32xf32> -> vector<256x32xf32>
    %102 = arith.addf %96, %101 : vector<256x32xf32>
    %c5_104 = arith.constant 5 : index
    %c8_105 = arith.constant 8 : index
    %c0_106 = arith.constant 0 : index
    %103 = vector.load %arg6[%c5_104, %c8_105, %c0_106] : memref<26x32x32xf32, #tpu.memory_space<vmem>>, vector<16x16x32xf32>
    %104 = vector.shape_cast %103 : vector<16x16x32xf32> to vector<256x32xf32>
    %c13 = arith.constant 13 : index
    %c0_107 = arith.constant 0 : index
    %c0_108 = arith.constant 0 : index
    %105 = vector.load %arg4[%c13, %c0_107, %c0_108] : memref<27x32x32xbf16, #tpu.memory_space<vmem>>, vector<1x32x32xbf16>
    %106 = vector.shape_cast %105 : vector<1x32x32xbf16> to vector<32x32xbf16>
    %cst_109 = arith.constant dense<0.000000e+00> : vector<256x32xf32>
    %107 = tpu.matmul %104, %106, %cst_109 {dimension_numbers = #tpu.dot_dimension_numbers<[1], [0], [0], [1], [0, 0, 1, 1], [], []>} : vector<256x32xf32>, vector<32x32xbf16>, vector<256x32xf32> -> vector<256x32xf32>
    %108 = arith.addf %102, %107 : vector<256x32xf32>
    %c5_110 = arith.constant 5 : index
    %c11_111 = arith.constant 11 : index
    %c0_112 = arith.constant 0 : index
    %109 = vector.load %arg6[%c5_110, %c11_111, %c0_112] : memref<26x32x32xf32, #tpu.memory_space<vmem>>, vector<16x16x32xf32>
    %110 = vector.shape_cast %109 : vector<16x16x32xf32> to vector<256x32xf32>
    %c14 = arith.constant 14 : index
    %c0_113 = arith.constant 0 : index
    %c0_114 = arith.constant 0 : index
    %111 = vector.load %arg4[%c14, %c0_113, %c0_114] : memref<27x32x32xbf16, #tpu.memory_space<vmem>>, vector<1x32x32xbf16>
    %112 = vector.shape_cast %111 : vector<1x32x32xbf16> to vector<32x32xbf16>
    %cst_115 = arith.constant dense<0.000000e+00> : vector<256x32xf32>
    %113 = tpu.matmul %110, %112, %cst_115 {dimension_numbers = #tpu.dot_dimension_numbers<[1], [0], [0], [1], [0, 0, 1, 1], [], []>} : vector<256x32xf32>, vector<32x32xbf16>, vector<256x32xf32> -> vector<256x32xf32>
    %114 = arith.addf %108, %113 : vector<256x32xf32>
    %c8_116 = arith.constant 8 : index
    %c5_117 = arith.constant 5 : index
    %c0_118 = arith.constant 0 : index
    %115 = vector.load %arg6[%c8_116, %c5_117, %c0_118] : memref<26x32x32xf32, #tpu.memory_space<vmem>>, vector<16x16x32xf32>
    %116 = vector.shape_cast %115 : vector<16x16x32xf32> to vector<256x32xf32>
    %c15 = arith.constant 15 : index
    %c0_119 = arith.constant 0 : index
    %c0_120 = arith.constant 0 : index
    %117 = vector.load %arg4[%c15, %c0_119, %c0_120] : memref<27x32x32xbf16, #tpu.memory_space<vmem>>, vector<1x32x32xbf16>
    %118 = vector.shape_cast %117 : vector<1x32x32xbf16> to vector<32x32xbf16>
    %cst_121 = arith.constant dense<0.000000e+00> : vector<256x32xf32>
    %119 = tpu.matmul %116, %118, %cst_121 {dimension_numbers = #tpu.dot_dimension_numbers<[1], [0], [0], [1], [0, 0, 1, 1], [], []>} : vector<256x32xf32>, vector<32x32xbf16>, vector<256x32xf32> -> vector<256x32xf32>
    %120 = arith.addf %114, %119 : vector<256x32xf32>
    %c8_122 = arith.constant 8 : index
    %c8_123 = arith.constant 8 : index
    %c0_124 = arith.constant 0 : index
    %121 = vector.load %arg6[%c8_122, %c8_123, %c0_124] : memref<26x32x32xf32, #tpu.memory_space<vmem>>, vector<16x16x32xf32>
    %122 = vector.shape_cast %121 : vector<16x16x32xf32> to vector<256x32xf32>
    %c16 = arith.constant 16 : index
    %c0_125 = arith.constant 0 : index
    %c0_126 = arith.constant 0 : index
    %123 = vector.load %arg4[%c16, %c0_125, %c0_126] : memref<27x32x32xbf16, #tpu.memory_space<vmem>>, vector<1x32x32xbf16>
    %124 = vector.shape_cast %123 : vector<1x32x32xbf16> to vector<32x32xbf16>
    %cst_127 = arith.constant dense<0.000000e+00> : vector<256x32xf32>
    %125 = tpu.matmul %122, %124, %cst_127 {dimension_numbers = #tpu.dot_dimension_numbers<[1], [0], [0], [1], [0, 0, 1, 1], [], []>} : vector<256x32xf32>, vector<32x32xbf16>, vector<256x32xf32> -> vector<256x32xf32>
    %126 = arith.addf %120, %125 : vector<256x32xf32>
    %c8_128 = arith.constant 8 : index
    %c11_129 = arith.constant 11 : index
    %c0_130 = arith.constant 0 : index
    %127 = vector.load %arg6[%c8_128, %c11_129, %c0_130] : memref<26x32x32xf32, #tpu.memory_space<vmem>>, vector<16x16x32xf32>
    %128 = vector.shape_cast %127 : vector<16x16x32xf32> to vector<256x32xf32>
    %c17 = arith.constant 17 : index
    %c0_131 = arith.constant 0 : index
    %c0_132 = arith.constant 0 : index
    %129 = vector.load %arg4[%c17, %c0_131, %c0_132] : memref<27x32x32xbf16, #tpu.memory_space<vmem>>, vector<1x32x32xbf16>
    %130 = vector.shape_cast %129 : vector<1x32x32xbf16> to vector<32x32xbf16>
    %cst_133 = arith.constant dense<0.000000e+00> : vector<256x32xf32>
    %131 = tpu.matmul %128, %130, %cst_133 {dimension_numbers = #tpu.dot_dimension_numbers<[1], [0], [0], [1], [0, 0, 1, 1], [], []>} : vector<256x32xf32>, vector<32x32xbf16>, vector<256x32xf32> -> vector<256x32xf32>
    %132 = arith.addf %126, %131 : vector<256x32xf32>
    %c0_134 = arith.constant 0 : index
    %c3_135 = arith.constant 3 : index
    %c0_136 = arith.constant 0 : index
    %133 = vector.load %arg6[%c0_134, %c3_135, %c0_136] : memref<26x32x32xf32, #tpu.memory_space<vmem>>, vector<16x16x32xf32>
    %134 = vector.shape_cast %133 : vector<16x16x32xf32> to vector<256x32xf32>
    %c18 = arith.constant 18 : index
    %c0_137 = arith.constant 0 : index
    %c0_138 = arith.constant 0 : index
    %135 = vector.load %arg4[%c18, %c0_137, %c0_138] : memref<27x32x32xbf16, #tpu.memory_space<vmem>>, vector<1x32x32xbf16>
    %136 = vector.shape_cast %135 : vector<1x32x32xbf16> to vector<32x32xbf16>
    %cst_139 = arith.constant dense<0.000000e+00> : vector<256x32xf32>
    %137 = tpu.matmul %134, %136, %cst_139 {dimension_numbers = #tpu.dot_dimension_numbers<[1], [0], [0], [1], [0, 0, 1, 1], [], []>} : vector<256x32xf32>, vector<32x32xbf16>, vector<256x32xf32> -> vector<256x32xf32>
    %138 = arith.addf %132, %137 : vector<256x32xf32>
    %c0_140 = arith.constant 0 : index
    %c8_141 = arith.constant 8 : index
    %c0_142 = arith.constant 0 : index
    %139 = vector.load %arg6[%c0_140, %c8_141, %c0_142] : memref<26x32x32xf32, #tpu.memory_space<vmem>>, vector<16x16x32xf32>
    %140 = vector.shape_cast %139 : vector<16x16x32xf32> to vector<256x32xf32>
    %c19 = arith.constant 19 : index
    %c0_143 = arith.constant 0 : index
    %c0_144 = arith.constant 0 : index
    %141 = vector.load %arg4[%c19, %c0_143, %c0_144] : memref<27x32x32xbf16, #tpu.memory_space<vmem>>, vector<1x32x32xbf16>
    %142 = vector.shape_cast %141 : vector<1x32x32xbf16> to vector<32x32xbf16>
    %cst_145 = arith.constant dense<0.000000e+00> : vector<256x32xf32>
    %143 = tpu.matmul %140, %142, %cst_145 {dimension_numbers = #tpu.dot_dimension_numbers<[1], [0], [0], [1], [0, 0, 1, 1], [], []>} : vector<256x32xf32>, vector<32x32xbf16>, vector<256x32xf32> -> vector<256x32xf32>
    %144 = arith.addf %138, %143 : vector<256x32xf32>
    %c0_146 = arith.constant 0 : index
    %c13_147 = arith.constant 13 : index
    %c0_148 = arith.constant 0 : index
    %145 = vector.load %arg6[%c0_146, %c13_147, %c0_148] : memref<26x32x32xf32, #tpu.memory_space<vmem>>, vector<16x16x32xf32>
    %146 = vector.shape_cast %145 : vector<16x16x32xf32> to vector<256x32xf32>
    %c20 = arith.constant 20 : index
    %c0_149 = arith.constant 0 : index
    %c0_150 = arith.constant 0 : index
    %147 = vector.load %arg4[%c20, %c0_149, %c0_150] : memref<27x32x32xbf16, #tpu.memory_space<vmem>>, vector<1x32x32xbf16>
    %148 = vector.shape_cast %147 : vector<1x32x32xbf16> to vector<32x32xbf16>
    %cst_151 = arith.constant dense<0.000000e+00> : vector<256x32xf32>
    %149 = tpu.matmul %146, %148, %cst_151 {dimension_numbers = #tpu.dot_dimension_numbers<[1], [0], [0], [1], [0, 0, 1, 1], [], []>} : vector<256x32xf32>, vector<32x32xbf16>, vector<256x32xf32> -> vector<256x32xf32>
    %150 = arith.addf %144, %149 : vector<256x32xf32>
    %c5_152 = arith.constant 5 : index
    %c3_153 = arith.constant 3 : index
    %c0_154 = arith.constant 0 : index
    %151 = vector.load %arg6[%c5_152, %c3_153, %c0_154] : memref<26x32x32xf32, #tpu.memory_space<vmem>>, vector<16x16x32xf32>
    %152 = vector.shape_cast %151 : vector<16x16x32xf32> to vector<256x32xf32>
    %c21_155 = arith.constant 21 : index
    %c0_156 = arith.constant 0 : index
    %c0_157 = arith.constant 0 : index
    %153 = vector.load %arg4[%c21_155, %c0_156, %c0_157] : memref<27x32x32xbf16, #tpu.memory_space<vmem>>, vector<1x32x32xbf16>
    %154 = vector.shape_cast %153 : vector<1x32x32xbf16> to vector<32x32xbf16>
    %cst_158 = arith.constant dense<0.000000e+00> : vector<256x32xf32>
    %155 = tpu.matmul %152, %154, %cst_158 {dimension_numbers = #tpu.dot_dimension_numbers<[1], [0], [0], [1], [0, 0, 1, 1], [], []>} : vector<256x32xf32>, vector<32x32xbf16>, vector<256x32xf32> -> vector<256x32xf32>
    %156 = arith.addf %150, %155 : vector<256x32xf32>
    %c5_159 = arith.constant 5 : index
    %c8_160 = arith.constant 8 : index
    %c0_161 = arith.constant 0 : index
    %157 = vector.load %arg6[%c5_159, %c8_160, %c0_161] : memref<26x32x32xf32, #tpu.memory_space<vmem>>, vector<16x16x32xf32>
    %158 = vector.shape_cast %157 : vector<16x16x32xf32> to vector<256x32xf32>
    %c22 = arith.constant 22 : index
    %c0_162 = arith.constant 0 : index
    %c0_163 = arith.constant 0 : index
    %159 = vector.load %arg4[%c22, %c0_162, %c0_163] : memref<27x32x32xbf16, #tpu.memory_space<vmem>>, vector<1x32x32xbf16>
    %160 = vector.shape_cast %159 : vector<1x32x32xbf16> to vector<32x32xbf16>
    %cst_164 = arith.constant dense<0.000000e+00> : vector<256x32xf32>
    %161 = tpu.matmul %158, %160, %cst_164 {dimension_numbers = #tpu.dot_dimension_numbers<[1], [0], [0], [1], [0, 0, 1, 1], [], []>} : vector<256x32xf32>, vector<32x32xbf16>, vector<256x32xf32> -> vector<256x32xf32>
    %162 = arith.addf %156, %161 : vector<256x32xf32>
    %c5_165 = arith.constant 5 : index
    %c13_166 = arith.constant 13 : index
    %c0_167 = arith.constant 0 : index
    %163 = vector.load %arg6[%c5_165, %c13_166, %c0_167] : memref<26x32x32xf32, #tpu.memory_space<vmem>>, vector<16x16x32xf32>
    %164 = vector.shape_cast %163 : vector<16x16x32xf32> to vector<256x32xf32>
    %c23 = arith.constant 23 : index
    %c0_168 = arith.constant 0 : index
    %c0_169 = arith.constant 0 : index
    %165 = vector.load %arg4[%c23, %c0_168, %c0_169] : memref<27x32x32xbf16, #tpu.memory_space<vmem>>, vector<1x32x32xbf16>
    %166 = vector.shape_cast %165 : vector<1x32x32xbf16> to vector<32x32xbf16>
    %cst_170 = arith.constant dense<0.000000e+00> : vector<256x32xf32>
    %167 = tpu.matmul %164, %166, %cst_170 {dimension_numbers = #tpu.dot_dimension_numbers<[1], [0], [0], [1], [0, 0, 1, 1], [], []>} : vector<256x32xf32>, vector<32x32xbf16>, vector<256x32xf32> -> vector<256x32xf32>
    %168 = arith.addf %162, %167 : vector<256x32xf32>
    %c10_171 = arith.constant 10 : index
    %c3_172 = arith.constant 3 : index
    %c0_173 = arith.constant 0 : index
    %169 = vector.load %arg6[%c10_171, %c3_172, %c0_173] : memref<26x32x32xf32, #tpu.memory_space<vmem>>, vector<16x16x32xf32>
    %170 = vector.shape_cast %169 : vector<16x16x32xf32> to vector<256x32xf32>
    %c24_174 = arith.constant 24 : index
    %c0_175 = arith.constant 0 : index
    %c0_176 = arith.constant 0 : index
    %171 = vector.load %arg4[%c24_174, %c0_175, %c0_176] : memref<27x32x32xbf16, #tpu.memory_space<vmem>>, vector<1x32x32xbf16>
    %172 = vector.shape_cast %171 : vector<1x32x32xbf16> to vector<32x32xbf16>
    %cst_177 = arith.constant dense<0.000000e+00> : vector<256x32xf32>
    %173 = tpu.matmul %170, %172, %cst_177 {dimension_numbers = #tpu.dot_dimension_numbers<[1], [0], [0], [1], [0, 0, 1, 1], [], []>} : vector<256x32xf32>, vector<32x32xbf16>, vector<256x32xf32> -> vector<256x32xf32>
    %174 = arith.addf %168, %173 : vector<256x32xf32>
    %c10_178 = arith.constant 10 : index
    %c8_179 = arith.constant 8 : index
    %c0_180 = arith.constant 0 : index
    %175 = vector.load %arg6[%c10_178, %c8_179, %c0_180] : memref<26x32x32xf32, #tpu.memory_space<vmem>>, vector<16x16x32xf32>
    %176 = vector.shape_cast %175 : vector<16x16x32xf32> to vector<256x32xf32>
    %c25 = arith.constant 25 : index
    %c0_181 = arith.constant 0 : index
    %c0_182 = arith.constant 0 : index
    %177 = vector.load %arg4[%c25, %c0_181, %c0_182] : memref<27x32x32xbf16, #tpu.memory_space<vmem>>, vector<1x32x32xbf16>
    %178 = vector.shape_cast %177 : vector<1x32x32xbf16> to vector<32x32xbf16>
    %cst_183 = arith.constant dense<0.000000e+00> : vector<256x32xf32>
    %179 = tpu.matmul %176, %178, %cst_183 {dimension_numbers = #tpu.dot_dimension_numbers<[1], [0], [0], [1], [0, 0, 1, 1], [], []>} : vector<256x32xf32>, vector<32x32xbf16>, vector<256x32xf32> -> vector<256x32xf32>
    %180 = arith.addf %174, %179 : vector<256x32xf32>
    %c10_184 = arith.constant 10 : index
    %c13_185 = arith.constant 13 : index
    %c0_186 = arith.constant 0 : index
    %181 = vector.load %arg6[%c10_184, %c13_185, %c0_186] : memref<26x32x32xf32, #tpu.memory_space<vmem>>, vector<16x16x32xf32>
    %182 = vector.shape_cast %181 : vector<16x16x32xf32> to vector<256x32xf32>
    %c26 = arith.constant 26 : index
    %c0_187 = arith.constant 0 : index
    %c0_188 = arith.constant 0 : index
    %183 = vector.load %arg4[%c26, %c0_187, %c0_188] : memref<27x32x32xbf16, #tpu.memory_space<vmem>>, vector<1x32x32xbf16>
    %184 = vector.shape_cast %183 : vector<1x32x32xbf16> to vector<32x32xbf16>
    %cst_189 = arith.constant dense<0.000000e+00> : vector<256x32xf32>
    %185 = tpu.matmul %182, %184, %cst_189 {dimension_numbers = #tpu.dot_dimension_numbers<[1], [0], [0], [1], [0, 0, 1, 1], [], []>} : vector<256x32xf32>, vector<32x32xbf16>, vector<256x32xf32> -> vector<256x32xf32>
    %186 = arith.addf %180, %185 : vector<256x32xf32>
    %187 = vector.extract_strided_slice %186 {offsets = [0, 0], sizes = [64, 32], strides = [1, 1]} : vector<256x32xf32> to vector<64x32xf32>
    %188 = vector.extract_strided_slice %186 {offsets = [64, 0], sizes = [64, 32], strides = [1, 1]} : vector<256x32xf32> to vector<64x32xf32>
    %189 = vector.extract_strided_slice %186 {offsets = [128, 0], sizes = [64, 32], strides = [1, 1]} : vector<256x32xf32> to vector<64x32xf32>
    %190 = vector.extract_strided_slice %186 {offsets = [192, 0], sizes = [64, 32], strides = [1, 1]} : vector<256x32xf32> to vector<64x32xf32>
    %191 = tpu.concatenate %187, %188, %189, %190 in 1 : vector<64x32xf32>, vector<64x32xf32>, vector<64x32xf32>, vector<64x32xf32> -> vector<64x128xf32>
    %c0_190 = arith.constant 0 : index
    %c0_191 = arith.constant 0 : index
    %c0_192 = arith.constant 0 : index
    %192 = vector.load %arg5[%c0_190, %c0_191, %c0_192] : memref<1x64x128xf32, #tpu.memory_space<vmem>>, vector<1x64x128xf32>
    %193 = vector.shape_cast %192 : vector<1x64x128xf32> to vector<64x128xf32>
    %194 = vector.shape_cast %191 : vector<64x128xf32> to vector<1x64x128xf32>
    tpu.vector_store %arg5[%c0_190, %c0_191, %c0_192], %194 {strides = array<i32>} : memref<1x64x128xf32, #tpu.memory_space<vmem>>, vector<1x64x128xf32>,
    return
  }
  func.func @transform_0(%arg0: i32) -> (i32, i32, i32) {
    %c0_i32 = arith.constant 0 : i32
    %c0_i32_0 = arith.constant 0 : i32
    %c0_i32_1 = arith.constant 0 : i32
    return %arg0, %c0_i32, %c0_i32_0 : i32, i32, i32
  }
  func.func @transform_1(%arg0: i32) -> (i32, i32, i32) {
    %c0_i32 = arith.constant 0 : i32
    %c0_i32_0 = arith.constant 0 : i32
    %c0_i32_1 = arith.constant 0 : i32
    return %arg0, %c0_i32, %c0_i32_0 : i32, i32, i32
  }
  func.func @transform_2(%arg0: i32) -> (i32, i32) {
    %c0_i32 = arith.constant 0 : i32
    %c0_i32_0 = arith.constant 0 : i32
    %c0_i32_1 = arith.constant 0 : i32
    return %c0_i32, %c0_i32_0 : i32, i32
  }
  func.func @transform_3(%arg0: i32) -> (i32, i32, i32) {
    %c0_i32 = arith.constant 0 : i32
    %c0_i32_0 = arith.constant 0 : i32
    %c0_i32_1 = arith.constant 0 : i32
    %c0_i32_2 = arith.constant 0 : i32
    return %c0_i32, %c0_i32_0, %c0_i32_1 : i32, i32, i32
  }
  func.func @transform_4(%arg0: i32) -> (i32, i32, i32) {
    %c0_i32 = arith.constant 0 : i32
    %c0_i32_0 = arith.constant 0 : i32
    %c0_i32_1 = arith.constant 0 : i32
    return %arg0, %c0_i32, %c0_i32_0 : i32, i32, i32
  }
}

</mosaic_0001>

<bundles_post_ra>
// kernel: tpu_custom_call.1
= control target key start
LH: loop header
LB: loop body
LE: loop exit
PB: predicated region body
PF: predicated region fallthrough
CT: control target
= control target key end

     0   :  { %9 = vsyncpa [#allocation4], 0  ;;  %s18407_s0 = inlined_call_operand.vmem [shape: bf16[4,256,32], index: 0, kind: input, shape index: {}]   ;;  %s18408_s1 = inlined_call_operand.vmem [shape: s32[4,1,256], index: 1, kind: input, shape index: {}]   ;;  %s18409_s2 = inlined_call_operand.vmem [shape: bf16[64,32], index: 2, kind: input, shape index: {}]   ;;  %s18410_s3 = inlined_call_operand.vmem [shape: bf16[27,32,32], index: 3, kind: input, shape index: {}]   ;;  %s18411_s4 = inlined_call_operand.hbm [shape: f32[4,64,128], index: 4, kind: output, shape index: {}]  }
   0x1   :  { %11 = vsyncpa [#allocation4 + $0x1], 0  ;;  %s15474_s15 = smov 0   ;;  %s15476_s16 = smov 0  }
   0x2   :  { %s15478_s17 = smov 0   ;;  %s15480_s18 = smov 0  }
   0x3 LB: > { %s15495_s19 = sadd.s32 4294967295, %s15440_s18   ;;  %s10903_s20 = sadd.s32 4294967294, %s15440_s18   ;;  %s15440_s18 = sphi %s15480_s18, %s18691_s18   ;;  %s15436_s17 = sphi %s15478_s17, %s18690_s17   ;;  %s15432_s16 = sphi %s15476_s16, %s18689_s16   ;;  %s15428_s15 = sphi %s15474_s15, %s18688_s15  }
   0x4   : > { %s15499_s21 = sadd.s32 1, %s15440_s18   ;;  %s118_s22 = sadd.s32 1, %s15436_s17 }
   0x5   : > { %s115_s23 = ssub.s32 %s15440_s18, %s15499_s21  ;;  %p128_p0 = scmp.ne.s32.totalorder %s15436_s17, %s15432_s16 }
   0x6   : > { %p116_p1 = scmp.eq.s32.totalorder %s115_s23, 0  ;;  %p129_p2 = scmp.eq.s32.totalorder %s15495_s19, 3 }
   0x7   : > { %p134_p3 = scmp.ne.s32.totalorder %s15432_s16, %s15428_s15  ;;  %p135_p4 = scmp.eq.s32.totalorder %s10903_s20, 3 }
   0x8   : > { %s15510_s24 = scalar_select %p116_p1, %s15436_s17, %s118_s22  }
   0x9   : > { %p15512_p5 = por %p129_p2, %p128_p0  ;;  %p15516_p6 = por %p135_p4, %p134_p3 }
   0xa   : > { %p10906_p7 = scmp.ge.s32.totalorder %s15440_s18, 1  ;;  %p174_p8 = scmp.lt.s32.totalorder %s15440_s18, 5 }
   0xc   : > { %p175_p9 = pnand %p10906_p7, %p174_p8 }
   0xe   : > { %178 = sbr.rel (%p175_p9) target bundleno = 1742 (0x6ce), region = 36 }
  0x15   : > { %p204_p10 = scmp.lt.s32.totalorder %s15495_s19, 3  ;;  %v214_v0 = vlaneseq  ;;  %v15548_v9 = vld [vmem:[%s18409_s2] sm:$0xff]   ;;  %v15553_v10 = vld [vmem:[%s18409_s2 + $0x8] sm:$0xff]   ;;  %vm631_vm0 = vcmask 261120   ;;  %v15442_v11 = vmov 0.0   ;;  %v15273_v12 = vld [vmem:[%s18409_s2 + $0x10] sm:$0xff]  }
  0x16   : > { %906 = vst.msk [vmem:[#allocation2] sm:$0xff] %vm631_vm0, %v15442_v11  ;;  %907 = vst.msk [vmem:[#allocation2 + $0x8] sm:$0xff] %vm631_vm0, %v15442_v11  ;;  %12946 = vmatprep.subr.bf16.mxu0 %v15548_v9  ;;  %v15274_v13 = vld [vmem:[%s18409_s2 + $0x18] sm:$0xff]   ;;  %s15444_s14 = smov 64   ;;  %s201_s20 = sand.u32 1, %s15432_s16  }
  0x17   : > { %s205_s27 = scalar_select %p204_p10, %s15495_s19, 3  ;;  %v218_v1 = vshrl.u32 %v214_v0, 7  ;;  %908 = vst.msk [vmem:[#allocation2 + $0x10] sm:$0xff] %vm631_vm0, %v15442_v11  ;;  %909 = vst.msk [vmem:[#allocation2 + $0x18] sm:$0xff] %vm631_vm0, %v15442_v11  ;;  %12947 = vmatpush3.bf16.msra.mxu0 %v15548_v9  ;;  %v15716_v14 = vand.u32 127, %v214_v0 }
  0x18   : > { %910 = vst.msk [vmem:[#allocation2 + $0x20] sm:$0xff] %vm631_vm0, %v15442_v11  ;;  %911 = vst.msk [vmem:[#allocation2 + $0x28] sm:$0xff] %vm631_vm0, %v15442_v11  ;;  %12948 = vmatprep.subr.bf16.mxu0 %v15553_v10  ;;  %s10907_s22 = sshll.u32 %s201_s20, 6  ;;  %s15446_s8 = smov [#allocation3]  }
  0x19   : > { %s10910_s28 = sshll.u32 %s205_s27, 1  ;;  %v219_v2 = vsub.s32 0, %v218_v1  ;;  %s12006_s29 = sshll.u32 %s205_s27, 7  ;;  %v223_v4 = vsub.s32 1, %v218_v1  ;;  %912 = vst.msk [vmem:[#allocation2 + $0x30] sm:$0xff] %vm631_vm0, %v15442_v11  ;;  %913 = vst.msk [vmem:[#allocation2 + $0x38] sm:$0xff] %vm631_vm0, %v15442_v11 }
  0x1a   : > { %s212_s6 = scalar_lea.vmem %s18408_s1, %s10910_s28  ;;  %s15531_s9 = scalar_lea.vmem %s18407_s0, %s12006_s29  ;;  %914 = vst.msk [vmem:[#allocation2 + $0x40] sm:$0xff] %vm631_vm0, %v15442_v11  ;;  %915 = vst.msk [vmem:[#allocation2 + $0x48] sm:$0xff] %vm631_vm0, %v15442_v11 }
  0x1b   : > { %v216_v3 = vld [vmem:[%s212_s6] sm:$0x3]  ;;  %916 = vst.msk [vmem:[#allocation2 + $0x50] sm:$0xff] %vm631_vm0, %v15442_v11  ;;  %917 = vst.msk [vmem:[#allocation2 + $0x58] sm:$0xff] %vm631_vm0, %v15442_v11  ;;  %12949 = vmatpush3.bf16.msra.mxu0 %v15553_v10  ;;  %s15443_s27 = smov 32   ;;  %s18320_s23 = scalar_lea.vmem [#allocation3], %s10907_s22 }
  0x1c   : > { %v220_v5 = vrot.slane %v216_v3, %v219_v2  ;;  %v224_v7 = vrot.slane %v216_v3, %v223_v4  ;;  %918 = vst.msk [vmem:[#allocation2 + $0x60] sm:$0xff] %vm631_vm0, %v15442_v11  ;;  %919 = vst.msk [vmem:[#allocation2 + $0x68] sm:$0xff] %vm631_vm0, %v15442_v11  ;;  %12950 = vmatprep.subr.bf16.mxu0 %v15273_v12  ;;  %s12007_s28 = sshll.u32 %s15495_s19, 10  ;;  %s10829_s29 = sshll.u32 %s18320_s23, 4  ;;  %s18357_s29 = int_to_ptr.vmem [resolvable:$true] %s10829_s29 }
  0x1d   : > { %920 = vst.msk [vmem:[#allocation2 + $0x70] sm:$0xff] %vm631_vm0, %v15442_v11  ;;  %921 = vst.msk [vmem:[#allocation2 + $0x78] sm:$0xff] %vm631_vm0, %v15442_v11  ;;  %s18355_s6 = scalar_lea.hbm %s18411_s4, %s12007_s28  ;;  %s18366_s19 = scalar_lea.sflag [#allocation4], %s201_s20 }
  0x1e   : > { %v228_v6 = vrot.slane %v220_v5, %v219_v2  ;;  %v15533_v8 = vrot.slane %v224_v7, %v219_v2  ;;  %922 = vst.msk [vmem:[#allocation2 + $0x80] sm:$0xff] %vm631_vm0, %v15442_v11  ;;  %923 = vst.msk [vmem:[#allocation2 + $0x88] sm:$0xff] %vm631_vm0, %v15442_v11  ;;  %s15378_s7 = scalar_lea.vmem %s18357_s29, 1024 }
  0x1f   : > { %924 = vst.msk [vmem:[#allocation2 + $0x90] sm:$0xff] %vm631_vm0, %v15442_v11  ;;  %925 = vst.msk [vmem:[#allocation2 + $0x98] sm:$0xff] %vm631_vm0, %v15442_v11  ;;  %12951 = vmatpush3.bf16.msra.mxu0 %v15273_v12  ;;  %p15379_p11 = scmp.ne.s32.totalorder %s18357_s29, %s15378_s7 }
  0x20   : > { %238 = vbcast.lane.b32.xlu1 %v228_v6, 272  ;;  %230 = vbcast.lane.b32.xlu0 %v228_v6, 256  ;;  %927 = vst.msk [vmem:[#allocation2 + $0x2a0] sm:$0xff] %vm631_vm0, %v15442_v11  ;;  %928 = vst.msk [vmem:[#allocation2 + $0x2a8] sm:$0xff] %vm631_vm0, %v15442_v11 }
  0x21   : > { %929 = vst.msk [vmem:[#allocation2 + $0x2b0] sm:$0xff] %vm631_vm0, %v15442_v11  ;;  %930 = vst.msk [vmem:[#allocation2 + $0x2b8] sm:$0xff] %vm631_vm0, %v15442_v11  ;;  %12952 = vmatprep.subr.bf16.mxu0 %v15274_v13  ;;  %p15380_p12 = pnand %p15379_p11, %p15512_p5 }
  0x22   : > { %931 = vst.msk [vmem:[#allocation2 + $0x2c0] sm:$0xff] %vm631_vm0, %v15442_v11  ;;  %932 = vst.msk [vmem:[#allocation2 + $0x2c8] sm:$0xff] %vm631_vm0, %v15442_v11 }
  0x23   : > { %933 = vst.msk [vmem:[#allocation2 + $0x2d0] sm:$0xff] %vm631_vm0, %v15442_v11  ;;  %934 = vst.msk [vmem:[#allocation2 + $0x2d8] sm:$0xff] %vm631_vm0, %v15442_v11  ;;  %12953 = vmatpush3.bf16.msra.mxu0 %v15274_v13  ;;  %p15381_p13 = pneg %p15380_p12 }
  0x24   : > { %242 = vbcast.lane.b32.xlu1 %v228_v6, 280  ;;  %234 = vbcast.lane.b32.xlu0 %v228_v6, 264  ;;  %935 = vst.msk [vmem:[#allocation2 + $0x2e0] sm:$0xff] %vm631_vm0, %v15442_v11  ;;  %936 = vst.msk [vmem:[#allocation2 + $0x2e8] sm:$0xff] %vm631_vm0, %v15442_v11 }
  0x25   : > { %937 = vst.msk [vmem:[#allocation2 + $0x2f0] sm:$0xff] %vm631_vm0, %v15442_v11  ;;  %938 = vst.msk [vmem:[#allocation2 + $0x2f8] sm:$0xff] %vm631_vm0, %v15442_v11 }
  0x26   : > { %939 = vst.msk [vmem:[#allocation2 + $0x300] sm:$0xff] %vm631_vm0, %v15442_v11  ;;  %940 = vst.msk [vmem:[#allocation2 + $0x308] sm:$0xff] %vm631_vm0, %v15442_v11 }
  0x27   : > { %941 = vst.msk [vmem:[#allocation2 + $0x310] sm:$0xff] %vm631_vm0, %v15442_v11  ;;  %942 = vst.msk [vmem:[#allocation2 + $0x318] sm:$0xff] %vm631_vm0, %v15442_v11 }
  0x28   : > { %250 = vbcast.lane.b32.xlu1 %v228_v6, 296  ;;  %246 = vbcast.lane.b32.xlu0 %v228_v6, 288  ;;  %943 = vst.msk [vmem:[#allocation2 + $0x320] sm:$0xff] %vm631_vm0, %v15442_v11  ;;  %944 = vst.msk [vmem:[#allocation2 + $0x328] sm:$0xff] %vm631_vm0, %v15442_v11 }
  0x29   : > { %945 = vst.msk [vmem:[#allocation2 + $0x330] sm:$0xff] %vm631_vm0, %v15442_v11  ;;  %946 = vst.msk [vmem:[#allocation2 + $0x338] sm:$0xff] %vm631_vm0, %v15442_v11 }
  0x2a   : > { %948 = vst.msk [vmem:[#allocation2 + $0xa0] sm:$0xff] %vm631_vm0, %v15442_v11  ;;  %949 = vst.msk [vmem:[#allocation2 + $0xc0] sm:$0xff] %vm631_vm0, %v15442_v11 }
  0x2b   : > { %950 = vst.msk [vmem:[#allocation2 + $0xe0] sm:$0xff] %vm631_vm0, %v15442_v11  ;;  %951 = vst.msk [vmem:[#allocation2 + $0x100] sm:$0xff] %vm631_vm0, %v15442_v11 }
  0x2c   : > { %258 = vbcast.lane.b32.xlu1 %v228_v6, 312  ;;  %254 = vbcast.lane.b32.xlu0 %v228_v6, 304  ;;  %952 = vst.msk [vmem:[#allocation2 + $0x120] sm:$0xff] %vm631_vm0, %v15442_v11  ;;  %953 = vst.msk [vmem:[#allocation2 + $0x140] sm:$0xff] %vm631_vm0, %v15442_v11 }
  0x2d   : > { %954 = vst.msk [vmem:[#allocation2 + $0x160] sm:$0xff] %vm631_vm0, %v15442_v11  ;;  %955 = vst.msk [vmem:[#allocation2 + $0x180] sm:$0xff] %vm631_vm0, %v15442_v11 }
  0x2e   : > { %956 = vst.msk [vmem:[#allocation2 + $0x1a0] sm:$0xff] %vm631_vm0, %v15442_v11  ;;  %957 = vst.msk [vmem:[#allocation2 + $0x1c0] sm:$0xff] %vm631_vm0, %v15442_v11 }
  0x2f   : > { %958 = vst.msk [vmem:[#allocation2 + $0x1e0] sm:$0xff] %vm631_vm0, %v15442_v11  ;;  %959 = vst.msk [vmem:[#allocation2 + $0x200] sm:$0xff] %vm631_vm0, %v15442_v11 }
  0x30   : > { %266 = vbcast.lane.b32.xlu1 %v228_v6, 328  ;;  %262 = vbcast.lane.b32.xlu0 %v228_v6, 320  ;;  %960 = vst.msk [vmem:[#allocation2 + $0x220] sm:$0xff] %vm631_vm0, %v15442_v11  ;;  %961 = vst.msk [vmem:[#allocation2 + $0x240] sm:$0xff] %vm631_vm0, %v15442_v11 }
  0x31   : > { %962 = vst.msk [vmem:[#allocation2 + $0x260] sm:$0xff] %vm631_vm0, %v15442_v11  ;;  %963 = vst.msk [vmem:[#allocation2 + $0x280] sm:$0xff] %vm631_vm0, %v15442_v11 }
  0x32   : > { %964 = vst.msk [vmem:[#allocation2 + $0xb8] sm:$0xff] %vm631_vm0, %v15442_v11  ;;  %965 = vst.msk [vmem:[#allocation2 + $0xd8] sm:$0xff] %vm631_vm0, %v15442_v11 }
  0x33   : > { %966 = vst.msk [vmem:[#allocation2 + $0xf8] sm:$0xff] %vm631_vm0, %v15442_v11  ;;  %967 = vst.msk [vmem:[#allocation2 + $0x118] sm:$0xff] %vm631_vm0, %v15442_v11 }
  0x34   : > { %274 = vbcast.lane.b32.xlu1 %v228_v6, 344  ;;  %270 = vbcast.lane.b32.xlu0 %v228_v6, 336  ;;  %968 = vst.msk [vmem:[#allocation2 + $0x138] sm:$0xff] %vm631_vm0, %v15442_v11  ;;  %969 = vst.msk [vmem:[#allocation2 + $0x158] sm:$0xff] %vm631_vm0, %v15442_v11 }
  0x35   : > { %970 = vst.msk [vmem:[#allocation2 + $0x178] sm:$0xff] %vm631_vm0, %v15442_v11  ;;  %971 = vst.msk [vmem:[#allocation2 + $0x198] sm:$0xff] %vm631_vm0, %v15442_v11 }
  0x36   : > { %972 = vst.msk [vmem:[#allocation2 + $0x1b8] sm:$0xff] %vm631_vm0, %v15442_v11  ;;  %973 = vst.msk [vmem:[#allocation2 + $0x1d8] sm:$0xff] %vm631_vm0, %v15442_v11 }
  0x37   : > { %974 = vst.msk [vmem:[#allocation2 + $0x1f8] sm:$0xff] %vm631_vm0, %v15442_v11  ;;  %975 = vst.msk [vmem:[#allocation2 + $0x218] sm:$0xff] %vm631_vm0, %v15442_v11 }
  0x38   : > { %282 = vbcast.lane.b32.xlu1 %v228_v6, 360  ;;  %278 = vbcast.lane.b32.xlu0 %v228_v6, 352  ;;  %976 = vst.msk [vmem:[#allocation2 + $0x238] sm:$0xff] %vm631_vm0, %v15442_v11  ;;  %977 = vst.msk [vmem:[#allocation2 + $0x258] sm:$0xff] %vm631_vm0, %v15442_v11 }
  0x39   : > { %978 = vst.msk [vmem:[#allocation2 + $0x278] sm:$0xff] %vm631_vm0, %v15442_v11  ;;  %979 = vst.msk [vmem:[#allocation2 + $0x298] sm:$0xff] %vm631_vm0, %v15442_v11 }
  0x3c   : > { %290 = vbcast.lane.b32.xlu1 %v228_v6, 376  ;;  %286 = vbcast.lane.b32.xlu0 %v228_v6, 368 }
  0x40   : > { %301 = vbcast.lane.b32.xlu1 %v15533_v8, 264  ;;  %297 = vbcast.lane.b32.xlu0 %v15533_v8, 256 }
  0x44   : > { %309 = vbcast.lane.b32.xlu1 %v15533_v8, 280  ;;  %305 = vbcast.lane.b32.xlu0 %v15533_v8, 272 }
  0x48   : > { %317 = vbcast.lane.b32.xlu1 %v15533_v8, 296  ;;  %313 = vbcast.lane.b32.xlu0 %v15533_v8, 288 }
  0x4c   : > { %325 = vbcast.lane.b32.xlu1 %v15533_v8, 312  ;;  %321 = vbcast.lane.b32.xlu0 %v15533_v8, 304 }
  0x50   : > { %333 = vbcast.lane.b32.xlu1 %v15533_v8, 328  ;;  %329 = vbcast.lane.b32.xlu0 %v15533_v8, 320 }
  0x54   : > { %341 = vbcast.lane.b32.xlu1 %v15533_v8, 344  ;;  %337 = vbcast.lane.b32.xlu0 %v15533_v8, 336 }
  0x58   : > { %349 = vbcast.lane.b32.xlu1 %v15533_v8, 360  ;;  %345 = vbcast.lane.b32.xlu0 %v15533_v8, 352 }
  0x5c   : > { %357 = vbcast.lane.b32.xlu1 %v15533_v8, 376  ;;  %353 = vbcast.lane.b32.xlu0 %v15533_v8, 368 }
  0x92   : > { %v239_v15 = vpop.permute.xlu1 %238  ;;  %v231_v16 = vpop.permute.xlu0 %230 }
  0x93   : > { %vm361_vm1 = vcmp.eq.s32.totalorder %v239_v15, %v15716_v14  ;;  %vm359_vm2 = vcmp.eq.s32.totalorder %v231_v16, %v15716_v14 }
  0x94   : > { %v10913_v19 = vsel %vm361_vm1, 1.0, %v15442_v11  ;;  %v10911_v20 = vsel %vm359_vm2, 1.0, %v15442_v11 }
  0x96   : > { %v243_v17 = vpop.permute.xlu1 %242  ;;  %v235_v18 = vpop.permute.xlu0 %234 }
  0x97   : > { %vm362_vm3 = vcmp.eq.s32.totalorder %v243_v17, %v15716_v14  ;;  %vm360_vm4 = vcmp.eq.s32.totalorder %v235_v18, %v15716_v14 }
  0x98   : > { %v10914_v21 = vsel %vm362_vm3, 1.0, %v15442_v11  ;;  %v10912_v22 = vsel %vm360_vm4, 1.0, %v15442_v11 }
  0x99   : > { %v456_v23 = vpack.c.bf16 %v10914_v21, %v10913_v19  ;;  %v455_v24 = vpack.c.bf16 %v10912_v22, %v10911_v20 }
  0x9a   : > { %v251_v25 = vpop.permute.xlu1 %250  ;;  %v247_v26 = vpop.permute.xlu0 %246 }
  0x9b   : > { %601 = vrot.lane.b32.xlu1 %v456_v23, %s15443_s27  ;;  %vm364_vm5 = vcmp.eq.s32.totalorder %v251_v25, %v15716_v14  ;;  %599 = vrot.lane.b32.xlu0 %v455_v24, %s15443_s27  ;;  %vm363_vm6 = vcmp.eq.s32.totalorder %v247_v26, %v15716_v14 }
  0x9c   : > { %v10916_v27 = vsel %vm364_vm5, 1.0, %v15442_v11  ;;  %v10915_v28 = vsel %vm363_vm6, 1.0, %v15442_v11 }
  0x9d   : > { %v457_v29 = vpack.c.bf16 %v10916_v27, %v10915_v28 }
  0x9e   : > { %v259_v30 = vpop.permute.xlu1 %258  ;;  %v255_v31 = vpop.permute.xlu0 %254 }
  0x9f   : > { %vm366_vm7 = vcmp.eq.s32.totalorder %v259_v30, %v15716_v14  ;;  %vm365_vm8 = vcmp.eq.s32.totalorder %v255_v31, %v15716_v14  ;;  %603 = vrot.lane.b32.xlu0 %v457_v29, %s15443_s27 }
  0xa0   : > { %v10918_v32 = vsel %vm366_vm7, 1.0, %v15442_v11  ;;  %v10917_v33 = vsel %vm365_vm8, 1.0, %v15442_v11 }
  0xa1   : > { %v458_v34 = vpack.c.bf16 %v10918_v32, %v10917_v33  ;;  %v15275_v33 = vld [vmem:[%s15531_s9 + $0x8] sm:$0xff]  }
  0xa2   : > { %v267_v35 = vpop.permute.xlu1 %266  ;;  %v263_v36 = vpop.permute.xlu0 %262 }
  0xa3   : > { %vm368_vm9 = vcmp.eq.s32.totalorder %v267_v35, %v15716_v14  ;;  %vm367_vm10 = vcmp.eq.s32.totalorder %v263_v36, %v15716_v14  ;;  %605 = vrot.lane.b32.xlu1 %v458_v34, %s15443_s27  ;;  %v15276_v34 = vld [vmem:[%s15531_s9] sm:$0xff]  }
  0xa4   : > { %v10920_v37 = vsel %vm368_vm9, 1.0, %v15442_v11  ;;  %v10919_v38 = vsel %vm367_vm10, 1.0, %v15442_v11 }
  0xa5   : > { %v459_v39 = vpack.c.bf16 %v10920_v37, %v10919_v38  ;;  %v15277_v38 = vld [vmem:[%s15531_s9 + $0x10] sm:$0xff]  }
  0xa6   : > { %v275_v40 = vpop.permute.xlu1 %274  ;;  %v271_v41 = vpop.permute.xlu0 %270 }
  0xa7   : > { %vm370_vm11 = vcmp.eq.s32.totalorder %v275_v40, %v15716_v14  ;;  %vm369_vm12 = vcmp.eq.s32.totalorder %v271_v41, %v15716_v14  ;;  %607 = vrot.lane.b32.xlu0 %v459_v39, %s15443_s27  ;;  %v15278_v40 = vld [vmem:[%s15531_s9 + $0x18] sm:$0xff]  }
  0xa8   : > { %v10922_v42 = vsel %vm370_vm11, 1.0, %v15442_v11  ;;  %v10921_v43 = vsel %vm369_vm12, 1.0, %v15442_v11 }
  0xa9   : > { %v460_v44 = vpack.c.bf16 %v10922_v42, %v10921_v43  ;;  %v15279_v43 = vld [vmem:[%s15531_s9 + $0x20] sm:$0xff]  }
  0xaa   : > { %v283_v45 = vpop.permute.xlu1 %282  ;;  %v279_v46 = vpop.permute.xlu0 %278 }
  0xab   : > { %vm372_vm13 = vcmp.eq.s32.totalorder %v283_v45, %v15716_v14  ;;  %vm371_vm14 = vcmp.eq.s32.totalorder %v279_v46, %v15716_v14  ;;  %609 = vrot.lane.b32.xlu1 %v460_v44, %s15443_s27  ;;  %v15280_v46 = vld [vmem:[%s15531_s9 + $0x28] sm:$0xff]  }
  0xac   : > { %v10924_v47 = vsel %vm372_vm13, 1.0, %v15442_v11  ;;  %v10923_v48 = vsel %vm371_vm14, 1.0, %v15442_v11 }
  0xad   : > { %v461_v49 = vpack.c.bf16 %v10924_v47, %v10923_v48 }
  0xae   : > { %v291_v50 = vpop.permute.xlu1 %290  ;;  %v287_v51 = vpop.permute.xlu0 %286 }
  0xaf   : > { %vm374_vm15 = vcmp.eq.s32.totalorder %v291_v50, %v15716_v14  ;;  %vm373_vm1 = vcmp.eq.s32.totalorder %v287_v51, %v15716_v14  ;;  %611 = vrot.lane.b32.xlu0 %v461_v49, %s15443_s27  ;;  %v15281_v49 = vld [vmem:[%s15531_s9 + $0x30] sm:$0xff]  }
  0xb0   : > { %v10926_v52 = vsel %vm374_vm15, 1.0, %v15442_v11  ;;  %v10925_v53 = vsel %vm373_vm1, 1.0, %v15442_v11 }
  0xb1   : > { %v462_v54 = vpack.c.bf16 %v10926_v52, %v10925_v53  ;;  %v15282_v52 = vld [vmem:[%s15531_s9 + $0x38] sm:$0xff]  }
  0xb2   : > { %v302_v55 = vpop.permute.xlu1 %301  ;;  %v298_v56 = vpop.permute.xlu0 %297 }
  0xb3   : > { %vm376_vm2 = vcmp.eq.s32.totalorder %v302_v55, %v15716_v14  ;;  %vm375_vm3 = vcmp.eq.s32.totalorder %v298_v56, %v15716_v14  ;;  %613 = vrot.lane.b32.xlu1 %v462_v54, %s15443_s27  ;;  %v15283_v55 = vld [vmem:[%s15531_s9 + $0x40] sm:$0xff]  }
  0xb4   : > { %v10928_v57 = vsel %vm376_vm2, 1.0, %v15442_v11  ;;  %v10927_v58 = vsel %vm375_vm3, 1.0, %v15442_v11  ;;  %vm712_vm3 = vcmask 523264  }
  0xb5   : > { %v463_v59 = vpack.c.bf16 %v10928_v57, %v10927_v58  ;;  %v15284_v58 = vld [vmem:[%s15531_s9 + $0x48] sm:$0xff]  }
  0xb6   : > { %v310_v60 = vpop.permute.xlu1 %309  ;;  %v306_v61 = vpop.permute.xlu0 %305 }
  0xb7   : > { %vm378_vm4 = vcmp.eq.s32.totalorder %v310_v60, %v15716_v14  ;;  %vm377_vm5 = vcmp.eq.s32.totalorder %v306_v61, %v15716_v14  ;;  %615 = vrot.lane.b32.xlu0 %v463_v59, %s15443_s27  ;;  %v15285_v61 = vld [vmem:[%s15531_s9 + $0x50] sm:$0xff]  }
  0xb8   : > { %v10930_v62 = vsel %vm378_vm4, 1.0, %v15442_v11  ;;  %v10929_v63 = vsel %vm377_vm5, 1.0, %v15442_v11  ;;  %vm10798_vm4 = vcmask 785408  }
  0xb9   : > { %v464_v0 = vpack.c.bf16 %v10930_v62, %v10929_v63 }
  0xba   : > { %v318_v1 = vpop.permute.xlu1 %317  ;;  %v314_v2 = vpop.permute.xlu0 %313 }
  0xbb   : > { %vm380_vm6 = vcmp.eq.s32.totalorder %v318_v1, %v15716_v14  ;;  %vm379_vm7 = vcmp.eq.s32.totalorder %v314_v2, %v15716_v14  ;;  %617 = vrot.lane.b32.xlu1 %v464_v0, %s15443_s27  ;;  %v15286_v0 = vld [vmem:[%s15531_s9 + $0x58] sm:$0xff]  }
  0xbc   : > { %v10932_v3 = vsel %vm380_vm6, 1.0, %v15442_v11  ;;  %v10931_v4 = vsel %vm379_vm7, 1.0, %v15442_v11 }
  0xbd   : > { %v465_v5 = vpack.c.bf16 %v10932_v3, %v10931_v4  ;;  %v15287_v3 = vld [vmem:[%s15531_s9 + $0x60] sm:$0xff]  }
  0xbe   : > { %v326_v6 = vpop.permute.xlu1 %325  ;;  %v322_v7 = vpop.permute.xlu0 %321 }
  0xbf   : > { %vm382_vm8 = vcmp.eq.s32.totalorder %v326_v6, %v15716_v14  ;;  %vm381_vm9 = vcmp.eq.s32.totalorder %v322_v7, %v15716_v14  ;;  %619 = vrot.lane.b32.xlu0 %v465_v5, %s15443_s27  ;;  %v15288_v6 = vld [vmem:[%s15531_s9 + $0x68] sm:$0xff]  }
  0xc0   : > { %v10934_v8 = vsel %vm382_vm8, 1.0, %v15442_v11  ;;  %v10933_v9 = vsel %vm381_vm9, 1.0, %v15442_v11 }
  0xc1   : > { %v466_v10 = vpack.c.bf16 %v10934_v8, %v10933_v9  ;;  %v15289_v9 = vld [vmem:[%s15531_s9 + $0x70] sm:$0xff]  }
  0xc2   : > { %v334_v12 = vpop.permute.xlu1 %333  ;;  %v330_v13 = vpop.permute.xlu0 %329 }
  0xc3   : > { %vm384_vm10 = vcmp.eq.s32.totalorder %v334_v12, %v15716_v14  ;;  %vm383_vm11 = vcmp.eq.s32.totalorder %v330_v13, %v15716_v14  ;;  %621 = vrot.lane.b32.xlu1 %v466_v10, %s15443_s27  ;;  %v15290_v13 = vld [vmem:[%s15531_s9 + $0x78] sm:$0xff]   ;;  %s15382_s9 = sshll.u32 %s15446_s8, 4  ;;  %s15383_s9 = int_to_ptr.vmem [resolvable:$false] %s15382_s9 }
  0xc4   : > { %v10936_v15 = vsel %vm384_vm10, 1.0, %v15442_v11  ;;  %v10935_v16 = vsel %vm383_vm11, 1.0, %v15442_v11  ;;  %s15384_s10 = scalar_lea.vmem %s15383_s9, 2048  ;;  %p15385_p0 = scmp.lt.s32.totalorder %s18357_s29, %s15383_s9 }
  0xc5   : > { %v467_v17 = vpack.c.bf16 %v10936_v15, %v10935_v16  ;;  %p15386_p1 = scmp.lt.s32.totalorder %s15384_s10, %s15378_s7 }
  0xc6   : > { %v342_v18 = vpop.permute.xlu1 %341  ;;  %v338_v19 = vpop.permute.xlu0 %337 }
  0xc7   : > { %vm386_vm12 = vcmp.eq.s32.totalorder %v342_v18, %v15716_v14  ;;  %vm385_vm13 = vcmp.eq.s32.totalorder %v338_v19, %v15716_v14  ;;  %623 = vrot.lane.b32.xlu0 %v467_v17, %s15443_s27  ;;  %v15291_v17 = vld [vmem:[%s18410_s3 + $0x10] sm:$0xff]   ;;  %v15292_v18 = vld [vmem:[%s18410_s3 + $0xc0] sm:$0xff]   ;;  %v15293_v19 = vld [vmem:[%s18410_s3 + $0x18] sm:$0xff]   ;;  %p15387_p2 = por %p15386_p1, %p15385_p0 }
  0xc8   : > { %v10938_v20 = vsel %vm386_vm12, 1.0, %v15442_v11  ;;  %v10937_v21 = vsel %vm385_vm13, 1.0, %v15442_v11  ;;  %12986 = vmatprep.subr.bf16.mxu0 %v15291_v17  ;;  %13610 = vmatprep.subr.bf16.mxu1 %v15292_v18 }
  0xc9   : > { %v468_v22 = vpack.c.bf16 %v10938_v20, %v10937_v21  ;;  %v1049_v20 = vld [vmem:[#allocation2 + $0x88] sm:$0xff]  ;;  %13611 = vmatpush3.bf16.msra.mxu1 %v15292_v18  ;;  %p15388_p3 = pnand %p15387_p2, %p15381_p13 }
  0xca   : > { %v350_v23 = vpop.permute.xlu1 %349  ;;  %v346_v24 = vpop.permute.xlu0 %345  ;;  %v15294_v21 = vld [vmem:[%s18410_s3 + $0xc8] sm:$0xff]  }
  0xcb   : > { %vm388_vm14 = vcmp.eq.s32.totalorder %v350_v23, %v15716_v14  ;;  %vm387_vm15 = vcmp.eq.s32.totalorder %v346_v24, %v15716_v14  ;;  %625 = vrot.lane.b32.xlu1 %v468_v22, %s15443_s27  ;;  %13612 = vmatprep.subr.bf16.mxu1 %v15294_v21  ;;  %v1050_v22 = vld [vmem:[#allocation2 + $0x90] sm:$0xff]  ;;  %v15297_v24 = vld [vmem:[%s18410_s3] sm:$0xff]  }
  0xcc   : > { %v10940_v25 = vsel %vm388_vm14, 1.0, %v15442_v11  ;;  %v10939_v26 = vsel %vm387_vm15, 1.0, %v15442_v11  ;;  %v15295_v23 = vld [vmem:[%s18410_s3 + $0xd0] sm:$0xff]  }
  0xcd   : > { %v469_v27 = vpack.c.bf16 %v10940_v25, %v10939_v26  ;;  %13613 = vmatpush3.bf16.msra.mxu1 %v15294_v21  ;;  %v15298_v25 = vld [vmem:[%s18410_s3 + $0x8] sm:$0xff]   ;;  %v15872_v26 = vld [vmem:[%s18410_s3 + $0x20] sm:$0xff]  }
  0xce   : > { %v358_v28 = vpop.permute.xlu1 %357  ;;  %v354_v29 = vpop.permute.xlu0 %353  ;;  %13662 = vmatprep.subr.bf16.mxu1 %v15295_v23 }
  0xcf   : > { %vm390_vm1 = vcmp.eq.s32.totalorder %v358_v28, %v15716_v14  ;;  %vm389_vm2 = vcmp.eq.s32.totalorder %v354_v29, %v15716_v14  ;;  %627 = vrot.lane.b32.xlu0 %v469_v27, %s15443_s27 }
  0xd0   : > { %v10942_v30 = vsel %vm390_vm1, 1.0, %v15442_v11  ;;  %v10941_v31 = vsel %vm389_vm2, 1.0, %v15442_v11 }
  0xd1   : > { %v470_v32 = vpack.c.bf16 %v10942_v30, %v10941_v31 }
  0xd3   : > { %629 = vrot.lane.b32.xlu1 %v470_v32, %s15443_s27 }
 0x10d   : > { %v602_v35 = vpop.permute.xlu1 %601  ;;  %v600_v36 = vpop.permute.xlu0 %599 }
 0x10e   : > { %v637_v37 = vsel %vm631_vm0, %v15275_v33, %v602_v35  ;;  %v634_v14 = vsel %vm631_vm0, %v15276_v34, %v600_v36  ;;  %v15296_v36 = vld [vmem:[%s18410_s3 + $0xd8] sm:$0xff]  }
 0x10f   : > { %12954 = vmatprep.mubr.msk.bf16.mxu0 %vm712_vm3, %v634_v14 }
 0x110   : > { %12955 = vmatmul.mubr.msk.bf16.vlgmr.msra.gmra.mrb[0].mxu0 %vm712_vm3, %v637_v37 }
 0x111   : > { %v604_v11 = vpop.permute.xlu0 %603  ;;  %12987 = vmatpush3.bf16.msra.mxu0 %v15291_v17 }
 0x112   : > { %v640_v39 = vsel %vm631_vm0, %v15277_v38, %v604_v11  ;;  %12988 = vmatprep.subr.bf16.mxu0 %v15293_v19 }
 0x113   : > { %12958 = vmatprep.mubr.msk.bf16.mxu0 %vm712_vm3, %v640_v39 }
 0x115   : > { %v606_v41 = vpop.permute.xlu1 %605  ;;  %12989 = vmatpush3.bf16.msra.mxu0 %v15293_v19 }
 0x116   : > { %v643_v42 = vsel %vm631_vm0, %v15278_v40, %v606_v41  ;;  %13038 = vmatprep.subr.bf16.mxu0 %v15297_v24 }
 0x118   : > { %12959 = vmatmul.mubr.msk.bf16.gmra.mrb[4].mxu0 %vm712_vm3, %v643_v42  ;;  %v15906_v42 = vld [vmem:[%s18410_s3 + $0xe0] sm:$0xff]  }
 0x119   : > { %v608_v44 = vpop.permute.xlu0 %607 }
 0x11a   : > { %v646_v45 = vsel %vm631_vm0, %v15279_v43, %v608_v44 }
 0x11b   : > { %12962 = vmatprep.mubr.msk.bf16.mxu0 %vm712_vm3, %v646_v45 }
 0x11d   : > { %v610_v47 = vpop.permute.xlu1 %609 }
 0x11e   : > { %v649_v48 = vsel %vm631_vm0, %v15280_v46, %v610_v47 }
 0x120   : > { %12963 = vmatmul.mubr.msk.bf16.gmra.mrb[8].mxu0 %vm712_vm3, %v649_v48 }
 0x121   : > { %v612_v50 = vpop.permute.xlu0 %611 }
 0x122   : > { %v652_v51 = vsel %vm631_vm0, %v15281_v49, %v612_v50 }
 0x123   : > { %12966 = vmatprep.mubr.msk.bf16.mxu0 %vm712_vm3, %v652_v51 }
 0x125   : > { %v614_v53 = vpop.permute.xlu1 %613 }
 0x126   : > { %v655_v54 = vsel %vm631_vm0, %v15282_v52, %v614_v53 }
 0x128   : > { %12967 = vmatmul.mubr.msk.bf16.gmra.mrb[12].mxu0 %vm712_vm3, %v655_v54 }
 0x129   : > { %v616_v56 = vpop.permute.xlu0 %615 }
 0x12a   : > { %v658_v57 = vsel %vm631_vm0, %v15283_v55, %v616_v56 }
 0x12b   : > { %12970 = vmatprep.mubr.msk.bf16.mxu0 %vm712_vm3, %v658_v57 }
 0x12d   : > { %v618_v59 = vpop.permute.xlu1 %617 }
 0x12e   : > { %v661_v60 = vsel %vm631_vm0, %v15284_v58, %v618_v59 }
 0x130   : > { %12971 = vmatmul.mubr.msk.bf16.gmra.mrb[16].mxu0 %vm712_vm3, %v661_v60 }
 0x131   : > { %v620_v62 = vpop.permute.xlu0 %619 }
 0x132   : > { %v664_v63 = vsel %vm631_vm0, %v15285_v61, %v620_v62 }
 0x133   : > { %12974 = vmatprep.mubr.msk.bf16.mxu0 %vm712_vm3, %v664_v63 }
 0x135   : > { %v622_v1 = vpop.permute.xlu1 %621 }
 0x136   : > { %v667_v2 = vsel %vm631_vm0, %v15286_v0, %v622_v1 }
 0x138   : > { %12975 = vmatmul.mubr.msk.bf16.gmra.mrb[20].mxu0 %vm712_vm3, %v667_v2 }
 0x139   : > { %v624_v4 = vpop.permute.xlu0 %623 }
 0x13a   : > { %v670_v5 = vsel %vm631_vm0, %v15287_v3, %v624_v4 }
 0x13b   : > { %12978 = vmatprep.mubr.msk.bf16.mxu0 %vm712_vm3, %v670_v5 }
 0x13d   : > { %v626_v7 = vpop.permute.xlu1 %625 }
 0x13e   : > { %v673_v8 = vsel %vm631_vm0, %v15288_v6, %v626_v7 }
 0x140   : > { %12979 = vmatmul.mubr.msk.bf16.gmra.mrb[24].mxu0 %vm712_vm3, %v673_v8 }
 0x141   : > { %v628_v10 = vpop.permute.xlu0 %627 }
 0x142   : > { %v676_v12 = vsel %vm631_vm0, %v15289_v9, %v628_v10 }
 0x143   : > { %12982 = vmatprep.mubr.msk.bf16.mxu0 %vm712_vm3, %v676_v12 }
 0x145   : > { %v630_v15 = vpop.permute.xlu1 %629 }
 0x146   : > { %v679_v16 = vsel %vm631_vm0, %v15290_v13, %v630_v15 }
 0x148   : > { %12983 = vmatmul.mubr.msk.bf16.gmra.mrb[28].mxu0 %vm712_vm3, %v679_v16 }
 0x149   : > { %12990 = vmatprep.mubr.msk.f32.mxu0 %vm631_vm0, %v1049_v20 }
 0x150   : > { %12991 = vmatmul.mubr.msk.f32.vlgmr.msra.gmra.mrb[32].mxu0 %vm631_vm0, %v1050_v22 }
 0x151   : > { %13039 = vmatpush3.bf16.msra.mxu0 %v15297_v24 }
 0x152   : > { %13040 = vmatprep.subr.bf16.mxu0 %v15298_v25 }
 0x155   : > { %13041 = vmatpush3.bf16.msra.mxu0 %v15298_v25 }
 0x156   : > { %13090 = vmatprep.subr.bf16.mxu0 %v15872_v26 }
 0x1e3   : > { %v12956_v27 = vpop.f32.mrb[0].mxu0 }
 0x1e4   : > { %982 = vst.msk [vmem:[#allocation2 + $0xc8] sm:$0xff] %vm631_vm0, %v12956_v27  ;;  %v779_v28 = vpop.f32.mrb[1].mxu0 }
 0x1e5   : > { %980 = vst.msk [vmem:[#allocation2 + $0xa8] sm:$0xff] %vm631_vm0, %v779_v28  ;;  %v12957_v29 = vpop.f32.mrb[2].mxu0 }
 0x1e6   : > { %983 = vst.msk [vmem:[#allocation2 + $0xd0] sm:$0xff] %vm631_vm0, %v12957_v29  ;;  %v782_v30 = vpop.f32.mrb[3].mxu0 }
 0x1e7   : > { %981 = vst.msk [vmem:[#allocation2 + $0xb0] sm:$0xff] %vm631_vm0, %v782_v30 }
 0x1eb   : > { %v12960_v31 = vpop.f32.mrb[4].mxu0  ;;  %v15896_v11 = vld [vmem:[#allocation2 + $0xc8] sm:$0xff] }
 0x1ec   : > { %986 = vst.msk [vmem:[#allocation2 + $0x108] sm:$0xff] %vm631_vm0, %v12960_v31  ;;  %v795_v32 = vpop.f32.mrb[5].mxu0  ;;  %v15880_v33 = vld [vmem:[#allocation2 + $0xa8] sm:$0xff]  ;;  %18501 = vst [vmem:[#allocation7_spill] sm:$0xff] %v15896_v11 }
 0x1ed   : > { %v5390_v34 = vld [vmem:[#allocation2 + $0xa5] sm:$0xff]  ;;  %984 = vst.msk [vmem:[#allocation2 + $0xe8] sm:$0xff] %vm631_vm0, %v795_v32  ;;  %v12961_v35 = vpop.f32.mrb[6].mxu0  ;;  %12993 = vmatprep.mubr.msk.f32.mxu0 %vm631_vm0, %v15880_v33  ;;  %v15901_v40 = vld [vmem:[#allocation2 + $0xd0] sm:$0xff] }
 0x1ee   : > { %13614 = vmatprep.mubr.msk.f32.mxu1 %vm631_vm0, %v5390_v34  ;;  %987 = vst.msk [vmem:[#allocation2 + $0x110] sm:$0xff] %vm631_vm0, %v12961_v35  ;;  %v798_v37 = vpop.f32.mrb[7].mxu0  ;;  %v15890_v14 = vld [vmem:[#allocation2 + $0xb0] sm:$0xff]  ;;  %v5392_v39 = vld [vmem:[#allocation2 + $0xc5] sm:$0xff]  ;;  %18502 = vst [vmem:[#allocation8_spill] sm:$0xff] %v15901_v40 }
 0x1ef   : > { %18500 = vst [vmem:[#allocation6_spill] sm:$0xff] %v15890_v14  ;;  %v5391_v38 = vld [vmem:[#allocation2 + $0xad] sm:$0xff]  ;;  %985 = vst.msk [vmem:[#allocation2 + $0xf0] sm:$0xff] %vm631_vm0, %v798_v37  ;;  %12994 = vmatmul.mubr.msk.f32.gmra.mrb[34].mxu0 %vm631_vm0, %v15890_v14 }
 0x1f0   : > { %13615 = vmatmul.mubr.msk.f32.vlgmr.msra.gmra.mrb[0].mxu1 %vm631_vm0, %v5391_v38  ;;  %12996 = vmatprep.mubr.msk.f32.mxu0 %vm631_vm0, %v15896_v11  ;;  %v5393_v41 = vld [vmem:[#allocation2 + $0xcd] sm:$0xff] }
 0x1f1   : > { %13663 = vmatpush3.bf16.msra.mxu1 %v15295_v23  ;;  %13617 = vmatprep.mubr.msk.f32.mxu1 %vm631_vm0, %v5392_v39 }
 0x1f2   : > { %13664 = vmatprep.subr.bf16.mxu1 %v15296_v36 }
 0x1f3   : > { %v12964_v43 = vpop.f32.mrb[8].mxu0  ;;  %12997 = vmatmul.mubr.msk.f32.gmra.mrb[36].mxu0 %vm631_vm0, %v15901_v40  ;;  %v15926_v51 = vld [vmem:[#allocation2 + $0x108] sm:$0xff] }
 0x1f4   : > { %13618 = vmatmul.mubr.msk.f32.gmra.mrb[2].mxu1 %vm631_vm0, %v5393_v41  ;;  %990 = vst.msk [vmem:[#allocation2 + $0x148] sm:$0xff] %vm631_vm0, %v12964_v43  ;;  %v811_v44 = vpop.f32.mrb[9].mxu0  ;;  %v15912_v45 = vld [vmem:[#allocation2 + $0xe8] sm:$0xff]  ;;  %18505 = vst [vmem:[#allocation11_spill] sm:$0xff] %v15926_v51 }
 0x1f5   : > { %18503 = vst [vmem:[#allocation9_spill] sm:$0xff] %v15912_v45  ;;  %v5394_v46 = vld [vmem:[#allocation2 + $0xe5] sm:$0xff]  ;;  %13665 = vmatpush3.bf16.msra.mxu1 %v15296_v36  ;;  %988 = vst.msk [vmem:[#allocation2 + $0x128] sm:$0xff] %vm631_vm0, %v811_v44  ;;  %v12965_v47 = vpop.f32.mrb[10].mxu0  ;;  %12999 = vmatprep.mubr.msk.f32.mxu0 %vm631_vm0, %v15912_v45  ;;  %v15934_v53 = vld [vmem:[#allocation2 + $0x110] sm:$0xff] }
 0x1f6   : > { %13620 = vmatprep.mubr.msk.f32.mxu1 %vm631_vm0, %v5394_v46  ;;  %991 = vst.msk [vmem:[#allocation2 + $0x150] sm:$0xff] %vm631_vm0, %v12965_v47  ;;  %v814_v48 = vpop.f32.mrb[11].mxu0  ;;  %v15919_v49 = vld [vmem:[#allocation2 + $0xf0] sm:$0xff]  ;;  %13714 = vmatprep.subr.bf16.mxu1 %v15906_v42  ;;  %v15928_v52 = vld [vmem:[#allocation2 + $0x105] sm:$0xff]  ;;  %18506 = vst [vmem:[#allocation12_spill] sm:$0xff] %v15934_v53 }
 0x1f7   : > { %18504 = vst [vmem:[#allocation10_spill] sm:$0xff] %v15919_v49  ;;  %v5395_v50 = vld [vmem:[#allocation2 + $0xed] sm:$0xff]  ;;  %989 = vst.msk [vmem:[#allocation2 + $0x130] sm:$0xff] %vm631_vm0, %v814_v48  ;;  %13000 = vmatmul.mubr.msk.f32.gmra.mrb[38].mxu0 %vm631_vm0, %v15919_v49 }
 0x1f8   : > { %13621 = vmatmul.mubr.msk.f32.gmra.mrb[4].mxu1 %vm631_vm0, %v5395_v50  ;;  %13002 = vmatprep.mubr.msk.f32.mxu0 %vm631_vm0, %v15926_v51  ;;  %v15936_v54 = vld [vmem:[#allocation2 + $0x10d] sm:$0xff] }
 0x1f9   : > { %13623 = vmatprep.mubr.msk.f32.mxu1 %vm631_vm0, %v15928_v52 }
 0x1fb   : > { %v12968_v55 = vpop.f32.mrb[12].mxu0  ;;  %13003 = vmatmul.mubr.msk.f32.gmra.mrb[40].mxu0 %vm631_vm0, %v15934_v53  ;;  %v15962_v63 = vld [vmem:[#allocation2 + $0x148] sm:$0xff] }
 0x1fc   : > { %13624 = vmatmul.mubr.msk.f32.gmra.mrb[6].mxu1 %vm631_vm0, %v15936_v54  ;;  %994 = vst.msk [vmem:[#allocation2 + $0x188] sm:$0xff] %vm631_vm0, %v12968_v55  ;;  %v827_v56 = vpop.f32.mrb[13].mxu0  ;;  %v15943_v57 = vld [vmem:[#allocation2 + $0x128] sm:$0xff]  ;;  %18509 = vst [vmem:[#allocation15_spill] sm:$0xff] %v15962_v63 }
 0x1fd   : > { %18507 = vst [vmem:[#allocation13_spill] sm:$0xff] %v15943_v57  ;;  %v15945_v58 = vld [vmem:[#allocation2 + $0x125] sm:$0xff]  ;;  %992 = vst.msk [vmem:[#allocation2 + $0x168] sm:$0xff] %vm631_vm0, %v827_v56  ;;  %v12969_v59 = vpop.f32.mrb[14].mxu0  ;;  %13005 = vmatprep.mubr.msk.f32.mxu0 %vm631_vm0, %v15943_v57  ;;  %v15970_v1 = vld [vmem:[#allocation2 + $0x150] sm:$0xff] }
 0x1fe   : > { %13626 = vmatprep.mubr.msk.f32.mxu1 %vm631_vm0, %v15945_v58  ;;  %995 = vst.msk [vmem:[#allocation2 + $0x190] sm:$0xff] %vm631_vm0, %v12969_v59  ;;  %v830_v60 = vpop.f32.mrb[15].mxu0  ;;  %v15953_v61 = vld [vmem:[#allocation2 + $0x130] sm:$0xff]  ;;  %v15964_v0 = vld [vmem:[#allocation2 + $0x145] sm:$0xff]  ;;  %18510 = vst [vmem:[#allocation16_spill] sm:$0xff] %v15970_v1 }
 0x1ff   : > { %18508 = vst [vmem:[#allocation14_spill] sm:$0xff] %v15953_v61  ;;  %v15955_v62 = vld [vmem:[#allocation2 + $0x12d] sm:$0xff]  ;;  %993 = vst.msk [vmem:[#allocation2 + $0x170] sm:$0xff] %vm631_vm0, %v830_v60  ;;  %13006 = vmatmul.mubr.msk.f32.gmra.mrb[42].mxu0 %vm631_vm0, %v15953_v61 }
 0x200   : > { %13627 = vmatmul.mubr.msk.f32.gmra.mrb[8].mxu1 %vm631_vm0, %v15955_v62  ;;  %13008 = vmatprep.mubr.msk.f32.mxu0 %vm631_vm0, %v15962_v63  ;;  %v15972_v2 = vld [vmem:[#allocation2 + $0x14d] sm:$0xff] }
 0x201   : > { %13629 = vmatprep.mubr.msk.f32.mxu1 %vm631_vm0, %v15964_v0 }
 0x203   : > { %v12972_v3 = vpop.f32.mrb[16].mxu0  ;;  %13009 = vmatmul.mubr.msk.f32.gmra.mrb[44].mxu0 %vm631_vm0, %v15970_v1  ;;  %v15998_v12 = vld [vmem:[#allocation2 + $0x188] sm:$0xff] }
 0x204   : > { %13630 = vmatmul.mubr.msk.f32.gmra.mrb[10].mxu1 %vm631_vm0, %v15972_v2  ;;  %998 = vst.msk [vmem:[#allocation2 + $0x1c8] sm:$0xff] %vm631_vm0, %v12972_v3  ;;  %v843_v4 = vpop.f32.mrb[17].mxu0  ;;  %v15979_v5 = vld [vmem:[#allocation2 + $0x168] sm:$0xff]  ;;  %18513 = vst [vmem:[#allocation19_spill] sm:$0xff] %v15998_v12 }
 0x205   : > { %18511 = vst [vmem:[#allocation17_spill] sm:$0xff] %v15979_v5  ;;  %v15981_v6 = vld [vmem:[#allocation2 + $0x165] sm:$0xff]  ;;  %996 = vst.msk [vmem:[#allocation2 + $0x1a8] sm:$0xff] %vm631_vm0, %v843_v4  ;;  %v12973_v7 = vpop.f32.mrb[18].mxu0  ;;  %13011 = vmatprep.mubr.msk.f32.mxu0 %vm631_vm0, %v15979_v5  ;;  %v16006_v15 = vld [vmem:[#allocation2 + $0x190] sm:$0xff] }
 0x206   : > { %13632 = vmatprep.mubr.msk.f32.mxu1 %vm631_vm0, %v15981_v6  ;;  %999 = vst.msk [vmem:[#allocation2 + $0x1d0] sm:$0xff] %vm631_vm0, %v12973_v7  ;;  %v846_v8 = vpop.f32.mrb[19].mxu0  ;;  %v15989_v9 = vld [vmem:[#allocation2 + $0x170] sm:$0xff]  ;;  %v16000_v13 = vld [vmem:[#allocation2 + $0x185] sm:$0xff]  ;;  %18514 = vst [vmem:[#allocation20_spill] sm:$0xff] %v16006_v15 }
 0x207   : > { %18512 = vst [vmem:[#allocation18_spill] sm:$0xff] %v15989_v9  ;;  %v15991_v10 = vld [vmem:[#allocation2 + $0x16d] sm:$0xff]  ;;  %997 = vst.msk [vmem:[#allocation2 + $0x1b0] sm:$0xff] %vm631_vm0, %v846_v8  ;;  %13012 = vmatmul.mubr.msk.f32.gmra.mrb[46].mxu0 %vm631_vm0, %v15989_v9 }
 0x208   : > { %13633 = vmatmul.mubr.msk.f32.gmra.mrb[12].mxu1 %vm631_vm0, %v15991_v10  ;;  %13014 = vmatprep.mubr.msk.f32.mxu0 %vm631_vm0, %v15998_v12  ;;  %v16008_v16 = vld [vmem:[#allocation2 + $0x18d] sm:$0xff] }
 0x209   : > { %13635 = vmatprep.mubr.msk.f32.mxu1 %vm631_vm0, %v16000_v13 }
 0x20b   : > { %v12976_v17 = vpop.f32.mrb[20].mxu0  ;;  %13015 = vmatmul.mubr.msk.f32.gmra.mrb[48].mxu0 %vm631_vm0, %v16006_v15  ;;  %v16034_v25 = vld [vmem:[#allocation2 + $0x1c8] sm:$0xff] }
 0x20c   : > { %13636 = vmatmul.mubr.msk.f32.gmra.mrb[14].mxu1 %vm631_vm0, %v16008_v16  ;;  %1002 = vst.msk [vmem:[#allocation2 + $0x208] sm:$0xff] %vm631_vm0, %v12976_v17  ;;  %v859_v18 = vpop.f32.mrb[21].mxu0  ;;  %v16015_v19 = vld [vmem:[#allocation2 + $0x1a8] sm:$0xff]  ;;  %18517 = vst [vmem:[#allocation23_spill] sm:$0xff] %v16034_v25 }
 0x20d   : > { %18515 = vst [vmem:[#allocation21_spill] sm:$0xff] %v16015_v19  ;;  %v16017_v20 = vld [vmem:[#allocation2 + $0x1a5] sm:$0xff]  ;;  %1000 = vst.msk [vmem:[#allocation2 + $0x1e8] sm:$0xff] %vm631_vm0, %v859_v18  ;;  %v12977_v21 = vpop.f32.mrb[22].mxu0  ;;  %13017 = vmatprep.mubr.msk.f32.mxu0 %vm631_vm0, %v16015_v19  ;;  %v16042_v28 = vld [vmem:[#allocation2 + $0x1d0] sm:$0xff] }
 0x20e   : > { %13638 = vmatprep.mubr.msk.f32.mxu1 %vm631_vm0, %v16017_v20  ;;  %1003 = vst.msk [vmem:[#allocation2 + $0x210] sm:$0xff] %vm631_vm0, %v12977_v21  ;;  %v862_v22 = vpop.f32.mrb[23].mxu0  ;;  %v16025_v23 = vld [vmem:[#allocation2 + $0x1b0] sm:$0xff]  ;;  %v16036_v27 = vld [vmem:[#allocation2 + $0x1c5] sm:$0xff]  ;;  %18518 = vst [vmem:[#allocation24_spill] sm:$0xff] %v16042_v28 }
 0x20f   : > { %18516 = vst [vmem:[#allocation22_spill] sm:$0xff] %v16025_v23  ;;  %v16027_v24 = vld [vmem:[#allocation2 + $0x1ad] sm:$0xff]  ;;  %1001 = vst.msk [vmem:[#allocation2 + $0x1f0] sm:$0xff] %vm631_vm0, %v862_v22  ;;  %13018 = vmatmul.mubr.msk.f32.gmra.mrb[50].mxu0 %vm631_vm0, %v16025_v23 }
 0x210   : > { %13639 = vmatmul.mubr.msk.f32.gmra.mrb[16].mxu1 %vm631_vm0, %v16027_v24  ;;  %13020 = vmatprep.mubr.msk.f32.mxu0 %vm631_vm0, %v16034_v25  ;;  %v16044_v29 = vld [vmem:[#allocation2 + $0x1cd] sm:$0xff] }
 0x211   : > { %13641 = vmatprep.mubr.msk.f32.mxu1 %vm631_vm0, %v16036_v27  ;;  %v1013_v21 = vld [vmem:[#allocation2 + $0x87] sm:$0xff] }
 0x213   : > { %v12980_v30 = vpop.f32.mrb[24].mxu0  ;;  %13021 = vmatmul.mubr.msk.f32.gmra.mrb[52].mxu0 %vm631_vm0, %v16042_v28  ;;  %v16070_v39 = vld [vmem:[#allocation2 + $0x208] sm:$0xff] }
 0x214   : > { %13642 = vmatmul.mubr.msk.f32.gmra.mrb[18].mxu1 %vm631_vm0, %v16044_v29  ;;  %1006 = vst.msk [vmem:[#allocation2 + $0x248] sm:$0xff] %vm631_vm0, %v12980_v30  ;;  %v875_v31 = vpop.f32.mrb[25].mxu0  ;;  %v16051_v32 = vld [vmem:[#allocation2 + $0x1e8] sm:$0xff]  ;;  %18521 = vst [vmem:[#allocation27_spill] sm:$0xff] %v16070_v39 }
 0x215   : > { %18519 = vst [vmem:[#allocation25_spill] sm:$0xff] %v16051_v32  ;;  %v16053_v34 = vld [vmem:[#allocation2 + $0x1e5] sm:$0xff]  ;;  %1004 = vst.msk [vmem:[#allocation2 + $0x228] sm:$0xff] %vm631_vm0, %v875_v31  ;;  %v12981_v35 = vpop.f32.mrb[26].mxu0  ;;  %13023 = vmatprep.mubr.msk.f32.mxu0 %vm631_vm0, %v16051_v32  ;;  %v16078_v43 = vld [vmem:[#allocation2 + $0x210] sm:$0xff] }
 0x216   : > { %13644 = vmatprep.mubr.msk.f32.mxu1 %vm631_vm0, %v16053_v34  ;;  %1007 = vst.msk [vmem:[#allocation2 + $0x250] sm:$0xff] %vm631_vm0, %v12981_v35  ;;  %v878_v36 = vpop.f32.mrb[27].mxu0  ;;  %v16061_v37 = vld [vmem:[#allocation2 + $0x1f0] sm:$0xff]  ;;  %v16072_v41 = vld [vmem:[#allocation2 + $0x205] sm:$0xff]  ;;  %18522 = vst [vmem:[#allocation28_spill] sm:$0xff] %v16078_v43 }
 0x217   : > { %18520 = vst [vmem:[#allocation26_spill] sm:$0xff] %v16061_v37  ;;  %v16063_v38 = vld [vmem:[#allocation2 + $0x1ed] sm:$0xff]  ;;  %1005 = vst.msk [vmem:[#allocation2 + $0x230] sm:$0xff] %vm631_vm0, %v878_v36  ;;  %13024 = vmatmul.mubr.msk.f32.gmra.mrb[54].mxu0 %vm631_vm0, %v16061_v37 }
 0x218   : > { %13645 = vmatmul.mubr.msk.f32.gmra.mrb[20].mxu1 %vm631_vm0, %v16063_v38  ;;  %13026 = vmatprep.mubr.msk.f32.mxu0 %vm631_vm0, %v16070_v39  ;;  %v16080_v44 = vld [vmem:[#allocation2 + $0x20d] sm:$0xff] }
 0x219   : > { %13647 = vmatprep.mubr.msk.f32.mxu1 %vm631_vm0, %v16072_v41  ;;  %v1014_v35 = vld [vmem:[#allocation2 + $0x8f] sm:$0xff] }
 0x21b   : > { %v12984_v46 = vpop.f32.mrb[28].mxu0  ;;  %13027 = vmatmul.mubr.msk.f32.gmra.mrb[56].mxu0 %vm631_vm0, %v16078_v43  ;;  %v16106_v3 = vld [vmem:[#allocation2 + $0x248] sm:$0xff] }
 0x21c   : > { %13648 = vmatmul.mubr.msk.f32.gmra.mrb[22].mxu1 %vm631_vm0, %v16080_v44  ;;  %1010 = vst.msk [vmem:[#allocation2 + $0x288] sm:$0xff] %vm631_vm0, %v12984_v46  ;;  %v891_v47 = vpop.f32.mrb[29].mxu0  ;;  %v16087_v48 = vld [vmem:[#allocation2 + $0x228] sm:$0xff]  ;;  %18525 = vst [vmem:[#allocation31_spill] sm:$0xff] %v16106_v3 }
 0x21d   : > { %18523 = vst [vmem:[#allocation29_spill] sm:$0xff] %v16087_v48  ;;  %v16089_v50 = vld [vmem:[#allocation2 + $0x225] sm:$0xff]  ;;  %1008 = vst.msk [vmem:[#allocation2 + $0x268] sm:$0xff] %vm631_vm0, %v891_v47  ;;  %v12985_v55 = vpop.f32.mrb[30].mxu0  ;;  %13029 = vmatprep.mubr.msk.f32.mxu0 %vm631_vm0, %v16087_v48  ;;  %v16114_v7 = vld [vmem:[#allocation2 + $0x250] sm:$0xff] }
 0x21e   : > { %13650 = vmatprep.mubr.msk.f32.mxu1 %vm631_vm0, %v16089_v50  ;;  %1011 = vst.msk [vmem:[#allocation2 + $0x290] sm:$0xff] %vm631_vm0, %v12985_v55  ;;  %v894_v56 = vpop.f32.mrb[31].mxu0  ;;  %v16097_v59 = vld [vmem:[#allocation2 + $0x230] sm:$0xff]  ;;  %v16108_v4 = vld [vmem:[#allocation2 + $0x245] sm:$0xff]  ;;  %18526 = vst [vmem:[#allocation32_spill] sm:$0xff] %v16114_v7 }
 0x21f   : > { %18524 = vst [vmem:[#allocation30_spill] sm:$0xff] %v16097_v59  ;;  %v16099_v60 = vld [vmem:[#allocation2 + $0x22d] sm:$0xff]  ;;  %1009 = vst.msk [vmem:[#allocation2 + $0x270] sm:$0xff] %vm631_vm0, %v894_v56  ;;  %13030 = vmatmul.mubr.msk.f32.gmra.mrb[58].mxu0 %vm631_vm0, %v16097_v59 }
 0x220   : > { %13651 = vmatmul.mubr.msk.f32.gmra.mrb[24].mxu1 %vm631_vm0, %v16099_v60  ;;  %13032 = vmatprep.mubr.msk.f32.mxu0 %vm631_vm0, %v16106_v3  ;;  %v16116_v8 = vld [vmem:[#allocation2 + $0x24d] sm:$0xff] }
 0x221   : > { %13653 = vmatprep.mubr.msk.f32.mxu1 %vm631_vm0, %v16108_v4  ;;  %v15302_v46 = vld [vmem:[%s18410_s3 + $0x28] sm:$0xff]  }
 0x222   : > { %v16151_v47 = vld [vmem:[#allocation2 + $0xa7] sm:$0xff]  ;;  %v16161_v56 = vld [vmem:[#allocation2 + $0xaf] sm:$0xff] }
 0x223   : > { %13033 = vmatmul.mubr.msk.f32.gmra.mrb[60].mxu0 %vm631_vm0, %v16114_v7  ;;  %v16138_v31 = vld [vmem:[#allocation2 + $0x285] sm:$0xff] }
 0x224   : > { %13654 = vmatmul.mubr.msk.f32.gmra.mrb[26].mxu1 %vm631_vm0, %v16116_v8  ;;  %v16122_v17 = vld [vmem:[#allocation2 + $0x268] sm:$0xff] }
 0x225   : > { %18527 = vst [vmem:[#allocation33_spill] sm:$0xff] %v16122_v17  ;;  %v16124_v18 = vld [vmem:[#allocation2 + $0x265] sm:$0xff]  ;;  %13035 = vmatprep.mubr.msk.f32.mxu0 %vm631_vm0, %v16122_v17  ;;  %v16143_v36 = vld [vmem:[#allocation2 + $0x28d] sm:$0xff] }
 0x226   : > { %13656 = vmatprep.mubr.msk.f32.mxu1 %vm631_vm0, %v16124_v18  ;;  %v16130_v22 = vld [vmem:[#allocation2 + $0x270] sm:$0xff]  ;;  %v15300_v55 = vld [vmem:[%s18410_s3 + $0xe8] sm:$0xff]  }
 0x227   : > { %18528 = vst [vmem:[#allocation34_spill] sm:$0xff] %v16130_v22  ;;  %v16132_v30 = vld [vmem:[#allocation2 + $0x26d] sm:$0xff]  ;;  %13036 = vmatmul.mubr.msk.f32.gmra.mrb[62].mxu0 %vm631_vm0, %v16130_v22 }
 0x228   : > { %13657 = vmatmul.mubr.msk.f32.gmra.mrb[28].mxu1 %vm631_vm0, %v16132_v30  ;;  %13042 = vmatprep.mubr.msk.f32.mxu0 %vm631_vm0, %v1013_v21  ;;  %v16167_v21 = vld [vmem:[#allocation2 + $0xc7] sm:$0xff] }
 0x229   : > { %13659 = vmatprep.mubr.msk.f32.mxu1 %vm631_vm0, %v16138_v31 }
 0x22b   : > { %13043 = vmatmul.mubr.msk.f32.vlgmr.msra.gmra.mrb[32].mxu0 %vm631_vm0, %v1014_v35  ;;  %v16184_v35 = vld [vmem:[%s18410_s3 + $0xf0] sm:$0xff]  }
 0x22c   : > { %13660 = vmatmul.mubr.msk.f32.gmra.mrb[30].mxu1 %vm631_vm0, %v16143_v36  ;;  %13045 = vmatprep.mubr.msk.f32.mxu0 %vm631_vm0, %v16151_v47 }
 0x22d   : > { %13666 = vmatprep.mubr.msk.f32.mxu1 %vm631_vm0, %v15880_v33  ;;  %13091 = vmatpush3.bf16.msra.mxu0 %v15872_v26  ;;  %v16177_v26 = vld [vmem:[%s18410_s3 + $0x30] sm:$0xff]  }
 0x22e   : > { %13092 = vmatprep.subr.bf16.mxu0 %v15302_v46  ;;  %v16179_v33 = vld [vmem:[#allocation2 + $0xcf] sm:$0xff] }
 0x22f   : > { %13046 = vmatmul.mubr.msk.f32.gmra.mrb[34].mxu0 %vm631_vm0, %v16161_v56 }
 0x230   : > { %13667 = vmatmul.mubr.msk.f32.vlgmr.msra.gmra.mrb[0].mxu1 %vm631_vm0, %v15890_v14  ;;  %13048 = vmatprep.mubr.msk.f32.mxu0 %vm631_vm0, %v16167_v21  ;;  %v16353_v14 = vld [vmem:[#allocation2 + $0x290] sm:$0xff] }
 0x231   : > { %13715 = vmatpush3.bf16.msra.mxu1 %v15906_v42  ;;  %13669 = vmatprep.mubr.msk.f32.mxu1 %vm631_vm0, %v15896_v11  ;;  %v16190_v42 = vld [vmem:[#allocation2 + $0xe7] sm:$0xff]  ;;  %v16342_v11 = vld [vmem:[#allocation2 + $0x26f] sm:$0xff]  ;;  %18531 = vst [vmem:[#allocation37_spill] sm:$0xff] %v16353_v14 }
 0x232   : > { %13716 = vmatprep.subr.bf16.mxu1 %v15300_v55  ;;  %13093 = vmatpush3.bf16.msra.mxu0 %v15302_v46  ;;  %v16197_v46 = vld [vmem:[#allocation2 + $0xef] sm:$0xff]  ;;  %18529 = vst [vmem:[#allocation35_spill] sm:$0xff] %v16342_v11 }
 0x233   : > { %13049 = vmatmul.mubr.msk.f32.gmra.mrb[36].mxu0 %vm631_vm0, %v16179_v33  ;;  %13142 = vmatprep.subr.bf16.mxu0 %v16177_v26 }
 0x234   : > { %13670 = vmatmul.mubr.msk.f32.gmra.mrb[2].mxu1 %vm631_vm0, %v15901_v40  ;;  %13051 = vmatprep.mubr.msk.f32.mxu0 %vm631_vm0, %v16190_v42  ;;  %v16204_v40 = vld [vmem:[#allocation2 + $0x107] sm:$0xff] }
 0x235   : > { %13672 = vmatprep.mubr.msk.f32.mxu1 %vm631_vm0, %v15912_v45  ;;  %13717 = vmatpush3.bf16.msra.mxu1 %v15300_v55  ;;  %v16210_v55 = vld [vmem:[#allocation2 + $0x10f] sm:$0xff]  ;;  %v16216_v45 = vld [vmem:[#allocation2 + $0x127] sm:$0xff] }
 0x236   : > { %13766 = vmatprep.subr.bf16.mxu1 %v16184_v35 }
 0x237   : > { %13052 = vmatmul.mubr.msk.f32.gmra.mrb[38].mxu0 %vm631_vm0, %v16197_v46 }
 0x238   : > { %13673 = vmatmul.mubr.msk.f32.gmra.mrb[4].mxu1 %vm631_vm0, %v15919_v49  ;;  %13054 = vmatprep.mubr.msk.f32.mxu0 %vm631_vm0, %v16204_v40  ;;  %v16222_v49 = vld [vmem:[#allocation2 + $0x12f] sm:$0xff] }
 0x239   : > { %13675 = vmatprep.mubr.msk.f32.mxu1 %vm631_vm0, %v15926_v51  ;;  %v16228_v51 = vld [vmem:[#allocation2 + $0x147] sm:$0xff] }
 0x23b   : > { %13055 = vmatmul.mubr.msk.f32.gmra.mrb[40].mxu0 %vm631_vm0, %v16210_v55 }
 0x23c   : > { %13676 = vmatmul.mubr.msk.f32.gmra.mrb[6].mxu1 %vm631_vm0, %v15934_v53  ;;  %13057 = vmatprep.mubr.msk.f32.mxu0 %vm631_vm0, %v16216_v45  ;;  %v16234_v53 = vld [vmem:[#allocation2 + $0x14f] sm:$0xff] }
 0x23d   : > { %13678 = vmatprep.mubr.msk.f32.mxu1 %vm631_vm0, %v15943_v57  ;;  %v16240_v57 = vld [vmem:[#allocation2 + $0x167] sm:$0xff] }
 0x23f   : > { %13058 = vmatmul.mubr.msk.f32.gmra.mrb[42].mxu0 %vm631_vm0, %v16222_v49 }
 0x240   : > { %13679 = vmatmul.mubr.msk.f32.gmra.mrb[8].mxu1 %vm631_vm0, %v15953_v61  ;;  %13060 = vmatprep.mubr.msk.f32.mxu0 %vm631_vm0, %v16228_v51  ;;  %v16246_v61 = vld [vmem:[#allocation2 + $0x16f] sm:$0xff] }
 0x241   : > { %13681 = vmatprep.mubr.msk.f32.mxu1 %vm631_vm0, %v15962_v63  ;;  %v16252_v63 = vld [vmem:[#allocation2 + $0x187] sm:$0xff] }
 0x243   : > { %13061 = vmatmul.mubr.msk.f32.gmra.mrb[44].mxu0 %vm631_vm0, %v16234_v53 }
 0x244   : > { %13682 = vmatmul.mubr.msk.f32.gmra.mrb[10].mxu1 %vm631_vm0, %v15970_v1  ;;  %13063 = vmatprep.mubr.msk.f32.mxu0 %vm631_vm0, %v16240_v57  ;;  %v16258_v1 = vld [vmem:[#allocation2 + $0x18f] sm:$0xff] }
 0x245   : > { %13684 = vmatprep.mubr.msk.f32.mxu1 %vm631_vm0, %v15979_v5  ;;  %v16264_v5 = vld [vmem:[#allocation2 + $0x1a7] sm:$0xff] }
 0x247   : > { %13064 = vmatmul.mubr.msk.f32.gmra.mrb[46].mxu0 %vm631_vm0, %v16246_v61 }
 0x248   : > { %13685 = vmatmul.mubr.msk.f32.gmra.mrb[12].mxu1 %vm631_vm0, %v15989_v9  ;;  %13066 = vmatprep.mubr.msk.f32.mxu0 %vm631_vm0, %v16252_v63  ;;  %v16270_v9 = vld [vmem:[#allocation2 + $0x1af] sm:$0xff] }
 0x249   : > { %13687 = vmatprep.mubr.msk.f32.mxu1 %vm631_vm0, %v15998_v12  ;;  %v16276_v12 = vld [vmem:[#allocation2 + $0x1c7] sm:$0xff] }
 0x24b   : > { %13067 = vmatmul.mubr.msk.f32.gmra.mrb[48].mxu0 %vm631_vm0, %v16258_v1 }
 0x24c   : > { %13688 = vmatmul.mubr.msk.f32.gmra.mrb[14].mxu1 %vm631_vm0, %v16006_v15  ;;  %13069 = vmatprep.mubr.msk.f32.mxu0 %vm631_vm0, %v16264_v5  ;;  %v16282_v15 = vld [vmem:[#allocation2 + $0x1cf] sm:$0xff] }
 0x24d   : > { %13690 = vmatprep.mubr.msk.f32.mxu1 %vm631_vm0, %v16015_v19  ;;  %v16288_v19 = vld [vmem:[#allocation2 + $0x1e7] sm:$0xff] }
 0x24f   : > { %13070 = vmatmul.mubr.msk.f32.gmra.mrb[50].mxu0 %vm631_vm0, %v16270_v9 }
 0x250   : > { %13691 = vmatmul.mubr.msk.f32.gmra.mrb[16].mxu1 %vm631_vm0, %v16025_v23  ;;  %13072 = vmatprep.mubr.msk.f32.mxu0 %vm631_vm0, %v16276_v12  ;;  %v16294_v23 = vld [vmem:[#allocation2 + $0x1ef] sm:$0xff] }
 0x251   : > { %13693 = vmatprep.mubr.msk.f32.mxu1 %vm631_vm0, %v16034_v25  ;;  %v16300_v25 = vld [vmem:[#allocation2 + $0x207] sm:$0xff] }
 0x253   : > { %13073 = vmatmul.mubr.msk.f32.gmra.mrb[52].mxu0 %vm631_vm0, %v16282_v15 }
 0x254   : > { %13694 = vmatmul.mubr.msk.f32.gmra.mrb[18].mxu1 %vm631_vm0, %v16042_v28  ;;  %13075 = vmatprep.mubr.msk.f32.mxu0 %vm631_vm0, %v16288_v19  ;;  %v16306_v28 = vld [vmem:[#allocation2 + $0x20f] sm:$0xff] }
 0x255   : > { %13696 = vmatprep.mubr.msk.f32.mxu1 %vm631_vm0, %v16051_v32  ;;  %v16312_v32 = vld [vmem:[#allocation2 + $0x227] sm:$0xff] }
 0x257   : > { %13076 = vmatmul.mubr.msk.f32.gmra.mrb[54].mxu0 %vm631_vm0, %v16294_v23 }
 0x258   : > { %13697 = vmatmul.mubr.msk.f32.gmra.mrb[20].mxu1 %vm631_vm0, %v16061_v37  ;;  %13078 = vmatprep.mubr.msk.f32.mxu0 %vm631_vm0, %v16300_v25  ;;  %v16318_v37 = vld [vmem:[#allocation2 + $0x22f] sm:$0xff] }
 0x259   : > { %13699 = vmatprep.mubr.msk.f32.mxu1 %vm631_vm0, %v16070_v39  ;;  %v16324_v39 = vld [vmem:[#allocation2 + $0x247] sm:$0xff] }
 0x25b   : > { %13079 = vmatmul.mubr.msk.f32.gmra.mrb[56].mxu0 %vm631_vm0, %v16306_v28 }
 0x25c   : > { %13700 = vmatmul.mubr.msk.f32.gmra.mrb[22].mxu1 %vm631_vm0, %v16078_v43  ;;  %13081 = vmatprep.mubr.msk.f32.mxu0 %vm631_vm0, %v16312_v32  ;;  %v16330_v43 = vld [vmem:[#allocation2 + $0x24f] sm:$0xff] }
 0x25d   : > { %13702 = vmatprep.mubr.msk.f32.mxu1 %vm631_vm0, %v16087_v48  ;;  %v16336_v48 = vld [vmem:[#allocation2 + $0x267] sm:$0xff] }
 0x25f   : > { %13082 = vmatmul.mubr.msk.f32.gmra.mrb[58].mxu0 %vm631_vm0, %v16318_v37 }
 0x260   : > { %13703 = vmatmul.mubr.msk.f32.gmra.mrb[24].mxu1 %vm631_vm0, %v16097_v59  ;;  %13084 = vmatprep.mubr.msk.f32.mxu0 %vm631_vm0, %v16324_v39  ;;  %v1688_v59 = vld [vmem:[#allocation2 + $0x89] sm:$0xff] }
 0x261   : > { %13705 = vmatprep.mubr.msk.f32.mxu1 %vm631_vm0, %v16106_v3  ;;  %v16348_v3 = vld [vmem:[#allocation2 + $0x288] sm:$0xff] }
 0x262   : > { %18530 = vst [vmem:[#allocation36_spill] sm:$0xff] %v16348_v3 }
 0x263   : > { %13085 = vmatmul.mubr.msk.f32.gmra.mrb[60].mxu0 %vm631_vm0, %v16330_v43 }
 0x264   : > { %13706 = vmatmul.mubr.msk.f32.gmra.mrb[26].mxu1 %vm631_vm0, %v16114_v7  ;;  %13087 = vmatprep.mubr.msk.f32.mxu0 %vm631_vm0, %v16336_v48  ;;  %v1689_v7 = vld [vmem:[#allocation2 + $0x91] sm:$0xff] }
 0x265   : > { %13708 = vmatprep.mubr.msk.f32.mxu1 %vm631_vm0, %v16122_v17  ;;  %v15306_v17 = vld [vmem:[%s18410_s3 + $0x38] sm:$0xff]  }
 0x267   : > { %13088 = vmatmul.mubr.msk.f32.gmra.mrb[62].mxu0 %vm631_vm0, %v16342_v11  ;;  %v6002_v11 = vld [vmem:[#allocation2 + $0xab] sm:$0xff] }
 0x268   : > { %13709 = vmatmul.mubr.msk.f32.gmra.mrb[28].mxu1 %vm631_vm0, %v16130_v22  ;;  %13094 = vmatprep.mubr.msk.f32.mxu0 %vm631_vm0, %v1688_v59  ;;  %v16361_v22 = vld [vmem:[#allocation2 + $0xa9] sm:$0xff]  ;;  %v15304_v59 = vld [vmem:[%s18410_s3 + $0xf8] sm:$0xff]  }
 0x269   : > { %13711 = vmatprep.mubr.msk.f32.mxu1 %vm631_vm0, %v16348_v3  ;;  %18532 = vst [vmem:[#allocation38_spill] sm:$0xff] %v16361_v22  ;;  %v16370_v3 = vld [vmem:[#allocation2 + $0xb1] sm:$0xff] }
 0x26a   : > { %18533 = vst [vmem:[#allocation39_spill] sm:$0xff] %v16370_v3 }
 0x26b   : > { %13095 = vmatmul.mubr.msk.f32.vlgmr.msra.gmra.mrb[32].mxu0 %vm631_vm0, %v1689_v7  ;;  %v6003_v7 = vld [vmem:[#allocation2 + $0xb3] sm:$0xff] }
 0x26c   : > { %13712 = vmatmul.mubr.msk.f32.gmra.mrb[30].mxu1 %vm631_vm0, %v16353_v14  ;;  %13097 = vmatprep.mubr.msk.f32.mxu0 %vm631_vm0, %v16361_v22  ;;  %v16375_v14 = vld [vmem:[#allocation2 + $0xc9] sm:$0xff]  ;;  %v16386_v22 = vld [vmem:[#allocation2 + $0xd1] sm:$0xff] }
 0x26d   : > { %13718 = vmatprep.mubr.msk.f32.mxu1 %vm631_vm0, %v6002_v11  ;;  %13143 = vmatpush3.bf16.msra.mxu0 %v16177_v26  ;;  %18534 = vst [vmem:[#allocation40_spill] sm:$0xff] %v16375_v14  ;;  %v6004_v11 = vld [vmem:[#allocation2 + $0xcb] sm:$0xff]  ;;  %v16384_v26 = vld [vmem:[%s18410_s3 + $0x40] sm:$0xff]   ;;  %18535 = vst [vmem:[#allocation41_spill] sm:$0xff] %v16386_v22 }
 0x26e   : > { %13144 = vmatprep.subr.bf16.mxu0 %v15306_v17 }
 0x26f   : > { %13098 = vmatmul.mubr.msk.f32.gmra.mrb[34].mxu0 %vm631_vm0, %v16370_v3  ;;  %v6005_v3 = vld [vmem:[#allocation2 + $0xd3] sm:$0xff] }
 0x270   : > { %13719 = vmatmul.mubr.msk.f32.vlgmr.msra.gmra.mrb[0].mxu1 %vm631_vm0, %v6003_v7  ;;  %13100 = vmatprep.mubr.msk.f32.mxu0 %vm631_vm0, %v16375_v14  ;;  %v16396_v7 = vld [vmem:[#allocation2 + $0xe9] sm:$0xff]  ;;  %v6007_v14 = vld [vmem:[#allocation2 + $0xf3] sm:$0xff] }
 0x271   : > { %13767 = vmatpush3.bf16.msra.mxu1 %v16184_v35  ;;  %13721 = vmatprep.mubr.msk.f32.mxu1 %vm631_vm0, %v6004_v11  ;;  %v16391_v35 = vld [vmem:[%s18410_s3 + $0x100] sm:$0xff]   ;;  %18536 = vst [vmem:[#allocation42_spill] sm:$0xff] %v16396_v7  ;;  %v6006_v11 = vld [vmem:[#allocation2 + $0xeb] sm:$0xff] }
 0x272   : > { %13768 = vmatprep.subr.bf16.mxu1 %v15304_v59  ;;  %13145 = vmatpush3.bf16.msra.mxu0 %v15306_v17  ;;  %v16402_v17 = vld [vmem:[#allocation2 + $0xf1] sm:$0xff] }
 0x273   : > { %13101 = vmatmul.mubr.msk.f32.gmra.mrb[36].mxu0 %vm631_vm0, %v16386_v22  ;;  %13194 = vmatprep.subr.bf16.mxu0 %v16384_v26  ;;  %18537 = vst [vmem:[#allocation43_spill] sm:$0xff] %v16402_v17  ;;  %v16410_v22 = vld [vmem:[#allocation2 + $0x10b] sm:$0xff] }
 0x274   : > { %13722 = vmatmul.mubr.msk.f32.gmra.mrb[2].mxu1 %vm631_vm0, %v6005_v3  ;;  %13103 = vmatprep.mubr.msk.f32.mxu0 %vm631_vm0, %v16396_v7  ;;  %v16408_v3 = vld [vmem:[#allocation2 + $0x109] sm:$0xff]  ;;  %v16434_v7 = vld [vmem:[#allocation2 + $0x133] sm:$0xff] }
 0x275   : > { %13724 = vmatprep.mubr.msk.f32.mxu1 %vm631_vm0, %v6006_v11  ;;  %13769 = vmatpush3.bf16.msra.mxu1 %v15304_v59  ;;  %18538 = vst [vmem:[#allocation44_spill] sm:$0xff] %v16408_v3  ;;  %v16416_v59 = vld [vmem:[#allocation2 + $0x111] sm:$0xff]  ;;  %18544 = vst [vmem:[#allocation50_spill] sm:$0xff] %v16434_v7 }
 0x276   : > { %13818 = vmatprep.subr.bf16.mxu1 %v16391_v35  ;;  %18539 = vst [vmem:[#allocation45_spill] sm:$0xff] %v16416_v59  ;;  %v16418_v11 = vld [vmem:[#allocation2 + $0x113] sm:$0xff] }
 0x277   : > { %13104 = vmatmul.mubr.msk.f32.gmra.mrb[38].mxu0 %vm631_vm0, %v16402_v17  ;;  %18540 = vst [vmem:[#allocation46_spill] sm:$0xff] %v16418_v11  ;;  %v16426_v17 = vld [vmem:[#allocation2 + $0x12b] sm:$0xff] }
 0x278   : > { %13725 = vmatmul.mubr.msk.f32.gmra.mrb[4].mxu1 %vm631_vm0, %v6007_v14  ;;  %13106 = vmatprep.mubr.msk.f32.mxu0 %vm631_vm0, %v16408_v3  ;;  %v16424_v14 = vld [vmem:[#allocation2 + $0x129] sm:$0xff]  ;;  %18542 = vst [vmem:[#allocation48_spill] sm:$0xff] %v16426_v17  ;;  %v16432_v3 = vld [vmem:[#allocation2 + $0x131] sm:$0xff] }
 0x279   : > { %13727 = vmatprep.mubr.msk.f32.mxu1 %vm631_vm0, %v16410_v22  ;;  %18541 = vst [vmem:[#allocation47_spill] sm:$0xff] %v16424_v14  ;;  %18543 = vst [vmem:[#allocation49_spill] sm:$0xff] %v16432_v3 }
 0x27b   : > { %13107 = vmatmul.mubr.msk.f32.gmra.mrb[40].mxu0 %vm631_vm0, %v16416_v59  ;;  %v16440_v59 = vld [vmem:[#allocation2 + $0x149] sm:$0xff] }
 0x27c   : > { %13728 = vmatmul.mubr.msk.f32.gmra.mrb[6].mxu1 %vm631_vm0, %v16418_v11  ;;  %13109 = vmatprep.mubr.msk.f32.mxu0 %vm631_vm0, %v16424_v14  ;;  %18545 = vst [vmem:[#allocation51_spill] sm:$0xff] %v16440_v59  ;;  %v16442_v11 = vld [vmem:[#allocation2 + $0x14b] sm:$0xff] }
 0x27d   : > { %13730 = vmatprep.mubr.msk.f32.mxu1 %vm631_vm0, %v16426_v17  ;;  %18546 = vst [vmem:[#allocation52_spill] sm:$0xff] %v16442_v11  ;;  %v16448_v14 = vld [vmem:[#allocation2 + $0x151] sm:$0xff] }
 0x27e   : > { %18547 = vst [vmem:[#allocation53_spill] sm:$0xff] %v16448_v14  ;;  %v16450_v17 = vld [vmem:[#allocation2 + $0x153] sm:$0xff] }
 0x27f   : > { %13110 = vmatmul.mubr.msk.f32.gmra.mrb[42].mxu0 %vm631_vm0, %v16432_v3  ;;  %18548 = vst [vmem:[#allocation54_spill] sm:$0xff] %v16450_v17  ;;  %v16456_v3 = vld [vmem:[#allocation2 + $0x169] sm:$0xff] }
 0x280   : > { %13731 = vmatmul.mubr.msk.f32.gmra.mrb[8].mxu1 %vm631_vm0, %v16434_v7  ;;  %13112 = vmatprep.mubr.msk.f32.mxu0 %vm631_vm0, %v16440_v59  ;;  %18549 = vst [vmem:[#allocation55_spill] sm:$0xff] %v16456_v3  ;;  %v16458_v7 = vld [vmem:[#allocation2 + $0x16b] sm:$0xff] }
 0x281   : > { %13733 = vmatprep.mubr.msk.f32.mxu1 %vm631_vm0, %v16442_v11  ;;  %18550 = vst [vmem:[#allocation56_spill] sm:$0xff] %v16458_v7  ;;  %v16464_v59 = vld [vmem:[#allocation2 + $0x171] sm:$0xff] }
 0x282   : > { %18551 = vst [vmem:[#allocation57_spill] sm:$0xff] %v16464_v59  ;;  %v16466_v11 = vld [vmem:[#allocation2 + $0x173] sm:$0xff] }
 0x283   : > { %13113 = vmatmul.mubr.msk.f32.gmra.mrb[44].mxu0 %vm631_vm0, %v16448_v14  ;;  %18552 = vst [vmem:[#allocation58_spill] sm:$0xff] %v16466_v11  ;;  %v16472_v14 = vld [vmem:[#allocation2 + $0x189] sm:$0xff] }
 0x284   : > { %13734 = vmatmul.mubr.msk.f32.gmra.mrb[10].mxu1 %vm631_vm0, %v16450_v17  ;;  %13115 = vmatprep.mubr.msk.f32.mxu0 %vm631_vm0, %v16456_v3  ;;  %18553 = vst [vmem:[#allocation59_spill] sm:$0xff] %v16472_v14  ;;  %v16474_v17 = vld [vmem:[#allocation2 + $0x18b] sm:$0xff] }
 0x285   : > { %13736 = vmatprep.mubr.msk.f32.mxu1 %vm631_vm0, %v16458_v7  ;;  %18554 = vst [vmem:[#allocation60_spill] sm:$0xff] %v16474_v17  ;;  %v16480_v3 = vld [vmem:[#allocation2 + $0x191] sm:$0xff] }
 0x286   : > { %18555 = vst [vmem:[#allocation61_spill] sm:$0xff] %v16480_v3  ;;  %v16482_v7 = vld [vmem:[#allocation2 + $0x193] sm:$0xff] }
 0x287   : > { %13116 = vmatmul.mubr.msk.f32.gmra.mrb[46].mxu0 %vm631_vm0, %v16464_v59  ;;  %18556 = vst [vmem:[#allocation62_spill] sm:$0xff] %v16482_v7  ;;  %v16488_v59 = vld [vmem:[#allocation2 + $0x1a9] sm:$0xff] }
 0x288   : > { %13737 = vmatmul.mubr.msk.f32.gmra.mrb[12].mxu1 %vm631_vm0, %v16466_v11  ;;  %13118 = vmatprep.mubr.msk.f32.mxu0 %vm631_vm0, %v16472_v14  ;;  %18557 = vst [vmem:[#allocation63_spill] sm:$0xff] %v16488_v59  ;;  %v16490_v11 = vld [vmem:[#allocation2 + $0x1ab] sm:$0xff] }
 0x289   : > { %13739 = vmatprep.mubr.msk.f32.mxu1 %vm631_vm0, %v16474_v17  ;;  %18558 = vst [vmem:[#allocation64_spill] sm:$0xff] %v16490_v11  ;;  %v16496_v14 = vld [vmem:[#allocation2 + $0x1b1] sm:$0xff] }
 0x28a   : > { %18559 = vst [vmem:[#allocation65_spill] sm:$0xff] %v16496_v14  ;;  %v16498_v17 = vld [vmem:[#allocation2 + $0x1b3] sm:$0xff] }
 0x28b   : > { %13119 = vmatmul.mubr.msk.f32.gmra.mrb[48].mxu0 %vm631_vm0, %v16480_v3  ;;  %18560 = vst [vmem:[#allocation66_spill] sm:$0xff] %v16498_v17  ;;  %v16504_v3 = vld [vmem:[#allocation2 + $0x1c9] sm:$0xff] }
 0x28c   : > { %13740 = vmatmul.mubr.msk.f32.gmra.mrb[14].mxu1 %vm631_vm0, %v16482_v7  ;;  %13121 = vmatprep.mubr.msk.f32.mxu0 %vm631_vm0, %v16488_v59  ;;  %18561 = vst [vmem:[#allocation67_spill] sm:$0xff] %v16504_v3  ;;  %v16506_v7 = vld [vmem:[#allocation2 + $0x1cb] sm:$0xff] }
 0x28d   : > { %13742 = vmatprep.mubr.msk.f32.mxu1 %vm631_vm0, %v16490_v11  ;;  %18562 = vst [vmem:[#allocation68_spill] sm:$0xff] %v16506_v7  ;;  %v16512_v59 = vld [vmem:[#allocation2 + $0x1d1] sm:$0xff] }
 0x28e   : > { %18563 = vst [vmem:[#allocation69_spill] sm:$0xff] %v16512_v59  ;;  %v16514_v11 = vld [vmem:[#allocation2 + $0x1d3] sm:$0xff] }
 0x28f   : > { %13122 = vmatmul.mubr.msk.f32.gmra.mrb[50].mxu0 %vm631_vm0, %v16496_v14  ;;  %18564 = vst [vmem:[#allocation70_spill] sm:$0xff] %v16514_v11  ;;  %v16520_v14 = vld [vmem:[#allocation2 + $0x1e9] sm:$0xff] }
 0x290   : > { %13743 = vmatmul.mubr.msk.f32.gmra.mrb[16].mxu1 %vm631_vm0, %v16498_v17  ;;  %13124 = vmatprep.mubr.msk.f32.mxu0 %vm631_vm0, %v16504_v3  ;;  %18565 = vst [vmem:[#allocation71_spill] sm:$0xff] %v16520_v14  ;;  %v16522_v17 = vld [vmem:[#allocation2 + $0x1eb] sm:$0xff] }
 0x291   : > { %13745 = vmatprep.mubr.msk.f32.mxu1 %vm631_vm0, %v16506_v7  ;;  %18566 = vst [vmem:[#allocation72_spill] sm:$0xff] %v16522_v17  ;;  %v16528_v3 = vld [vmem:[#allocation2 + $0x1f1] sm:$0xff] }
 0x292   : > { %18567 = vst [vmem:[#allocation73_spill] sm:$0xff] %v16528_v3  ;;  %v16530_v7 = vld [vmem:[#allocation2 + $0x1f3] sm:$0xff] }
 0x293   : > { %13125 = vmatmul.mubr.msk.f32.gmra.mrb[52].mxu0 %vm631_vm0, %v16512_v59  ;;  %18568 = vst [vmem:[#allocation74_spill] sm:$0xff] %v16530_v7  ;;  %v16536_v59 = vld [vmem:[#allocation2 + $0x209] sm:$0xff] }
 0x294   : > { %13746 = vmatmul.mubr.msk.f32.gmra.mrb[18].mxu1 %vm631_vm0, %v16514_v11  ;;  %13127 = vmatprep.mubr.msk.f32.mxu0 %vm631_vm0, %v16520_v14  ;;  %18569 = vst [vmem:[#allocation75_spill] sm:$0xff] %v16536_v59  ;;  %v16538_v11 = vld [vmem:[#allocation2 + $0x20b] sm:$0xff] }
 0x295   : > { %13748 = vmatprep.mubr.msk.f32.mxu1 %vm631_vm0, %v16522_v17  ;;  %18570 = vst [vmem:[#allocation76_spill] sm:$0xff] %v16538_v11  ;;  %v16544_v14 = vld [vmem:[#allocation2 + $0x211] sm:$0xff] }
 0x296   : > { %18571 = vst [vmem:[#allocation77_spill] sm:$0xff] %v16544_v14  ;;  %v16546_v17 = vld [vmem:[#allocation2 + $0x213] sm:$0xff] }
 0x297   : > { %13128 = vmatmul.mubr.msk.f32.gmra.mrb[54].mxu0 %vm631_vm0, %v16528_v3  ;;  %18572 = vst [vmem:[#allocation78_spill] sm:$0xff] %v16546_v17  ;;  %v16552_v3 = vld [vmem:[#allocation2 + $0x229] sm:$0xff] }
 0x298   : > { %13749 = vmatmul.mubr.msk.f32.gmra.mrb[20].mxu1 %vm631_vm0, %v16530_v7  ;;  %13130 = vmatprep.mubr.msk.f32.mxu0 %vm631_vm0, %v16536_v59  ;;  %18573 = vst [vmem:[#allocation79_spill] sm:$0xff] %v16552_v3  ;;  %v16554_v7 = vld [vmem:[#allocation2 + $0x22b] sm:$0xff] }
 0x299   : > { %13751 = vmatprep.mubr.msk.f32.mxu1 %vm631_vm0, %v16538_v11  ;;  %18574 = vst [vmem:[#allocation80_spill] sm:$0xff] %v16554_v7  ;;  %v16560_v59 = vld [vmem:[#allocation2 + $0x231] sm:$0xff] }
 0x29a   : > { %18575 = vst [vmem:[#allocation81_spill] sm:$0xff] %v16560_v59  ;;  %v16562_v11 = vld [vmem:[#allocation2 + $0x233] sm:$0xff] }
 0x29b   : > { %13131 = vmatmul.mubr.msk.f32.gmra.mrb[56].mxu0 %vm631_vm0, %v16544_v14  ;;  %18576 = vst [vmem:[#allocation82_spill] sm:$0xff] %v16562_v11  ;;  %v16568_v14 = vld [vmem:[#allocation2 + $0x249] sm:$0xff] }
 0x29c   : > { %13752 = vmatmul.mubr.msk.f32.gmra.mrb[22].mxu1 %vm631_vm0, %v16546_v17  ;;  %13133 = vmatprep.mubr.msk.f32.mxu0 %vm631_vm0, %v16552_v3  ;;  %18577 = vst [vmem:[#allocation83_spill] sm:$0xff] %v16568_v14  ;;  %v16570_v17 = vld [vmem:[#allocation2 + $0x24b] sm:$0xff] }
 0x29d   : > { %13754 = vmatprep.mubr.msk.f32.mxu1 %vm631_vm0, %v16554_v7  ;;  %18578 = vst [vmem:[#allocation84_spill] sm:$0xff] %v16570_v17  ;;  %v16576_v3 = vld [vmem:[#allocation2 + $0x251] sm:$0xff] }
 0x29e   : > { %18579 = vst [vmem:[#allocation85_spill] sm:$0xff] %v16576_v3  ;;  %v16578_v7 = vld [vmem:[#allocation2 + $0x253] sm:$0xff] }
 0x29f   : > { %13134 = vmatmul.mubr.msk.f32.gmra.mrb[58].mxu0 %vm631_vm0, %v16560_v59  ;;  %v16584_v59 = vld [vmem:[#allocation2 + $0x269] sm:$0xff] }
 0x2a0   : > { %13755 = vmatmul.mubr.msk.f32.gmra.mrb[24].mxu1 %vm631_vm0, %v16562_v11  ;;  %13136 = vmatprep.mubr.msk.f32.mxu0 %vm631_vm0, %v16568_v14  ;;  %18580 = vst [vmem:[#allocation86_spill] sm:$0xff] %v16584_v59  ;;  %v16586_v11 = vld [vmem:[#allocation2 + $0x26b] sm:$0xff] }
 0x2a1   : > { %13757 = vmatprep.mubr.msk.f32.mxu1 %vm631_vm0, %v16570_v17  ;;  %18581 = vst [vmem:[#allocation87_spill] sm:$0xff] %v16586_v11  ;;  %v16592_v14 = vld [vmem:[#allocation2 + $0x271] sm:$0xff] }
 0x2a2   : > { %v16594_v17 = vld [vmem:[#allocation2 + $0x273] sm:$0xff] }
 0x2a3   : > { %13137 = vmatmul.mubr.msk.f32.gmra.mrb[60].mxu0 %vm631_vm0, %v16576_v3  ;;  %v16600_v3 = vld [vmem:[#allocation2 + $0x28b] sm:$0xff] }
 0x2a4   : > { %13758 = vmatmul.mubr.msk.f32.gmra.mrb[26].mxu1 %vm631_vm0, %v16578_v7  ;;  %13139 = vmatprep.mubr.msk.f32.mxu0 %vm631_vm0, %v16584_v59  ;;  %v16606_v59 = vld [vmem:[#allocation2 + $0x293] sm:$0xff] }
 0x2a5   : > { %13760 = vmatprep.mubr.msk.f32.mxu1 %vm631_vm0, %v16586_v11  ;;  %v15310_v11 = vld [vmem:[%s18410_s3 + $0x48] sm:$0xff]  }
 0x2a7   : > { %13140 = vmatmul.mubr.msk.f32.gmra.mrb[62].mxu0 %vm631_vm0, %v16592_v14 }
 0x2a8   : > { %13761 = vmatmul.mubr.msk.f32.gmra.mrb[28].mxu1 %vm631_vm0, %v16594_v17  ;;  %13146 = vmatprep.mubr.msk.f32.mxu0 %vm631_vm0, %v16151_v47  ;;  %v15308_v47 = vld [vmem:[%s18410_s3 + $0x108] sm:$0xff]  }
 0x2a9   : > { %13763 = vmatprep.mubr.msk.f32.mxu1 %vm631_vm0, %v16600_v3 }
 0x2ab   : > { %13147 = vmatmul.mubr.msk.f32.vlgmr.msra.gmra.mrb[32].mxu0 %vm631_vm0, %v16161_v56  ;;  %v16640_v56 = vld [vmem:[%s18410_s3 + $0x110] sm:$0xff]  }
 0x2ac   : > { %13764 = vmatmul.mubr.msk.f32.gmra.mrb[30].mxu1 %vm631_vm0, %v16606_v59  ;;  %13149 = vmatprep.mubr.msk.f32.mxu0 %vm631_vm0, %v16167_v21  ;;  %v16873_v21 = vld [vmem:[#allocation2 + $0x208] sm:$0xff] }
 0x2ad   : > { %13770 = vmatprep.mubr.msk.f32.mxu1 %vm631_vm0, %v15928_v52  ;;  %13195 = vmatpush3.bf16.msra.mxu0 %v16384_v26  ;;  %v16635_v52 = vld [vmem:[%s18410_s3 + $0x50] sm:$0xff]   ;;  %v18602_v26 = vld [vmem:[#allocation25_spill] sm:$0xff] }
 0x2ae   : > { %13196 = vmatprep.subr.bf16.mxu0 %v15310_v11 }
 0x2af   : > { %13150 = vmatmul.mubr.msk.f32.gmra.mrb[34].mxu0 %vm631_vm0, %v16179_v33  ;;  %v18600_v33 = vld [vmem:[#allocation23_spill] sm:$0xff] }
 0x2b0   : > { %13771 = vmatmul.mubr.msk.f32.vlgmr.msra.gmra.mrb[0].mxu1 %vm631_vm0, %v15936_v54  ;;  %13152 = vmatprep.mubr.msk.f32.mxu0 %vm631_vm0, %v16190_v42  ;;  %v6402_v54 = vld [vmem:[#allocation2 + $0x2cd] sm:$0xff] }
 0x2b1   : > { %13819 = vmatpush3.bf16.msra.mxu1 %v16391_v35  ;;  %13773 = vmatprep.mubr.msk.f32.mxu1 %vm631_vm0, %v15945_v58  ;;  %v16747_v58 = vld [vmem:[#allocation2 + $0x28f] sm:$0xff] }
 0x2b2   : > { %13820 = vmatprep.subr.bf16.mxu1 %v15308_v47  ;;  %13197 = vmatpush3.bf16.msra.mxu0 %v15310_v11  ;;  %v16879_v42 = vld [vmem:[#allocation2 + $0x210] sm:$0xff]  ;;  %v18603_v11 = vld [vmem:[#allocation26_spill] sm:$0xff] }
 0x2b3   : > { %13153 = vmatmul.mubr.msk.f32.gmra.mrb[36].mxu0 %vm631_vm0, %v16197_v46  ;;  %13246 = vmatprep.subr.bf16.mxu0 %v16635_v52  ;;  %v18601_v46 = vld [vmem:[#allocation24_spill] sm:$0xff] }
 0x2b4   : > { %13774 = vmatmul.mubr.msk.f32.gmra.mrb[2].mxu1 %vm631_vm0, %v15955_v62  ;;  %13155 = vmatprep.mubr.msk.f32.mxu0 %vm631_vm0, %v16204_v40  ;;  %v6399_v40 = vld [vmem:[#allocation2 + $0x2a5] sm:$0xff]  ;;  %v6404_v62 = vld [vmem:[#allocation2 + $0x2ed] sm:$0xff] }
 0x2b5   : > { %13776 = vmatprep.mubr.msk.f32.mxu1 %vm631_vm0, %v15964_v0  ;;  %13821 = vmatpush3.bf16.msra.mxu1 %v15308_v47  ;;  %v18583_v0 = vld [vmem:[#allocation6_spill] sm:$0xff]  ;;  %v16891_v35 = vld [vmem:[#allocation2 + $0x230] sm:$0xff]  ;;  %v16897_v47 = vld [vmem:[#allocation2 + $0x248] sm:$0xff] }
 0x2b6   : > { %13870 = vmatprep.subr.bf16.mxu1 %v16640_v56 }
 0x2b7   : > { %13156 = vmatmul.mubr.msk.f32.gmra.mrb[38].mxu0 %vm631_vm0, %v16210_v55  ;;  %v16885_v55 = vld [vmem:[#allocation2 + $0x228] sm:$0xff] }
 0x2b8   : > { %13777 = vmatmul.mubr.msk.f32.gmra.mrb[4].mxu1 %vm631_vm0, %v15972_v2  ;;  %13158 = vmatprep.mubr.msk.f32.mxu0 %vm631_vm0, %v16216_v45  ;;  %v6400_v45 = vld [vmem:[#allocation2 + $0x2ad] sm:$0xff] }
 0x2b9   : > { %13779 = vmatprep.mubr.msk.f32.mxu1 %vm631_vm0, %v15981_v6  ;;  %v18584_v2 = vld [vmem:[#allocation7_spill] sm:$0xff]  ;;  %v16770_v6 = vld [vmem:[#allocation2 + $0x110] sm:$0xff] }
 0x2bb   : > { %13159 = vmatmul.mubr.msk.f32.gmra.mrb[40].mxu0 %vm631_vm0, %v16222_v49  ;;  %v6401_v49 = vld [vmem:[#allocation2 + $0x2c5] sm:$0xff] }
 0x2bc   : > { %13780 = vmatmul.mubr.msk.f32.gmra.mrb[6].mxu1 %vm631_vm0, %v15991_v10  ;;  %13161 = vmatprep.mubr.msk.f32.mxu0 %vm631_vm0, %v16228_v51  ;;  %v18582_v51 = vld [vmem:[#allocation35_spill] sm:$0xff]  ;;  %v18586_v10 = vld [vmem:[#allocation9_spill] sm:$0xff] }
 0x2bd   : > { %13782 = vmatprep.mubr.msk.f32.mxu1 %vm631_vm0, %v16000_v13  ;;  %v16786_v13 = vld [vmem:[%s18410_s3 + $0x60] sm:$0xff]  }
 0x2bf   : > { %13162 = vmatmul.mubr.msk.f32.gmra.mrb[42].mxu0 %vm631_vm0, %v16234_v53  ;;  %v16742_v53 = vld [vmem:[#allocation2 + $0x287] sm:$0xff] }
 0x2c0   : > { %13783 = vmatmul.mubr.msk.f32.gmra.mrb[8].mxu1 %vm631_vm0, %v16008_v16  ;;  %13164 = vmatprep.mubr.msk.f32.mxu0 %vm631_vm0, %v16240_v57  ;;  %v6403_v57 = vld [vmem:[#allocation2 + $0x2e5] sm:$0xff] }
 0x2c1   : > { %13785 = vmatprep.mubr.msk.f32.mxu1 %vm631_vm0, %v16017_v20  ;;  %v16793_v16 = vld [vmem:[%s18410_s3 + $0x120] sm:$0xff]   ;;  %v16799_v20 = vld [vmem:[#allocation2 + $0x148] sm:$0xff] }
 0x2c3   : > { %13165 = vmatmul.mubr.msk.f32.gmra.mrb[44].mxu0 %vm631_vm0, %v16246_v61  ;;  %v15345_v61 = vld [vmem:[#allocation2 + $0xa8] sm:$0xff] }
 0x2c4   : > { %13786 = vmatmul.mubr.msk.f32.gmra.mrb[10].mxu1 %vm631_vm0, %v16027_v24  ;;  %13167 = vmatprep.mubr.msk.f32.mxu0 %vm631_vm0, %v16252_v63  ;;  %v15314_v63 = vld [vmem:[%s18410_s3 + $0x58] sm:$0xff]   ;;  %v16806_v24 = vld [vmem:[#allocation2 + $0x150] sm:$0xff] }
 0x2c5   : > { %13788 = vmatprep.mubr.msk.f32.mxu1 %vm631_vm0, %v16036_v27  ;;  %v16813_v27 = vld [vmem:[#allocation2 + $0x168] sm:$0xff] }
 0x2c7   : > { %13168 = vmatmul.mubr.msk.f32.gmra.mrb[46].mxu0 %vm631_vm0, %v16258_v1  ;;  %v16760_v1 = vld [vmem:[#allocation2 + $0x108] sm:$0xff] }
 0x2c8   : > { %13789 = vmatmul.mubr.msk.f32.gmra.mrb[12].mxu1 %vm631_vm0, %v16044_v29  ;;  %13170 = vmatprep.mubr.msk.f32.mxu0 %vm631_vm0, %v16264_v5  ;;  %v15312_v5 = vld [vmem:[%s18410_s3 + $0x118] sm:$0xff]   ;;  %v16819_v29 = vld [vmem:[#allocation2 + $0x170] sm:$0xff] }
 0x2c9   : > { %13791 = vmatprep.mubr.msk.f32.mxu1 %vm631_vm0, %v16053_v34  ;;  %v16825_v34 = vld [vmem:[#allocation2 + $0x188] sm:$0xff] }
 0x2cb   : > { %13171 = vmatmul.mubr.msk.f32.gmra.mrb[48].mxu0 %vm631_vm0, %v16270_v9  ;;  %v18585_v9 = vld [vmem:[#allocation8_spill] sm:$0xff] }
 0x2cc   : > { %13792 = vmatmul.mubr.msk.f32.gmra.mrb[14].mxu1 %vm631_vm0, %v16063_v38  ;;  %13173 = vmatprep.mubr.msk.f32.mxu0 %vm631_vm0, %v16276_v12  ;;  %v16779_v12 = vld [vmem:[#allocation2 + $0x128] sm:$0xff]  ;;  %v16831_v38 = vld [vmem:[#allocation2 + $0x190] sm:$0xff] }
 0x2cd   : > { %13794 = vmatprep.mubr.msk.f32.mxu1 %vm631_vm0, %v16072_v41  ;;  %v16837_v41 = vld [vmem:[#allocation2 + $0x1a8] sm:$0xff] }
 0x2cf   : > { %13174 = vmatmul.mubr.msk.f32.gmra.mrb[50].mxu0 %vm631_vm0, %v16282_v15  ;;  %v16788_v15 = vld [vmem:[#allocation2 + $0x130] sm:$0xff] }
 0x2d0   : > { %13795 = vmatmul.mubr.msk.f32.gmra.mrb[16].mxu1 %vm631_vm0, %v16080_v44  ;;  %13176 = vmatprep.mubr.msk.f32.mxu0 %vm631_vm0, %v16288_v19  ;;  %v18587_v19 = vld [vmem:[#allocation10_spill] sm:$0xff]  ;;  %v16843_v44 = vld [vmem:[#allocation2 + $0x1b0] sm:$0xff] }
 0x2d1   : > { %13797 = vmatprep.mubr.msk.f32.mxu1 %vm631_vm0, %v16089_v50  ;;  %v16849_v50 = vld [vmem:[#allocation2 + $0x1c8] sm:$0xff] }
 0x2d3   : > { %13177 = vmatmul.mubr.msk.f32.gmra.mrb[52].mxu0 %vm631_vm0, %v16294_v23  ;;  %v18588_v23 = vld [vmem:[#allocation11_spill] sm:$0xff] }
 0x2d4   : > { %13798 = vmatmul.mubr.msk.f32.gmra.mrb[18].mxu1 %vm631_vm0, %v16099_v60  ;;  %13179 = vmatprep.mubr.msk.f32.mxu0 %vm631_vm0, %v16300_v25  ;;  %v18589_v25 = vld [vmem:[#allocation12_spill] sm:$0xff]  ;;  %v18596_v60 = vld [vmem:[#allocation19_spill] sm:$0xff] }
 0x2d5   : > { %13800 = vmatprep.mubr.msk.f32.mxu1 %vm631_vm0, %v16108_v4  ;;  %v16855_v4 = vld [vmem:[#allocation2 + $0x1d0] sm:$0xff] }
 0x2d7   : > { %13180 = vmatmul.mubr.msk.f32.gmra.mrb[54].mxu0 %vm631_vm0, %v16306_v28  ;;  %v18590_v28 = vld [vmem:[#allocation13_spill] sm:$0xff] }
 0x2d8   : > { %13801 = vmatmul.mubr.msk.f32.gmra.mrb[20].mxu1 %vm631_vm0, %v16116_v8  ;;  %13182 = vmatprep.mubr.msk.f32.mxu0 %vm631_vm0, %v16312_v32  ;;  %v18591_v32 = vld [vmem:[#allocation14_spill] sm:$0xff]  ;;  %v18597_v8 = vld [vmem:[#allocation20_spill] sm:$0xff] }
 0x2d9   : > { %13803 = vmatprep.mubr.msk.f32.mxu1 %vm631_vm0, %v16124_v18  ;;  %v16861_v18 = vld [vmem:[#allocation2 + $0x1e8] sm:$0xff] }
 0x2db   : > { %13183 = vmatmul.mubr.msk.f32.gmra.mrb[56].mxu0 %vm631_vm0, %v16318_v37  ;;  %v18592_v37 = vld [vmem:[#allocation15_spill] sm:$0xff] }
 0x2dc   : > { %13804 = vmatmul.mubr.msk.f32.gmra.mrb[22].mxu1 %vm631_vm0, %v16132_v30  ;;  %13185 = vmatprep.mubr.msk.f32.mxu0 %vm631_vm0, %v16324_v39  ;;  %v18593_v39 = vld [vmem:[#allocation16_spill] sm:$0xff]  ;;  %v18598_v30 = vld [vmem:[#allocation21_spill] sm:$0xff] }
 0x2dd   : > { %13806 = vmatprep.mubr.msk.f32.mxu1 %vm631_vm0, %v16138_v31  ;;  %v16867_v31 = vld [vmem:[#allocation2 + $0x1f0] sm:$0xff] }
 0x2df   : > { %13186 = vmatmul.mubr.msk.f32.gmra.mrb[58].mxu0 %vm631_vm0, %v16330_v43  ;;  %v18594_v43 = vld [vmem:[#allocation17_spill] sm:$0xff] }
 0x2e0   : > { %13807 = vmatmul.mubr.msk.f32.gmra.mrb[24].mxu1 %vm631_vm0, %v16143_v36  ;;  %13188 = vmatprep.mubr.msk.f32.mxu0 %vm631_vm0, %v16336_v48  ;;  %v18595_v48 = vld [vmem:[#allocation18_spill] sm:$0xff] }
 0x2e1   : > { %13809 = vmatprep.mubr.msk.f32.mxu1 %vm631_vm0, %v6399_v40  ;;  %v18599_v36 = vld [vmem:[#allocation22_spill] sm:$0xff]  ;;  %v18605_v40 = vld [vmem:[#allocation28_spill] sm:$0xff] }
 0x2e3   : > { %13189 = vmatmul.mubr.msk.f32.gmra.mrb[60].mxu0 %vm631_vm0, %v18582_v51  ;;  %v16915_v51 = vld [vmem:[#allocation2 + $0x270] sm:$0xff] }
 0x2e4   : > { %13810 = vmatmul.mubr.msk.f32.gmra.mrb[26].mxu1 %vm631_vm0, %v6400_v45  ;;  %13191 = vmatprep.mubr.msk.f32.mxu0 %vm631_vm0, %v16742_v53  ;;  %v16909_v45 = vld [vmem:[#allocation2 + $0x268] sm:$0xff] }
 0x2e5   : > { %13812 = vmatprep.mubr.msk.f32.mxu1 %vm631_vm0, %v6401_v49  ;;  %v18606_v49 = vld [vmem:[#allocation29_spill] sm:$0xff] }
 0x2e7   : > { %13192 = vmatmul.mubr.msk.f32.gmra.mrb[62].mxu0 %vm631_vm0, %v16747_v58 }
 0x2e8   : > { %13813 = vmatmul.mubr.msk.f32.gmra.mrb[28].mxu1 %vm631_vm0, %v6402_v54  ;;  %13198 = vmatprep.mubr.msk.f32.mxu0 %vm631_vm0, %v15345_v61  ;;  %v18607_v54 = vld [vmem:[#allocation30_spill] sm:$0xff]  ;;  %v18609_v61 = vld [vmem:[#allocation36_spill] sm:$0xff] }
 0x2e9   : > { %13815 = vmatprep.mubr.msk.f32.mxu1 %vm631_vm0, %v6403_v57  ;;  %v18608_v57 = vld [vmem:[#allocation31_spill] sm:$0xff] }
 0x2eb   : > { %13199 = vmatmul.mubr.msk.f32.vlgmr.msra.gmra.mrb[32].mxu0 %vm631_vm0, %v18583_v0  ;;  %v18611_v0 = vld [vmem:[#allocation37_spill] sm:$0xff] }
 0x2ec   : > { %13816 = vmatmul.mubr.msk.f32.gmra.mrb[30].mxu1 %vm631_vm0, %v6404_v62  ;;  %13201 = vmatprep.mubr.msk.f32.mxu0 %vm631_vm0, %v18584_v2  ;;  %v16925_v62 = vld [vmem:[#allocation2 + $0x2a8] sm:$0xff]  ;;  %v18612_v2 = vld [vmem:[#allocation33_spill] sm:$0xff] }
 0x2ed   : > { %13822 = vmatprep.mubr.msk.f32.mxu1 %vm631_vm0, %v16760_v1  ;;  %13247 = vmatpush3.bf16.msra.mxu0 %v16635_v52  ;;  %v18604_v52 = vld [vmem:[#allocation27_spill] sm:$0xff] }
 0x2ee   : > { %13248 = vmatprep.subr.bf16.mxu0 %v15314_v63 }
 0x2ef   : > { %13202 = vmatmul.mubr.msk.f32.gmra.mrb[34].mxu0 %vm631_vm0, %v18585_v9  ;;  %v6771_v9 = vld [vmem:[#allocation2 + $0x2c8] sm:$0xff] }
 0x2f0   : > { %13823 = vmatmul.mubr.msk.f32.vlgmr.msra.gmra.mrb[0].mxu1 %vm631_vm0, %v16770_v6  ;;  %13204 = vmatprep.mubr.msk.f32.mxu0 %vm631_vm0, %v18586_v10  ;;  %v18613_v10 = vld [vmem:[#allocation34_spill] sm:$0xff] }
 0x2f1   : > { %13871 = vmatpush3.bf16.msra.mxu1 %v16640_v56  ;;  %13825 = vmatprep.mubr.msk.f32.mxu1 %vm631_vm0, %v16779_v12  ;;  %v16903_v56 = vld [vmem:[#allocation2 + $0x250] sm:$0xff] }
 0x2f2   : > { %13872 = vmatprep.subr.bf16.mxu1 %v15312_v5  ;;  %13249 = vmatpush3.bf16.msra.mxu0 %v15314_v63  ;;  %v18610_v63 = vld [vmem:[#allocation32_spill] sm:$0xff] }
 0x2f3   : > { %13205 = vmatmul.mubr.msk.f32.gmra.mrb[36].mxu0 %vm631_vm0, %v18587_v19  ;;  %13298 = vmatprep.subr.bf16.mxu0 %v16786_v13  ;;  %v6772_v19 = vld [vmem:[#allocation2 + $0x2d0] sm:$0xff] }
 0x2f4   : > { %13826 = vmatmul.mubr.msk.f32.gmra.mrb[2].mxu1 %vm631_vm0, %v16788_v15  ;;  %13207 = vmatprep.mubr.msk.f32.mxu0 %vm631_vm0, %v18588_v23  ;;  %v6773_v23 = vld [vmem:[#allocation2 + $0x2e8] sm:$0xff] }
 0x2f5   : > { %13828 = vmatprep.mubr.msk.f32.mxu1 %vm631_vm0, %v16799_v20  ;;  %13873 = vmatpush3.bf16.msra.mxu1 %v15312_v5  ;;  %v16935_v5 = vld [vmem:[#allocation2 + $0x2b0] sm:$0xff] }
 0x2f6   : > { %13922 = vmatprep.subr.bf16.mxu1 %v16793_v16 }
 0x2f7   : > { %13208 = vmatmul.mubr.msk.f32.gmra.mrb[38].mxu0 %vm631_vm0, %v18589_v25  ;;  %v18614_v25 = vld [vmem:[#allocation38_spill] sm:$0xff] }
 0x2f8   : > { %13829 = vmatmul.mubr.msk.f32.gmra.mrb[4].mxu1 %vm631_vm0, %v16806_v24  ;;  %13210 = vmatprep.mubr.msk.f32.mxu0 %vm631_vm0, %v18590_v28  ;;  %v6774_v28 = vld [vmem:[#allocation2 + $0x2f0] sm:$0xff] }
 0x2f9   : > { %13831 = vmatprep.mubr.msk.f32.mxu1 %vm631_vm0, %v16813_v27 }
 0x2fb   : > { %13211 = vmatmul.mubr.msk.f32.gmra.mrb[40].mxu0 %vm631_vm0, %v18591_v32  ;;  %v15318_v32 = vld [vmem:[%s18410_s3 + $0x68] sm:$0xff]  }
 0x2fc   : > { %13832 = vmatmul.mubr.msk.f32.gmra.mrb[6].mxu1 %vm631_vm0, %v16819_v29  ;;  %13213 = vmatprep.mubr.msk.f32.mxu0 %vm631_vm0, %v18592_v37  ;;  %v18615_v37 = vld [vmem:[#allocation39_spill] sm:$0xff] }
 0x2fd   : > { %13834 = vmatprep.mubr.msk.f32.mxu1 %vm631_vm0, %v16825_v34 }
 0x2ff   : > { %13214 = vmatmul.mubr.msk.f32.gmra.mrb[42].mxu0 %vm631_vm0, %v18593_v39  ;;  %v18616_v39 = vld [vmem:[#allocation40_spill] sm:$0xff] }
 0x300   : > { %13835 = vmatmul.mubr.msk.f32.gmra.mrb[8].mxu1 %vm631_vm0, %v16831_v38  ;;  %13216 = vmatprep.mubr.msk.f32.mxu0 %vm631_vm0, %v18594_v43  ;;  %v15316_v43 = vld [vmem:[%s18410_s3 + $0x128] sm:$0xff]  }
 0x301   : > { %13837 = vmatprep.mubr.msk.f32.mxu1 %vm631_vm0, %v16837_v41 }
 0x303   : > { %13217 = vmatmul.mubr.msk.f32.gmra.mrb[44].mxu0 %vm631_vm0, %v18595_v48  ;;  %v18617_v48 = vld [vmem:[#allocation41_spill] sm:$0xff] }
 0x304   : > { %13838 = vmatmul.mubr.msk.f32.gmra.mrb[10].mxu1 %vm631_vm0, %v16843_v44  ;;  %13219 = vmatprep.mubr.msk.f32.mxu0 %vm631_vm0, %v18596_v60  ;;  %v18618_v60 = vld [vmem:[#allocation46_spill] sm:$0xff] }
 0x305   : > { %13840 = vmatprep.mubr.msk.f32.mxu1 %vm631_vm0, %v16849_v50 }
 0x307   : > { %13220 = vmatmul.mubr.msk.f32.gmra.mrb[46].mxu0 %vm631_vm0, %v18597_v8  ;;  %v18619_v8 = vld [vmem:[#allocation42_spill] sm:$0xff] }
 0x308   : > { %13841 = vmatmul.mubr.msk.f32.gmra.mrb[12].mxu1 %vm631_vm0, %v16855_v4  ;;  %13222 = vmatprep.mubr.msk.f32.mxu0 %vm631_vm0, %v18598_v30  ;;  %v18620_v30 = vld [vmem:[#allocation48_spill] sm:$0xff] }
 0x309   : > { %13843 = vmatprep.mubr.msk.f32.mxu1 %vm631_vm0, %v16861_v18 }
 0x30b   : > { %13223 = vmatmul.mubr.msk.f32.gmra.mrb[48].mxu0 %vm631_vm0, %v18599_v36  ;;  %v18621_v36 = vld [vmem:[#allocation43_spill] sm:$0xff] }
 0x30c   : > { %13844 = vmatmul.mubr.msk.f32.gmra.mrb[14].mxu1 %vm631_vm0, %v16867_v31  ;;  %13225 = vmatprep.mubr.msk.f32.mxu0 %vm631_vm0, %v18600_v33  ;;  %v18623_v33 = vld [vmem:[#allocation44_spill] sm:$0xff] }
 0x30d   : > { %13846 = vmatprep.mubr.msk.f32.mxu1 %vm631_vm0, %v16873_v21 }
 0x30f   : > { %13226 = vmatmul.mubr.msk.f32.gmra.mrb[50].mxu0 %vm631_vm0, %v18601_v46  ;;  %v18624_v46 = vld [vmem:[#allocation52_spill] sm:$0xff] }
 0x310   : > { %13847 = vmatmul.mubr.msk.f32.gmra.mrb[16].mxu1 %vm631_vm0, %v16879_v42  ;;  %13228 = vmatprep.mubr.msk.f32.mxu0 %vm631_vm0, %v18602_v26  ;;  %v18625_v26 = vld [vmem:[#allocation45_spill] sm:$0xff] }
 0x311   : > { %13849 = vmatprep.mubr.msk.f32.mxu1 %vm631_vm0, %v16885_v55 }
 0x313   : > { %13229 = vmatmul.mubr.msk.f32.gmra.mrb[52].mxu0 %vm631_vm0, %v18603_v11  ;;  %v18626_v11 = vld [vmem:[#allocation54_spill] sm:$0xff] }
 0x314   : > { %13850 = vmatmul.mubr.msk.f32.gmra.mrb[18].mxu1 %vm631_vm0, %v16891_v35  ;;  %13231 = vmatprep.mubr.msk.f32.mxu0 %vm631_vm0, %v18604_v52  ;;  %v18627_v52 = vld [vmem:[#allocation47_spill] sm:$0xff] }
 0x315   : > { %13852 = vmatprep.mubr.msk.f32.mxu1 %vm631_vm0, %v16897_v47 }
 0x317   : > { %13232 = vmatmul.mubr.msk.f32.gmra.mrb[54].mxu0 %vm631_vm0, %v18605_v40  ;;  %v18628_v40 = vld [vmem:[#allocation56_spill] sm:$0xff] }
 0x318   : > { %13853 = vmatmul.mubr.msk.f32.gmra.mrb[20].mxu1 %vm631_vm0, %v16903_v56  ;;  %13234 = vmatprep.mubr.msk.f32.mxu0 %vm631_vm0, %v18606_v49  ;;  %v18629_v49 = vld [vmem:[#allocation49_spill] sm:$0xff] }
 0x319   : > { %13855 = vmatprep.mubr.msk.f32.mxu1 %vm631_vm0, %v16909_v45 }
 0x31b   : > { %13235 = vmatmul.mubr.msk.f32.gmra.mrb[56].mxu0 %vm631_vm0, %v18607_v54  ;;  %v18630_v54 = vld [vmem:[#allocation58_spill] sm:$0xff] }
 0x31c   : > { %13856 = vmatmul.mubr.msk.f32.gmra.mrb[22].mxu1 %vm631_vm0, %v16915_v51  ;;  %13237 = vmatprep.mubr.msk.f32.mxu0 %vm631_vm0, %v18608_v57  ;;  %v18631_v57 = vld [vmem:[#allocation51_spill] sm:$0xff] }
 0x31d   : > { %13858 = vmatprep.mubr.msk.f32.mxu1 %vm631_vm0, %v18609_v61 }
 0x31f   : > { %13238 = vmatmul.mubr.msk.f32.gmra.mrb[58].mxu0 %vm631_vm0, %v18610_v63  ;;  %v18633_v63 = vld [vmem:[#allocation53_spill] sm:$0xff] }
 0x320   : > { %13859 = vmatmul.mubr.msk.f32.gmra.mrb[24].mxu1 %vm631_vm0, %v18611_v0  ;;  %13240 = vmatprep.mubr.msk.f32.mxu0 %vm631_vm0, %v18612_v2  ;;  %v18635_v2 = vld [vmem:[#allocation55_spill] sm:$0xff] }
 0x321   : > { %13861 = vmatprep.mubr.msk.f32.mxu1 %vm631_vm0, %v16925_v62 }
 0x323   : > { %13241 = vmatmul.mubr.msk.f32.gmra.mrb[60].mxu0 %vm631_vm0, %v18613_v10  ;;  %v18637_v10 = vld [vmem:[#allocation57_spill] sm:$0xff] }
 0x324   : > { %13862 = vmatmul.mubr.msk.f32.gmra.mrb[26].mxu1 %vm631_vm0, %v16935_v5  ;;  %13243 = vmatprep.mubr.msk.f32.mxu0 %vm631_vm0, %v18609_v61  ;;  %v18632_v61 = vld [vmem:[#allocation60_spill] sm:$0xff] }
 0x325   : > { %13864 = vmatprep.mubr.msk.f32.mxu1 %vm631_vm0, %v6771_v9  ;;  %v18636_v9 = vld [vmem:[#allocation64_spill] sm:$0xff] }
 0x327   : > { %13244 = vmatmul.mubr.msk.f32.gmra.mrb[62].mxu0 %vm631_vm0, %v18611_v0  ;;  %v18634_v0 = vld [vmem:[#allocation62_spill] sm:$0xff] }
 0x328   : > { %13865 = vmatmul.mubr.msk.f32.gmra.mrb[28].mxu1 %vm631_vm0, %v6772_v19  ;;  %13250 = vmatprep.mubr.msk.f32.mxu0 %vm631_vm0, %v18614_v25  ;;  %v18638_v19 = vld [vmem:[#allocation66_spill] sm:$0xff]  ;;  %v18640_v25 = vld [vmem:[#allocation68_spill] sm:$0xff] }
 0x329   : > { %13867 = vmatprep.mubr.msk.f32.mxu1 %vm631_vm0, %v6773_v23  ;;  %v18639_v23 = vld [vmem:[#allocation59_spill] sm:$0xff] }
 0x32b   : > { %13251 = vmatmul.mubr.msk.f32.vlgmr.msra.gmra.mrb[32].mxu0 %vm631_vm0, %v18615_v37  ;;  %v18643_v37 = vld [vmem:[#allocation63_spill] sm:$0xff] }
 0x32c   : > { %13868 = vmatmul.mubr.msk.f32.gmra.mrb[30].mxu1 %vm631_vm0, %v6774_v28  ;;  %13253 = vmatprep.mubr.msk.f32.mxu0 %vm631_vm0, %v18616_v39  ;;  %v18641_v28 = vld [vmem:[#allocation61_spill] sm:$0xff]  ;;  %v18644_v39 = vld [vmem:[#allocation72_spill] sm:$0xff] }
 0x32d   : > { %13874 = vmatprep.mubr.msk.f32.mxu1 %vm631_vm0, %v16410_v22  ;;  %13299 = vmatpush3.bf16.msra.mxu0 %v16786_v13  ;;  %v16976_v22 = vld [vmem:[%s18410_s3 + $0x70] sm:$0xff]  }
 0x32e   : > { %13300 = vmatprep.subr.bf16.mxu0 %v15318_v32  ;;  %v16981_v13 = vld [vmem:[%s18410_s3 + $0x130] sm:$0xff]  }
 0x32f   : > { %13254 = vmatmul.mubr.msk.f32.gmra.mrb[34].mxu0 %vm631_vm0, %v18617_v48  ;;  %v18646_v48 = vld [vmem:[#allocation74_spill] sm:$0xff] }
 0x330   : > { %13875 = vmatmul.mubr.msk.f32.vlgmr.msra.gmra.mrb[0].mxu1 %vm631_vm0, %v18618_v60  ;;  %13256 = vmatprep.mubr.msk.f32.mxu0 %vm631_vm0, %v18619_v8  ;;  %v18647_v60 = vld [vmem:[#allocation67_spill] sm:$0xff]  ;;  %v18648_v8 = vld [vmem:[#allocation76_spill] sm:$0xff] }
 0x331   : > { %13923 = vmatpush3.bf16.msra.mxu1 %v16793_v16  ;;  %13877 = vmatprep.mubr.msk.f32.mxu1 %vm631_vm0, %v18620_v30  ;;  %v18622_v16 = vld [vmem:[#allocation50_spill] sm:$0xff]  ;;  %v18649_v30 = vld [vmem:[#allocation69_spill] sm:$0xff] }
 0x332   : > { %13924 = vmatprep.subr.bf16.mxu1 %v15316_v43  ;;  %13301 = vmatpush3.bf16.msra.mxu0 %v15318_v32  ;;  %v18642_v32 = vld [vmem:[#allocation70_spill] sm:$0xff] }
 0x333   : > { %13257 = vmatmul.mubr.msk.f32.gmra.mrb[36].mxu0 %vm631_vm0, %v18621_v36  ;;  %13350 = vmatprep.subr.bf16.mxu0 %v16976_v22  ;;  %v18650_v36 = vld [vmem:[#allocation78_spill] sm:$0xff] }
 0x334   : > { %13878 = vmatmul.mubr.msk.f32.gmra.mrb[2].mxu1 %vm631_vm0, %v18622_v16  ;;  %13259 = vmatprep.mubr.msk.f32.mxu0 %vm631_vm0, %v18623_v33  ;;  %v18651_v16 = vld [vmem:[#allocation71_spill] sm:$0xff]  ;;  %v18652_v33 = vld [vmem:[#allocation80_spill] sm:$0xff] }
 0x335   : > { %13880 = vmatprep.mubr.msk.f32.mxu1 %vm631_vm0, %v18624_v46  ;;  %13925 = vmatpush3.bf16.msra.mxu1 %v15316_v43  ;;  %v18645_v43 = vld [vmem:[#allocation65_spill] sm:$0xff] }
 0x336   : > { %13974 = vmatprep.subr.bf16.mxu1 %v16981_v13  ;;  %v18653_v46 = vld [vmem:[#allocation73_spill] sm:$0xff] }
 0x337   : > { %13260 = vmatmul.mubr.msk.f32.gmra.mrb[38].mxu0 %vm631_vm0, %v18625_v26  ;;  %v18654_v26 = vld [vmem:[#allocation82_spill] sm:$0xff] }
 0x338   : > { %13881 = vmatmul.mubr.msk.f32.gmra.mrb[4].mxu1 %vm631_vm0, %v18626_v11  ;;  %13262 = vmatprep.mubr.msk.f32.mxu0 %vm631_vm0, %v18627_v52  ;;  %v18655_v11 = vld [vmem:[#allocation75_spill] sm:$0xff]  ;;  %v18656_v52 = vld [vmem:[#allocation84_spill] sm:$0xff] }
 0x339   : > { %13883 = vmatprep.mubr.msk.f32.mxu1 %vm631_vm0, %v18628_v40  ;;  %v18657_v40 = vld [vmem:[#allocation77_spill] sm:$0xff] }
 0x33b   : > { %13263 = vmatmul.mubr.msk.f32.gmra.mrb[40].mxu0 %vm631_vm0, %v18629_v49  ;;  %v18658_v49 = vld [vmem:[#allocation79_spill] sm:$0xff] }
 0x33c   : > { %13884 = vmatmul.mubr.msk.f32.gmra.mrb[6].mxu1 %vm631_vm0, %v18630_v54  ;;  %13265 = vmatprep.mubr.msk.f32.mxu0 %vm631_vm0, %v18631_v57  ;;  %v18659_v54 = vld [vmem:[#allocation87_spill] sm:$0xff]  ;;  %v18660_v57 = vld [vmem:[#allocation81_spill] sm:$0xff] }
 0x33d   : > { %13886 = vmatprep.mubr.msk.f32.mxu1 %vm631_vm0, %v18632_v61  ;;  %v18661_v61 = vld [vmem:[#allocation83_spill] sm:$0xff] }
 0x33f   : > { %13266 = vmatmul.mubr.msk.f32.gmra.mrb[42].mxu0 %vm631_vm0, %v18633_v63  ;;  %v7139_v63 = vld [vmem:[#allocation2 + $0x2ab] sm:$0xff] }
 0x340   : > { %13887 = vmatmul.mubr.msk.f32.gmra.mrb[8].mxu1 %vm631_vm0, %v18634_v0  ;;  %13268 = vmatprep.mubr.msk.f32.mxu0 %vm631_vm0, %v18635_v2  ;;  %v18663_v0 = vld [vmem:[#allocation86_spill] sm:$0xff]  ;;  %v7140_v2 = vld [vmem:[#allocation2 + $0x2b3] sm:$0xff] }
 0x341   : > { %13889 = vmatprep.mubr.msk.f32.mxu1 %vm631_vm0, %v18636_v9  ;;  %v7143_v9 = vld [vmem:[#allocation2 + $0x2eb] sm:$0xff] }
 0x343   : > { %13269 = vmatmul.mubr.msk.f32.gmra.mrb[44].mxu0 %vm631_vm0, %v18637_v10  ;;  %v17088_v10 = vld [vmem:[#allocation2 + $0x291] sm:$0xff] }
 0x344   : > { %13890 = vmatmul.mubr.msk.f32.gmra.mrb[10].mxu1 %vm631_vm0, %v18638_v19  ;;  %13271 = vmatprep.mubr.msk.f32.mxu0 %vm631_vm0, %v18639_v23  ;;  %v3169_v19 = vld [vmem:[#allocation2 + $0xc7] sm:$0xff] }
 0x345   : > { %13892 = vmatprep.mubr.msk.f32.mxu1 %vm631_vm0, %v18640_v25  ;;  %v7483_v23 = vld [vmem:[#allocation2 + $0x3] sm:$0xff]  ;;  %v3170_v25 = vld [vmem:[#allocation2 + $0xcf] sm:$0xff] }
 0x347   : > { %13272 = vmatmul.mubr.msk.f32.gmra.mrb[46].mxu0 %vm631_vm0, %v18641_v28  ;;  %v15322_v28 = vld [vmem:[%s18410_s3 + $0x78] sm:$0xff]  }
 0x348   : > { %13893 = vmatmul.mubr.msk.f32.gmra.mrb[12].mxu1 %vm631_vm0, %v18642_v32  ;;  %13274 = vmatprep.mubr.msk.f32.mxu0 %vm631_vm0, %v18643_v37  ;;  %v3171_v32 = vld [vmem:[#allocation2 + $0xe7] sm:$0xff] }
 0x349   : > { %13895 = vmatprep.mubr.msk.f32.mxu1 %vm631_vm0, %v18644_v39  ;;  %v7484_v37 = vld [vmem:[#allocation2 + $0xb] sm:$0xff]  ;;  %v15320_v39 = vld [vmem:[%s18410_s3 + $0x138] sm:$0xff]  }
 0x34b   : > { %13275 = vmatmul.mubr.msk.f32.gmra.mrb[48].mxu0 %vm631_vm0, %v18645_v43  ;;  %v3172_v43 = vld [vmem:[#allocation2 + $0xef] sm:$0xff] }
 0x34c   : > { %13896 = vmatmul.mubr.msk.f32.gmra.mrb[14].mxu1 %vm631_vm0, %v18646_v48  ;;  %13277 = vmatprep.mubr.msk.f32.mxu0 %vm631_vm0, %v18647_v60  ;;  %v7485_v48 = vld [vmem:[#allocation2 + $0x23] sm:$0xff] }
 0x34d   : > { %13898 = vmatprep.mubr.msk.f32.mxu1 %vm631_vm0, %v18648_v8  ;;  %v3173_v60 = vld [vmem:[#allocation2 + $0x107] sm:$0xff] }
 0x34e   : > { %v7486_v8 = vld [vmem:[#allocation2 + $0x2b] sm:$0xff] }
 0x34f   : > { %13278 = vmatmul.mubr.msk.f32.gmra.mrb[50].mxu0 %vm631_vm0, %v18649_v30  ;;  %v7487_v30 = vld [vmem:[#allocation2 + $0x43] sm:$0xff] }
 0x350   : > { %13899 = vmatmul.mubr.msk.f32.gmra.mrb[16].mxu1 %vm631_vm0, %v18650_v36  ;;  %13280 = vmatprep.mubr.msk.f32.mxu0 %vm631_vm0, %v18651_v16  ;;  %v3174_v36 = vld [vmem:[#allocation2 + $0x10f] sm:$0xff]  ;;  %v17119_v16 = vld [vmem:[%s18410_s3 + $0x140] sm:$0xff]  }
 0x351   : > { %13901 = vmatprep.mubr.msk.f32.mxu1 %vm631_vm0, %v18652_v33  ;;  %v7488_v33 = vld [vmem:[#allocation2 + $0x4b] sm:$0xff] }
 0x353   : > { %13281 = vmatmul.mubr.msk.f32.gmra.mrb[52].mxu0 %vm631_vm0, %v18653_v46  ;;  %v7489_v46 = vld [vmem:[#allocation2 + $0x63] sm:$0xff] }
 0x354   : > { %13902 = vmatmul.mubr.msk.f32.gmra.mrb[18].mxu1 %vm631_vm0, %v18654_v26  ;;  %13283 = vmatprep.mubr.msk.f32.mxu0 %vm631_vm0, %v18655_v11  ;;  %v3176_v26 = vld [vmem:[#allocation2 + $0x12f] sm:$0xff]  ;;  %v3177_v11 = vld [vmem:[#allocation2 + $0x147] sm:$0xff] }
 0x355   : > { %13904 = vmatprep.mubr.msk.f32.mxu1 %vm631_vm0, %v18656_v52  ;;  %v7490_v52 = vld [vmem:[#allocation2 + $0x6b] sm:$0xff] }
 0x357   : > { %13284 = vmatmul.mubr.msk.f32.gmra.mrb[54].mxu0 %vm631_vm0, %v18657_v40  ;;  %v7491_v40 = vld [vmem:[#allocation2 + $0x83] sm:$0xff] }
 0x358   : > { %13905 = vmatmul.mubr.msk.f32.gmra.mrb[20].mxu1 %vm631_vm0, %v16578_v7  ;;  %13286 = vmatprep.mubr.msk.f32.mxu0 %vm631_vm0, %v18658_v49  ;;  %v18662_v7 = vld [vmem:[#allocation85_spill] sm:$0xff]  ;;  %v3178_v49 = vld [vmem:[#allocation2 + $0x14f] sm:$0xff] }
 0x359   : > { %13907 = vmatprep.mubr.msk.f32.mxu1 %vm631_vm0, %v18659_v54  ;;  %v3179_v54 = vld [vmem:[#allocation2 + $0x167] sm:$0xff] }
 0x35b   : > { %13287 = vmatmul.mubr.msk.f32.gmra.mrb[56].mxu0 %vm631_vm0, %v18660_v57  ;;  %v7492_v57 = vld [vmem:[#allocation2 + $0x8b] sm:$0xff] }
 0x35c   : > { %13908 = vmatmul.mubr.msk.f32.gmra.mrb[22].mxu1 %vm631_vm0, %v16594_v17  ;;  %13289 = vmatprep.mubr.msk.f32.mxu0 %vm631_vm0, %v18661_v61  ;;  %v7141_v17 = vld [vmem:[#allocation2 + $0x2cb] sm:$0xff] }
 0x35d   : > { %13910 = vmatprep.mubr.msk.f32.mxu1 %vm631_vm0, %v16600_v3  ;;  %v17083_v3 = vld [vmem:[#allocation2 + $0x289] sm:$0xff] }
 0x35e   : > { %v3180_v61 = vld [vmem:[#allocation2 + $0x16f] sm:$0xff] }
 0x35f   : > { %13290 = vmatmul.mubr.msk.f32.gmra.mrb[58].mxu0 %vm631_vm0, %v18662_v7  ;;  %v17137_v7 = vld [vmem:[#allocation2 + $0xa3] sm:$0xff] }
 0x360   : > { %13911 = vmatmul.mubr.msk.f32.gmra.mrb[24].mxu1 %vm631_vm0, %v16606_v59  ;;  %13292 = vmatprep.mubr.msk.f32.mxu0 %vm631_vm0, %v18663_v0  ;;  %v7142_v59 = vld [vmem:[#allocation2 + $0x2d3] sm:$0xff] }
 0x361   : > { %13913 = vmatprep.mubr.msk.f32.mxu1 %vm631_vm0, %v7139_v63  ;;  %v3181_v63 = vld [vmem:[#allocation2 + $0x187] sm:$0xff]  ;;  %v3182_v0 = vld [vmem:[#allocation2 + $0x18f] sm:$0xff] }
 0x363   : > { %13293 = vmatmul.mubr.msk.f32.gmra.mrb[60].mxu0 %vm631_vm0, %v16592_v14  ;;  %v7144_v14 = vld [vmem:[#allocation2 + $0x2f3] sm:$0xff] }
 0x364   : > { %13914 = vmatmul.mubr.msk.f32.gmra.mrb[26].mxu1 %vm631_vm0, %v7140_v2  ;;  %13295 = vmatprep.mubr.msk.f32.mxu0 %vm631_vm0, %v17083_v3  ;;  %v17142_v2 = vld [vmem:[#allocation2 + $0xab] sm:$0xff] }
 0x365   : > { %13916 = vmatprep.mubr.msk.f32.mxu1 %vm631_vm0, %v7141_v17  ;;  %v3183_v17 = vld [vmem:[#allocation2 + $0x1a7] sm:$0xff] }
 0x367   : > { %13296 = vmatmul.mubr.msk.f32.gmra.mrb[62].mxu0 %vm631_vm0, %v17088_v10 }
 0x368   : > { %13917 = vmatmul.mubr.msk.f32.gmra.mrb[28].mxu1 %vm631_vm0, %v7142_v59  ;;  %13302 = vmatprep.mubr.msk.f32.mxu0 %vm631_vm0, %v3169_v19  ;;  %v17147_v59 = vld [vmem:[#allocation2 + $0xc3] sm:$0xff]  ;;  %v17152_v19 = vld [vmem:[#allocation2 + $0xcb] sm:$0xff] }
 0x369   : > { %13919 = vmatprep.mubr.msk.f32.mxu1 %vm631_vm0, %v7143_v9  ;;  %v3184_v9 = vld [vmem:[#allocation2 + $0x1af] sm:$0xff] }
 0x36b   : > { %13303 = vmatmul.mubr.msk.f32.vlgmr.msra.gmra.mrb[32].mxu0 %vm631_vm0, %v3170_v25  ;;  %v3186_v25 = vld [vmem:[#allocation2 + $0x1cf] sm:$0xff] }
 0x36c   : > { %13920 = vmatmul.mubr.msk.f32.gmra.mrb[30].mxu1 %vm631_vm0, %v7144_v14  ;;  %13305 = vmatprep.mubr.msk.f32.mxu0 %vm631_vm0, %v3171_v32  ;;  %v3185_v14 = vld [vmem:[#allocation2 + $0x1c7] sm:$0xff] }
 0x36d   : > { %13926 = vmatprep.mubr.msk.f32.mxu1 %vm631_vm0, %v7483_v23  ;;  %13351 = vmatpush3.bf16.msra.mxu0 %v16976_v22  ;;  %v17114_v22 = vld [vmem:[%s18410_s3 + $0x80] sm:$0xff]  }
 0x36e   : > { %13352 = vmatprep.subr.bf16.mxu0 %v15322_v28  ;;  %v17157_v23 = vld [vmem:[#allocation2 + $0xe3] sm:$0xff] }
 0x36f   : > { %13306 = vmatmul.mubr.msk.f32.gmra.mrb[34].mxu0 %vm631_vm0, %v3172_v43  ;;  %v3187_v32 = vld [vmem:[#allocation2 + $0x1e7] sm:$0xff] }
 0x370   : > { %13927 = vmatmul.mubr.msk.f32.vlgmr.msra.gmra.mrb[0].mxu1 %vm631_vm0, %v7484_v37  ;;  %13308 = vmatprep.mubr.msk.f32.mxu0 %vm631_vm0, %v3173_v60  ;;  %v17167_v37 = vld [vmem:[#allocation2 + $0x103] sm:$0xff]  ;;  %v17172_v43 = vld [vmem:[#allocation2 + $0x10b] sm:$0xff] }
 0x371   : > { %13975 = vmatpush3.bf16.msra.mxu1 %v16981_v13  ;;  %13929 = vmatprep.mubr.msk.f32.mxu1 %vm631_vm0, %v7485_v48  ;;  %v3175_v13 = vld [vmem:[#allocation2 + $0x127] sm:$0xff] }
 0x372   : > { %13976 = vmatprep.subr.bf16.mxu1 %v15320_v39  ;;  %13353 = vmatpush3.bf16.msra.mxu0 %v15322_v28  ;;  %v17162_v28 = vld [vmem:[#allocation2 + $0xeb] sm:$0xff]  ;;  %v17177_v60 = vld [vmem:[#allocation2 + $0x123] sm:$0xff] }
 0x373   : > { %13309 = vmatmul.mubr.msk.f32.gmra.mrb[36].mxu0 %vm631_vm0, %v3174_v36  ;;  %13402 = vmatprep.subr.bf16.mxu0 %v17114_v22  ;;  %v3189_v48 = vld [vmem:[#allocation2 + $0x207] sm:$0xff] }
 0x374   : > { %13930 = vmatmul.mubr.msk.f32.gmra.mrb[2].mxu1 %vm631_vm0, %v7486_v8  ;;  %13311 = vmatprep.mubr.msk.f32.mxu0 %vm631_vm0, %v3175_v13  ;;  %v3190_v8 = vld [vmem:[#allocation2 + $0x20f] sm:$0xff]  ;;  %v3191_v36 = vld [vmem:[#allocation2 + $0x227] sm:$0xff] }
 0x375   : > { %13932 = vmatprep.mubr.msk.f32.mxu1 %vm631_vm0, %v7487_v30  ;;  %13977 = vmatpush3.bf16.msra.mxu1 %v15320_v39  ;;  %v3188_v39 = vld [vmem:[#allocation2 + $0x1ef] sm:$0xff]  ;;  %v17187_v13 = vld [vmem:[#allocation2 + $0x143] sm:$0xff] }
 0x376   : > { %14026 = vmatprep.subr.bf16.mxu1 %v17119_v16  ;;  %v17182_v30 = vld [vmem:[#allocation2 + $0x12b] sm:$0xff] }
 0x377   : > { %13312 = vmatmul.mubr.msk.f32.gmra.mrb[38].mxu0 %vm631_vm0, %v3176_v26  ;;  %v3193_v26 = vld [vmem:[#allocation2 + $0x247] sm:$0xff] }
 0x378   : > { %13933 = vmatmul.mubr.msk.f32.gmra.mrb[4].mxu1 %vm631_vm0, %v7488_v33  ;;  %13314 = vmatprep.mubr.msk.f32.mxu0 %vm631_vm0, %v3177_v11  ;;  %v3192_v33 = vld [vmem:[#allocation2 + $0x22f] sm:$0xff]  ;;  %v17197_v11 = vld [vmem:[#allocation2 + $0x163] sm:$0xff] }
 0x379   : > { %13935 = vmatprep.mubr.msk.f32.mxu1 %vm631_vm0, %v7489_v46  ;;  %v17192_v46 = vld [vmem:[#allocation2 + $0x14b] sm:$0xff] }
 0x37b   : > { %13315 = vmatmul.mubr.msk.f32.gmra.mrb[40].mxu0 %vm631_vm0, %v3178_v49  ;;  %v3195_v49 = vld [vmem:[#allocation2 + $0x267] sm:$0xff] }
 0x37c   : > { %13936 = vmatmul.mubr.msk.f32.gmra.mrb[6].mxu1 %vm631_vm0, %v7490_v52  ;;  %13317 = vmatprep.mubr.msk.f32.mxu0 %vm631_vm0, %v3179_v54  ;;  %v3194_v52 = vld [vmem:[#allocation2 + $0x24f] sm:$0xff]  ;;  %v17207_v54 = vld [vmem:[#allocation2 + $0x183] sm:$0xff] }
 0x37d   : > { %13938 = vmatprep.mubr.msk.f32.mxu1 %vm631_vm0, %v7491_v40  ;;  %v17202_v40 = vld [vmem:[#allocation2 + $0x16b] sm:$0xff] }
 0x37f   : > { %13318 = vmatmul.mubr.msk.f32.gmra.mrb[42].mxu0 %vm631_vm0, %v3180_v61  ;;  %v17212_v61 = vld [vmem:[#allocation2 + $0x18b] sm:$0xff] }
 0x380   : > { %13939 = vmatmul.mubr.msk.f32.gmra.mrb[8].mxu1 %vm631_vm0, %v7492_v57  ;;  %13320 = vmatprep.mubr.msk.f32.mxu0 %vm631_vm0, %v3181_v63  ;;  %v3196_v57 = vld [vmem:[#allocation2 + $0x26f] sm:$0xff]  ;;  %v17217_v63 = vld [vmem:[#allocation2 + $0x1a3] sm:$0xff] }
 0x381   : > { %13941 = vmatprep.mubr.msk.f32.mxu1 %vm631_vm0, %v17137_v7 }
 0x383   : > { %13321 = vmatmul.mubr.msk.f32.gmra.mrb[44].mxu0 %vm631_vm0, %v3182_v0  ;;  %v3199_v0 = vld [vmem:[#allocation2 + $0x2a7] sm:$0xff] }
 0x384   : > { %13942 = vmatmul.mubr.msk.f32.gmra.mrb[10].mxu1 %vm631_vm0, %v17142_v2  ;;  %13323 = vmatprep.mubr.msk.f32.mxu0 %vm631_vm0, %v3183_v17  ;;  %v17223_v17 = vld [vmem:[#allocation2 + $0x1ab] sm:$0xff] }
 0x385   : > { %13944 = vmatprep.mubr.msk.f32.mxu1 %vm631_vm0, %v17147_v59 }
 0x387   : > { %13324 = vmatmul.mubr.msk.f32.gmra.mrb[46].mxu0 %vm631_vm0, %v3184_v9  ;;  %v17229_v9 = vld [vmem:[#allocation2 + $0x1c3] sm:$0xff] }
 0x388   : > { %13945 = vmatmul.mubr.msk.f32.gmra.mrb[12].mxu1 %vm631_vm0, %v17152_v19  ;;  %13326 = vmatprep.mubr.msk.f32.mxu0 %vm631_vm0, %v3185_v14  ;;  %v17234_v14 = vld [vmem:[#allocation2 + $0x1cb] sm:$0xff] }
 0x389   : > { %13947 = vmatprep.mubr.msk.f32.mxu1 %vm631_vm0, %v17157_v23 }
 0x38b   : > { %13327 = vmatmul.mubr.msk.f32.gmra.mrb[48].mxu0 %vm631_vm0, %v3186_v25  ;;  %v17239_v25 = vld [vmem:[#allocation2 + $0xc8] sm:$0xff] }
 0x38c   : > { %13948 = vmatmul.mubr.msk.f32.gmra.mrb[14].mxu1 %vm631_vm0, %v17162_v28  ;;  %13329 = vmatprep.mubr.msk.f32.mxu0 %vm631_vm0, %v3187_v32  ;;  %v7853_v32 = vld [vmem:[#allocation2 + $0x8] sm:$0xff] }
 0x38d   : > { %13950 = vmatprep.mubr.msk.f32.mxu1 %vm631_vm0, %v17167_v37 }
 0x38f   : > { %13330 = vmatmul.mubr.msk.f32.gmra.mrb[50].mxu0 %vm631_vm0, %v3188_v39  ;;  %v17247_v39 = vld [vmem:[#allocation2 + $0xd0] sm:$0xff] }
 0x390   : > { %13951 = vmatmul.mubr.msk.f32.gmra.mrb[16].mxu1 %vm631_vm0, %v17172_v43  ;;  %13332 = vmatprep.mubr.msk.f32.mxu0 %vm631_vm0, %v3189_v48  ;;  %v17249_v48 = vld [vmem:[#allocation2 + $0x1eb] sm:$0xff] }
 0x391   : > { %13953 = vmatprep.mubr.msk.f32.mxu1 %vm631_vm0, %v17177_v60 }
 0x393   : > { %13333 = vmatmul.mubr.msk.f32.gmra.mrb[52].mxu0 %vm631_vm0, %v3190_v8  ;;  %v15326_v8 = vld [vmem:[%s18410_s3 + $0x88] sm:$0xff]  }
 0x394   : > { %13954 = vmatmul.mubr.msk.f32.gmra.mrb[18].mxu1 %vm631_vm0, %v17182_v30  ;;  %13335 = vmatprep.mubr.msk.f32.mxu0 %vm631_vm0, %v3191_v36  ;;  %v17258_v36 = vld [vmem:[#allocation2 + $0xe8] sm:$0xff] }
 0x395   : > { %13956 = vmatprep.mubr.msk.f32.mxu1 %vm631_vm0, %v17187_v13 }
 0x397   : > { %13336 = vmatmul.mubr.msk.f32.gmra.mrb[54].mxu0 %vm631_vm0, %v3192_v33  ;;  %v7854_v33 = vld [vmem:[#allocation2 + $0x10] sm:$0xff] }
 0x398   : > { %13957 = vmatmul.mubr.msk.f32.gmra.mrb[20].mxu1 %vm631_vm0, %v17192_v46  ;;  %13338 = vmatprep.mubr.msk.f32.mxu0 %vm631_vm0, %v3193_v26  ;;  %v15324_v26 = vld [vmem:[%s18410_s3 + $0x148] sm:$0xff]  }
 0x399   : > { %13959 = vmatprep.mubr.msk.f32.mxu1 %vm631_vm0, %v17197_v11 }
 0x39b   : > { %13339 = vmatmul.mubr.msk.f32.gmra.mrb[56].mxu0 %vm631_vm0, %v3194_v52  ;;  %v17267_v52 = vld [vmem:[#allocation2 + $0xf0] sm:$0xff] }
 0x39c   : > { %13960 = vmatmul.mubr.msk.f32.gmra.mrb[22].mxu1 %vm631_vm0, %v17202_v40  ;;  %13341 = vmatprep.mubr.msk.f32.mxu0 %vm631_vm0, %v3195_v49  ;;  %v7855_v49 = vld [vmem:[#allocation2 + $0x28] sm:$0xff] }
 0x39d   : > { %13962 = vmatprep.mubr.msk.f32.mxu1 %vm631_vm0, %v17207_v54 }
 0x39f   : > { %13342 = vmatmul.mubr.msk.f32.gmra.mrb[58].mxu0 %vm631_vm0, %v3196_v57  ;;  %v7856_v57 = vld [vmem:[#allocation2 + $0x30] sm:$0xff] }
 0x3a0   : > { %13963 = vmatmul.mubr.msk.f32.gmra.mrb[24].mxu1 %vm631_vm0, %v17212_v61  ;;  %13344 = vmatprep.mubr.msk.f32.mxu0 %vm631_vm0, %v16742_v53  ;;  %v3200_v53 = vld [vmem:[#allocation2 + $0x2af] sm:$0xff] }
 0x3a1   : > { %13965 = vmatprep.mubr.msk.f32.mxu1 %vm631_vm0, %v17217_v63 }
 0x3a3   : > { %13345 = vmatmul.mubr.msk.f32.gmra.mrb[60].mxu0 %vm631_vm0, %v16747_v58  ;;  %v17241_v58 = vld [vmem:[#allocation2 + $0x1e3] sm:$0xff] }
 0x3a4   : > { %13966 = vmatmul.mubr.msk.f32.gmra.mrb[26].mxu1 %vm631_vm0, %v17223_v17  ;;  %13347 = vmatprep.mubr.msk.f32.mxu0 %vm631_vm0, %v3199_v0  ;;  %v17276_v0 = vld [vmem:[#allocation2 + $0x48] sm:$0xff] }
 0x3a5   : > { %13968 = vmatprep.mubr.msk.f32.mxu1 %vm631_vm0, %v17229_v9 }
 0x3a7   : > { %13348 = vmatmul.mubr.msk.f32.gmra.mrb[62].mxu0 %vm631_vm0, %v3200_v53  ;;  %v17286_v53 = vld [vmem:[%s18410_s3 + $0x150] sm:$0xff]  }
 0x3a8   : > { %13969 = vmatmul.mubr.msk.f32.gmra.mrb[28].mxu1 %vm631_vm0, %v17234_v14  ;;  %13354 = vmatprep.mubr.msk.f32.mxu0 %vm631_vm0, %v17239_v25 }
 0x3a9   : > { %13971 = vmatprep.mubr.msk.f32.mxu1 %vm631_vm0, %v17241_v58 }
 0x3ab   : > { %13355 = vmatmul.mubr.msk.f32.vlgmr.msra.gmra.mrb[32].mxu0 %vm631_vm0, %v17247_v39 }
 0x3ac   : > { %13972 = vmatmul.mubr.msk.f32.gmra.mrb[30].mxu1 %vm631_vm0, %v17249_v48  ;;  %13357 = vmatprep.mubr.msk.f32.mxu0 %vm631_vm0, %v17258_v36 }
 0x3ad   : > { %13978 = vmatprep.mubr.msk.f32.mxu1 %vm631_vm0, %v7853_v32  ;;  %13403 = vmatpush3.bf16.msra.mxu0 %v17114_v22  ;;  %v17281_v22 = vld [vmem:[%s18410_s3 + $0x90] sm:$0xff]   ;;  %v17297_v32 = vld [vmem:[#allocation2 + $0x68] sm:$0xff] }
 0x3ae   : > { %13404 = vmatprep.subr.bf16.mxu0 %v15326_v8 }
 0x3af   : > { %13358 = vmatmul.mubr.msk.f32.gmra.mrb[34].mxu0 %vm631_vm0, %v17267_v52 }
 0x3b0   : > { %13979 = vmatmul.mubr.msk.f32.vlgmr.msra.gmra.mrb[0].mxu1 %vm631_vm0, %v7854_v33  ;;  %13360 = vmatprep.mubr.msk.f32.mxu0 %vm631_vm0, %v16760_v1  ;;  %v17311_v33 = vld [vmem:[#allocation2 + $0x88] sm:$0xff] }
 0x3b1   : > { %14027 = vmatpush3.bf16.msra.mxu1 %v17119_v16  ;;  %13981 = vmatprep.mubr.msk.f32.mxu1 %vm631_vm0, %v7855_v49  ;;  %v17295_v16 = vld [vmem:[#allocation2 + $0x50] sm:$0xff]  ;;  %v17327_v49 = vld [vmem:[#allocation2 + $0xa8] sm:$0xff] }
 0x3b2   : > { %14028 = vmatprep.subr.bf16.mxu1 %v15324_v26  ;;  %13405 = vmatpush3.bf16.msra.mxu0 %v15326_v8  ;;  %v17309_v8 = vld [vmem:[#allocation2 + $0x70] sm:$0xff] }
 0x3b3   : > { %13361 = vmatmul.mubr.msk.f32.gmra.mrb[36].mxu0 %vm631_vm0, %v16770_v6  ;;  %13454 = vmatprep.subr.bf16.mxu0 %v17281_v22 }
 0x3b4   : > { %13982 = vmatmul.mubr.msk.f32.gmra.mrb[2].mxu1 %vm631_vm0, %v7856_v57  ;;  %13363 = vmatprep.mubr.msk.f32.mxu0 %vm631_vm0, %v16779_v12  ;;  %v17333_v57 = vld [vmem:[#allocation2 + $0xb0] sm:$0xff] }
 0x3b5   : > { %13984 = vmatprep.mubr.msk.f32.mxu1 %vm631_vm0, %v17276_v0  ;;  %14029 = vmatpush3.bf16.msra.mxu1 %v15324_v26  ;;  %v17321_v26 = vld [vmem:[#allocation2 + $0x90] sm:$0xff] }
 0x3b6   : > { %14078 = vmatprep.subr.bf16.mxu1 %v17286_v53 }
 0x3b7   : > { %13364 = vmatmul.mubr.msk.f32.gmra.mrb[38].mxu0 %vm631_vm0, %v16788_v15 }
 0x3b8   : > { %13985 = vmatmul.mubr.msk.f32.gmra.mrb[4].mxu1 %vm631_vm0, %v17295_v16  ;;  %13366 = vmatprep.mubr.msk.f32.mxu0 %vm631_vm0, %v16799_v20 }
 0x3b9   : > { %13987 = vmatprep.mubr.msk.f32.mxu1 %vm631_vm0, %v17297_v32 }
 0x3bb   : > { %13367 = vmatmul.mubr.msk.f32.gmra.mrb[40].mxu0 %vm631_vm0, %v16806_v24 }
 0x3bc   : > { %13988 = vmatmul.mubr.msk.f32.gmra.mrb[6].mxu1 %vm631_vm0, %v17309_v8  ;;  %13369 = vmatprep.mubr.msk.f32.mxu0 %vm631_vm0, %v16813_v27 }
 0x3bd   : > { %13990 = vmatprep.mubr.msk.f32.mxu1 %vm631_vm0, %v17311_v33 }
 0x3bf   : > { %13370 = vmatmul.mubr.msk.f32.gmra.mrb[42].mxu0 %vm631_vm0, %v16819_v29 }
 0x3c0   : > { %13991 = vmatmul.mubr.msk.f32.gmra.mrb[8].mxu1 %vm631_vm0, %v17321_v26  ;;  %13372 = vmatprep.mubr.msk.f32.mxu0 %vm631_vm0, %v16825_v34 }
 0x3c1   : > { %13993 = vmatprep.mubr.msk.f32.mxu1 %vm631_vm0, %v17327_v49 }
 0x3c3   : > { %13373 = vmatmul.mubr.msk.f32.gmra.mrb[44].mxu0 %vm631_vm0, %v16831_v38 }
 0x3c4   : > { %13994 = vmatmul.mubr.msk.f32.gmra.mrb[10].mxu1 %vm631_vm0, %v17333_v57  ;;  %13375 = vmatprep.mubr.msk.f32.mxu0 %vm631_vm0, %v16837_v41 }
 0x3c5   : > { %13996 = vmatprep.mubr.msk.f32.mxu1 %vm631_vm0, %v17239_v25 }
 0x3c7   : > { %13376 = vmatmul.mubr.msk.f32.gmra.mrb[46].mxu0 %vm631_vm0, %v16843_v44 }
 0x3c8   : > { %13997 = vmatmul.mubr.msk.f32.gmra.mrb[12].mxu1 %vm631_vm0, %v17247_v39  ;;  %13378 = vmatprep.mubr.msk.f32.mxu0 %vm631_vm0, %v16849_v50 }
 0x3c9   : > { %13999 = vmatprep.mubr.msk.f32.mxu1 %vm631_vm0, %v17258_v36 }
 0x3cb   : > { %13379 = vmatmul.mubr.msk.f32.gmra.mrb[48].mxu0 %vm631_vm0, %v16855_v4 }
 0x3cc   : > { %14000 = vmatmul.mubr.msk.f32.gmra.mrb[14].mxu1 %vm631_vm0, %v17267_v52  ;;  %13381 = vmatprep.mubr.msk.f32.mxu0 %vm631_vm0, %v16861_v18 }
 0x3cd   : > { %14002 = vmatprep.mubr.msk.f32.mxu1 %vm631_vm0, %v16760_v1  ;;  %v3567_v1 = vld [vmem:[#allocation2 + $0x288] sm:$0xff] }
 0x3cf   : > { %13382 = vmatmul.mubr.msk.f32.gmra.mrb[50].mxu0 %vm631_vm0, %v16867_v31 }
 0x3d0   : > { %14003 = vmatmul.mubr.msk.f32.gmra.mrb[16].mxu1 %vm631_vm0, %v16770_v6  ;;  %13384 = vmatprep.mubr.msk.f32.mxu0 %vm631_vm0, %v16873_v21  ;;  %v3568_v6 = vld [vmem:[#allocation2 + $0x290] sm:$0xff]  ;;  %v17439_v21 = vld [vmem:[%s18410_s3 + $0x160] sm:$0xff]  }
 0x3d1   : > { %14005 = vmatprep.mubr.msk.f32.mxu1 %vm631_vm0, %v16779_v12  ;;  %v3909_v12 = vld [vmem:[#allocation2 + $0xc9] sm:$0xff] }
 0x3d3   : > { %13385 = vmatmul.mubr.msk.f32.gmra.mrb[52].mxu0 %vm631_vm0, %v16879_v42  ;;  %v3915_v42 = vld [vmem:[#allocation2 + $0x129] sm:$0xff] }
 0x3d4   : > { %14006 = vmatmul.mubr.msk.f32.gmra.mrb[18].mxu1 %vm631_vm0, %v16788_v15  ;;  %13387 = vmatprep.mubr.msk.f32.mxu0 %vm631_vm0, %v16885_v55  ;;  %v8223_v15 = vld [vmem:[#allocation2 + $0xd] sm:$0xff]  ;;  %v8228_v55 = vld [vmem:[#allocation2 + $0x55] sm:$0xff] }
 0x3d5   : > { %14008 = vmatprep.mubr.msk.f32.mxu1 %vm631_vm0, %v16799_v20  ;;  %v3910_v20 = vld [vmem:[#allocation2 + $0xd1] sm:$0xff] }
 0x3d7   : > { %13388 = vmatmul.mubr.msk.f32.gmra.mrb[54].mxu0 %vm631_vm0, %v16891_v35  ;;  %v17446_v35 = vld [vmem:[#allocation2 + $0x6d] sm:$0xff] }
 0x3d8   : > { %14009 = vmatmul.mubr.msk.f32.gmra.mrb[20].mxu1 %vm631_vm0, %v16806_v24  ;;  %13390 = vmatprep.mubr.msk.f32.mxu0 %vm631_vm0, %v16897_v47  ;;  %v15330_v24 = vld [vmem:[%s18410_s3 + $0x98] sm:$0xff]  }
 0x3d9   : > { %14011 = vmatprep.mubr.msk.f32.mxu1 %vm631_vm0, %v16813_v27  ;;  %v3911_v27 = vld [vmem:[#allocation2 + $0xe9] sm:$0xff]  ;;  %v3916_v47 = vld [vmem:[#allocation2 + $0x131] sm:$0xff] }
 0x3db   : > { %13391 = vmatmul.mubr.msk.f32.gmra.mrb[56].mxu0 %vm631_vm0, %v16903_v56  ;;  %v3917_v56 = vld [vmem:[#allocation2 + $0x149] sm:$0xff] }
 0x3dc   : > { %14012 = vmatmul.mubr.msk.f32.gmra.mrb[22].mxu1 %vm631_vm0, %v16819_v29  ;;  %13393 = vmatprep.mubr.msk.f32.mxu0 %vm631_vm0, %v16909_v45  ;;  %v8224_v29 = vld [vmem:[#allocation2 + $0x15] sm:$0xff] }
 0x3dd   : > { %14014 = vmatprep.mubr.msk.f32.mxu1 %vm631_vm0, %v16825_v34  ;;  %v15328_v34 = vld [vmem:[%s18410_s3 + $0x158] sm:$0xff]  }
 0x3de   : > { %v8230_v45 = vld [vmem:[#allocation2 + $0x75] sm:$0xff] }
 0x3df   : > { %13394 = vmatmul.mubr.msk.f32.gmra.mrb[58].mxu0 %vm631_vm0, %v16915_v51  ;;  %v17455_v51 = vld [vmem:[#allocation2 + $0x8d] sm:$0xff] }
 0x3e0   : > { %14015 = vmatmul.mubr.msk.f32.gmra.mrb[24].mxu1 %vm631_vm0, %v16831_v38  ;;  %13396 = vmatprep.mubr.msk.f32.mxu0 %vm631_vm0, %v3567_v1  ;;  %v3912_v38 = vld [vmem:[#allocation2 + $0xf1] sm:$0xff]  ;;  %v3921_v1 = vld [vmem:[#allocation2 + $0x189] sm:$0xff] }
 0x3e1   : > { %14017 = vmatprep.mubr.msk.f32.mxu1 %vm631_vm0, %v16837_v41  ;;  %v8225_v41 = vld [vmem:[#allocation2 + $0x2d] sm:$0xff] }
 0x3e3   : > { %13397 = vmatmul.mubr.msk.f32.gmra.mrb[60].mxu0 %vm631_vm0, %v3568_v6  ;;  %v17464_v6 = vld [vmem:[#allocation2 + $0xad] sm:$0xff] }
 0x3e4   : > { %14018 = vmatmul.mubr.msk.f32.gmra.mrb[26].mxu1 %vm631_vm0, %v16843_v44  ;;  %13399 = vmatprep.mubr.msk.f32.mxu0 %vm631_vm0, %v16925_v62  ;;  %v3913_v44 = vld [vmem:[#allocation2 + $0x109] sm:$0xff]  ;;  %v3918_v62 = vld [vmem:[#allocation2 + $0x151] sm:$0xff] }
 0x3e5   : > { %14020 = vmatprep.mubr.msk.f32.mxu1 %vm631_vm0, %v16849_v50  ;;  %v8226_v50 = vld [vmem:[#allocation2 + $0x35] sm:$0xff] }
 0x3e7   : > { %13400 = vmatmul.mubr.msk.f32.gmra.mrb[62].mxu0 %vm631_vm0, %v16935_v5  ;;  %v3919_v5 = vld [vmem:[#allocation2 + $0x169] sm:$0xff] }
 0x3e8   : > { %14021 = vmatmul.mubr.msk.f32.gmra.mrb[28].mxu1 %vm631_vm0, %v16855_v4  ;;  %13406 = vmatprep.mubr.msk.f32.mxu0 %vm631_vm0, %v3909_v12  ;;  %v17429_v4 = vld [vmem:[#allocation2 + $0x4d] sm:$0xff] }
 0x3e9   : > { %14023 = vmatprep.mubr.msk.f32.mxu1 %vm631_vm0, %v16861_v18  ;;  %v17434_v18 = vld [vmem:[%s18410_s3 + $0xa0] sm:$0xff]   ;;  %v3922_v12 = vld [vmem:[#allocation2 + $0x191] sm:$0xff] }
 0x3eb   : > { %13407 = vmatmul.mubr.msk.f32.vlgmr.msra.gmra.mrb[32].mxu0 %vm631_vm0, %v3910_v20  ;;  %v3923_v20 = vld [vmem:[#allocation2 + $0x1a9] sm:$0xff] }
 0x3ec   : > { %14024 = vmatmul.mubr.msk.f32.gmra.mrb[30].mxu1 %vm631_vm0, %v16867_v31  ;;  %13409 = vmatprep.mubr.msk.f32.mxu0 %vm631_vm0, %v3911_v27  ;;  %v3914_v31 = vld [vmem:[#allocation2 + $0x111] sm:$0xff] }
 0x3ed   : > { %14030 = vmatprep.mubr.msk.f32.mxu1 %vm631_vm0, %v8223_v15  ;;  %13455 = vmatpush3.bf16.msra.mxu0 %v17281_v22  ;;  %v8232_v22 = vld [vmem:[#allocation2 + $0x95] sm:$0xff] }
 0x3ee   : > { %13456 = vmatprep.subr.bf16.mxu0 %v15330_v24  ;;  %v17469_v15 = vld [vmem:[#allocation2 + $0xb5] sm:$0xff] }
 0x3ef   : > { %13410 = vmatmul.mubr.msk.f32.gmra.mrb[34].mxu0 %vm631_vm0, %v3912_v38  ;;  %v3924_v27 = vld [vmem:[#allocation2 + $0x1b1] sm:$0xff] }
 0x3f0   : > { %14031 = vmatmul.mubr.msk.f32.vlgmr.msra.gmra.mrb[0].mxu1 %vm631_vm0, %v8224_v29  ;;  %13412 = vmatprep.mubr.msk.f32.mxu0 %vm631_vm0, %v3913_v44  ;;  %v17479_v29 = vld [vmem:[#allocation2 + $0xd5] sm:$0xff]  ;;  %v17484_v38 = vld [vmem:[#allocation2 + $0xed] sm:$0xff] }
 0x3f1   : > { %14079 = vmatpush3.bf16.msra.mxu1 %v17286_v53  ;;  %14033 = vmatprep.mubr.msk.f32.mxu1 %vm631_vm0, %v8225_v41  ;;  %v3920_v53 = vld [vmem:[#allocation2 + $0x171] sm:$0xff] }
 0x3f2   : > { %14080 = vmatprep.subr.bf16.mxu1 %v15328_v34  ;;  %13457 = vmatpush3.bf16.msra.mxu0 %v15330_v24  ;;  %v17474_v24 = vld [vmem:[#allocation2 + $0xcd] sm:$0xff]  ;;  %v17489_v44 = vld [vmem:[#allocation2 + $0xf5] sm:$0xff] }
 0x3f3   : > { %13413 = vmatmul.mubr.msk.f32.gmra.mrb[36].mxu0 %vm631_vm0, %v3914_v31  ;;  %13506 = vmatprep.subr.bf16.mxu0 %v17434_v18  ;;  %v3926_v41 = vld [vmem:[#allocation2 + $0x1d1] sm:$0xff] }
 0x3f4   : > { %14034 = vmatmul.mubr.msk.f32.gmra.mrb[2].mxu1 %vm631_vm0, %v8226_v50  ;;  %13415 = vmatprep.mubr.msk.f32.mxu0 %vm631_vm0, %v3915_v42  ;;  %v3927_v50 = vld [vmem:[#allocation2 + $0x1e9] sm:$0xff]  ;;  %v3928_v42 = vld [vmem:[#allocation2 + $0x1f1] sm:$0xff] }
 0x3f5   : > { %14036 = vmatprep.mubr.msk.f32.mxu1 %vm631_vm0, %v17429_v4  ;;  %14081 = vmatpush3.bf16.msra.mxu1 %v15328_v34  ;;  %v3925_v34 = vld [vmem:[#allocation2 + $0x1c9] sm:$0xff] }
 0x3f6   : > { %14130 = vmatprep.subr.bf16.mxu1 %v17439_v21  ;;  %v17494_v31 = vld [vmem:[#allocation2 + $0x10d] sm:$0xff] }
 0x3f7   : > { %13416 = vmatmul.mubr.msk.f32.gmra.mrb[38].mxu0 %vm631_vm0, %v3916_v47  ;;  %v3929_v47 = vld [vmem:[#allocation2 + $0x209] sm:$0xff] }
 0x3f8   : > { %14037 = vmatmul.mubr.msk.f32.gmra.mrb[4].mxu1 %vm631_vm0, %v8228_v55  ;;  %13418 = vmatprep.mubr.msk.f32.mxu0 %vm631_vm0, %v3917_v56  ;;  %v17499_v55 = vld [vmem:[#allocation2 + $0x115] sm:$0xff]  ;;  %v17504_v56 = vld [vmem:[#allocation2 + $0x12d] sm:$0xff] }
 0x3f9   : > { %14039 = vmatprep.mubr.msk.f32.mxu1 %vm631_vm0, %v17446_v35 }
 0x3fb   : > { %13419 = vmatmul.mubr.msk.f32.gmra.mrb[40].mxu0 %vm631_vm0, %v3918_v62  ;;  %v17509_v62 = vld [vmem:[#allocation2 + $0x135] sm:$0xff] }
 0x3fc   : > { %14040 = vmatmul.mubr.msk.f32.gmra.mrb[6].mxu1 %vm631_vm0, %v8230_v45  ;;  %13421 = vmatprep.mubr.msk.f32.mxu0 %vm631_vm0, %v3919_v5  ;;  %v3930_v45 = vld [vmem:[#allocation2 + $0x211] sm:$0xff]  ;;  %v3931_v5 = vld [vmem:[#allocation2 + $0x229] sm:$0xff] }
 0x3fd   : > { %14042 = vmatprep.mubr.msk.f32.mxu1 %vm631_vm0, %v17455_v51 }
 0x3ff   : > { %13422 = vmatmul.mubr.msk.f32.gmra.mrb[42].mxu0 %vm631_vm0, %v3920_v53  ;;  %v3932_v53 = vld [vmem:[#allocation2 + $0x231] sm:$0xff] }
 0x400   : > { %14043 = vmatmul.mubr.msk.f32.gmra.mrb[8].mxu1 %vm631_vm0, %v8232_v22  ;;  %13424 = vmatprep.mubr.msk.f32.mxu0 %vm631_vm0, %v3921_v1  ;;  %v17514_v22 = vld [vmem:[#allocation2 + $0x14d] sm:$0xff]  ;;  %v17519_v1 = vld [vmem:[#allocation2 + $0x155] sm:$0xff] }
 0x401   : > { %14045 = vmatprep.mubr.msk.f32.mxu1 %vm631_vm0, %v17464_v6 }
 0x403   : > { %13425 = vmatmul.mubr.msk.f32.gmra.mrb[44].mxu0 %vm631_vm0, %v3922_v12  ;;  %v3933_v12 = vld [vmem:[#allocation2 + $0x249] sm:$0xff] }
 0x404   : > { %14046 = vmatmul.mubr.msk.f32.gmra.mrb[10].mxu1 %vm631_vm0, %v17469_v15  ;;  %13427 = vmatprep.mubr.msk.f32.mxu0 %vm631_vm0, %v3923_v20  ;;  %v17524_v20 = vld [vmem:[#allocation2 + $0x16d] sm:$0xff] }
 0x405   : > { %14048 = vmatprep.mubr.msk.f32.mxu1 %vm631_vm0, %v17474_v24 }
 0x407   : > { %13428 = vmatmul.mubr.msk.f32.gmra.mrb[46].mxu0 %vm631_vm0, %v3924_v27  ;;  %v3934_v27 = vld [vmem:[#allocation2 + $0x251] sm:$0xff] }
 0x408   : > { %14049 = vmatmul.mubr.msk.f32.gmra.mrb[12].mxu1 %vm631_vm0, %v17479_v29  ;;  %13430 = vmatprep.mubr.msk.f32.mxu0 %vm631_vm0, %v3925_v34  ;;  %v17529_v34 = vld [vmem:[#allocation2 + $0x175] sm:$0xff] }
 0x409   : > { %14051 = vmatprep.mubr.msk.f32.mxu1 %vm631_vm0, %v17484_v38 }
 0x40b   : > { %13431 = vmatmul.mubr.msk.f32.gmra.mrb[48].mxu0 %vm631_vm0, %v3926_v41  ;;  %v3935_v41 = vld [vmem:[#allocation2 + $0x269] sm:$0xff] }
 0x40c   : > { %14052 = vmatmul.mubr.msk.f32.gmra.mrb[14].mxu1 %vm631_vm0, %v17489_v44  ;;  %13433 = vmatprep.mubr.msk.f32.mxu0 %vm631_vm0, %v3927_v50  ;;  %v17534_v50 = vld [vmem:[#allocation2 + $0x18d] sm:$0xff] }
 0x40d   : > { %14054 = vmatprep.mubr.msk.f32.mxu1 %vm631_vm0, %v17494_v31 }
 0x40f   : > { %13434 = vmatmul.mubr.msk.f32.gmra.mrb[50].mxu0 %vm631_vm0, %v3928_v42  ;;  %v3936_v42 = vld [vmem:[#allocation2 + $0x271] sm:$0xff] }
 0x410   : > { %14055 = vmatmul.mubr.msk.f32.gmra.mrb[16].mxu1 %vm631_vm0, %v17499_v55  ;;  %13436 = vmatprep.mubr.msk.f32.mxu0 %vm631_vm0, %v3929_v47  ;;  %v17539_v47 = vld [vmem:[#allocation2 + $0x195] sm:$0xff] }
 0x411   : > { %14057 = vmatprep.mubr.msk.f32.mxu1 %vm631_vm0, %v17504_v56 }
 0x413   : > { %13437 = vmatmul.mubr.msk.f32.gmra.mrb[52].mxu0 %vm631_vm0, %v3930_v45  ;;  %v17544_v45 = vld [vmem:[#allocation2 + $0x1ad] sm:$0xff] }
 0x414   : > { %14058 = vmatmul.mubr.msk.f32.gmra.mrb[18].mxu1 %vm631_vm0, %v17509_v62  ;;  %13439 = vmatprep.mubr.msk.f32.mxu0 %vm631_vm0, %v3931_v5  ;;  %v3939_v5 = vld [vmem:[#allocation2 + $0x2a9] sm:$0xff] }
 0x415   : > { %14060 = vmatprep.mubr.msk.f32.mxu1 %vm631_vm0, %v17514_v22 }
 0x417   : > { %13440 = vmatmul.mubr.msk.f32.gmra.mrb[54].mxu0 %vm631_vm0, %v3932_v53  ;;  %v17550_v53 = vld [vmem:[#allocation2 + $0x1b5] sm:$0xff] }
 0x418   : > { %14061 = vmatmul.mubr.msk.f32.gmra.mrb[20].mxu1 %vm631_vm0, %v17519_v1  ;;  %13442 = vmatprep.mubr.msk.f32.mxu0 %vm631_vm0, %v3933_v12  ;;  %18664 = vst [vmem:[#allocation35_spill] sm:$0xff] %v17550_v53  ;;  %v17556_v12 = vld [vmem:[#allocation2 + $0x1cd] sm:$0xff] }
 0x419   : > { %14063 = vmatprep.mubr.msk.f32.mxu1 %vm631_vm0, %v17524_v20 }
 0x41b   : > { %13443 = vmatmul.mubr.msk.f32.gmra.mrb[56].mxu0 %vm631_vm0, %v3934_v27  ;;  %v4280_v27 = vld [vmem:[#allocation2 + $0x45] sm:$0xff] }
 0x41c   : > { %14064 = vmatmul.mubr.msk.f32.gmra.mrb[22].mxu1 %vm631_vm0, %v17529_v34  ;;  %13445 = vmatprep.mubr.msk.f32.mxu0 %vm631_vm0, %v3935_v41  ;;  %v17561_v41 = vld [vmem:[#allocation2 + $0x1d5] sm:$0xff] }
 0x41d   : > { %14066 = vmatprep.mubr.msk.f32.mxu1 %vm631_vm0, %v17534_v50 }
 0x41f   : > { %13446 = vmatmul.mubr.msk.f32.gmra.mrb[58].mxu0 %vm631_vm0, %v3936_v42  ;;  %v4282_v42 = vld [vmem:[#allocation2 + $0x65] sm:$0xff] }
 0x420   : > { %14067 = vmatmul.mubr.msk.f32.gmra.mrb[24].mxu1 %vm631_vm0, %v17539_v47  ;;  %13448 = vmatprep.mubr.msk.f32.mxu0 %vm631_vm0, %v17083_v3  ;;  %v3940_v3 = vld [vmem:[#allocation2 + $0x2b1] sm:$0xff] }
 0x421   : > { %14069 = vmatprep.mubr.msk.f32.mxu1 %vm631_vm0, %v17544_v45 }
 0x423   : > { %13449 = vmatmul.mubr.msk.f32.gmra.mrb[60].mxu0 %vm631_vm0, %v17088_v10  ;;  %v17566_v10 = vld [vmem:[#allocation2 + $0x1ed] sm:$0xff] }
 0x424   : > { %14070 = vmatmul.mubr.msk.f32.gmra.mrb[26].mxu1 %vm631_vm0, %v17550_v53  ;;  %13451 = vmatprep.mubr.msk.f32.mxu0 %vm631_vm0, %v3939_v5  ;;  %v17571_v53 = vld [vmem:[#allocation2 + $0x1f5] sm:$0xff]  ;;  %v15334_v5 = vld [vmem:[%s18410_s3 + $0xa8] sm:$0xff]  }
 0x425   : > { %14072 = vmatprep.mubr.msk.f32.mxu1 %vm631_vm0, %v17556_v12 }
 0x427   : > { %13452 = vmatmul.mubr.msk.f32.gmra.mrb[62].mxu0 %vm631_vm0, %v3940_v3  ;;  %v15332_v3 = vld [vmem:[%s18410_s3 + $0x168] sm:$0xff]  }
 0x428   : > { %14073 = vmatmul.mubr.msk.f32.gmra.mrb[28].mxu1 %vm631_vm0, %v17561_v41  ;;  %13458 = vmatprep.mubr.msk.f32.mxu0 %vm631_vm0, %v4280_v27  ;;  %v4284_v27 = vld [vmem:[#allocation2 + $0x85] sm:$0xff] }
 0x429   : > { %14075 = vmatprep.mubr.msk.f32.mxu1 %vm631_vm0, %v17566_v10 }
 0x42b   : > { %13459 = vmatmul.mubr.msk.f32.vlgmr.msra.gmra.mrb[32].mxu0 %vm631_vm0, %v17429_v4  ;;  %v17603_v4 = vld [vmem:[%s18410_s3 + $0x170] sm:$0xff]  }
 0x42c   : > { %14076 = vmatmul.mubr.msk.f32.gmra.mrb[30].mxu1 %vm631_vm0, %v17571_v53  ;;  %13461 = vmatprep.mubr.msk.f32.mxu0 %vm631_vm0, %v4282_v42  ;;  %v15338_v42 = vld [vmem:[%s18410_s3 + $0xb8] sm:$0xff]  }
 0x42d   : > { %14082 = vmatprep.mubr.msk.f32.mxu1 %vm631_vm0, %v17137_v7  ;;  %13507 = vmatpush3.bf16.msra.mxu0 %v17434_v18  ;;  %v17598_v7 = vld [vmem:[%s18410_s3 + $0xb0] sm:$0xff]  }
 0x42e   : > { %13508 = vmatprep.subr.bf16.mxu0 %v15334_v5  ;;  %v17714_v18 = vld [vmem:[#allocation2 + $0x22d] sm:$0xff] }
 0x42f   : > { %13462 = vmatmul.mubr.msk.f32.gmra.mrb[34].mxu0 %vm631_vm0, %v17446_v35  ;;  %v17722_v35 = vld [vmem:[#allocation2 + $0x283] sm:$0xff] }
 0x430   : > { %14083 = vmatmul.mubr.msk.f32.vlgmr.msra.gmra.mrb[0].mxu1 %vm631_vm0, %v17142_v2  ;;  %13464 = vmatprep.mubr.msk.f32.mxu0 %vm631_vm0, %v4284_v27  ;;  %v4286_v2 = vld [vmem:[#allocation2 + $0xa5] sm:$0xff]  ;;  %v15349_v27 = vld [vmem:[#allocation2 + $0xd0] sm:$0xff] }
 0x431   : > { %14131 = vmatpush3.bf16.msra.mxu1 %v17439_v21  ;;  %14085 = vmatprep.mubr.msk.f32.mxu1 %vm631_vm0, %v17147_v59  ;;  %v4288_v59 = vld [vmem:[#allocation2 + $0xc5] sm:$0xff] }
 0x432   : > { %14132 = vmatprep.subr.bf16.mxu1 %v15332_v3  ;;  %13509 = vmatpush3.bf16.msra.mxu0 %v15334_v5  ;;  %v17716_v21 = vld [vmem:[#allocation2 + $0x26b] sm:$0xff] }
 0x433   : > { %13465 = vmatmul.mubr.msk.f32.gmra.mrb[36].mxu0 %vm631_vm0, %v17455_v51  ;;  %13558 = vmatprep.subr.bf16.mxu0 %v17598_v7  ;;  %v17728_v51 = vld [vmem:[#allocation2 + $0x28b] sm:$0xff] }
 0x434   : > { %14086 = vmatmul.mubr.msk.f32.gmra.mrb[2].mxu1 %vm631_vm0, %v17152_v19  ;;  %13467 = vmatprep.mubr.msk.f32.mxu0 %vm631_vm0, %v4286_v2  ;;  %v4290_v19 = vld [vmem:[#allocation2 + $0xe5] sm:$0xff] }
 0x435   : > { %14088 = vmatprep.mubr.msk.f32.mxu1 %vm631_vm0, %v17157_v23  ;;  %14133 = vmatpush3.bf16.msra.mxu1 %v15332_v3  ;;  %v4292_v23 = vld [vmem:[#allocation2 + $0x105] sm:$0xff] }
 0x436   : > { %14182 = vmatprep.subr.bf16.mxu1 %v17603_v4  ;;  %v15346_v5 = vld [vmem:[#allocation2 + $0xa8] sm:$0xff] }
 0x437   : > { %13468 = vmatmul.mubr.msk.f32.gmra.mrb[38].mxu0 %vm631_vm0, %v17464_v6  ;;  %v15348_v3 = vld [vmem:[#allocation2 + $0xc8] sm:$0xff] }
 0x438   : > { %14089 = vmatmul.mubr.msk.f32.gmra.mrb[4].mxu1 %vm631_vm0, %v17162_v28  ;;  %13470 = vmatprep.mubr.msk.f32.mxu0 %vm631_vm0, %v4288_v59  ;;  %v4294_v28 = vld [vmem:[#allocation2 + $0x125] sm:$0xff]  ;;  %v15357_v59 = vld [vmem:[#allocation2 + $0x150] sm:$0xff] }
 0x439   : > { %14091 = vmatprep.mubr.msk.f32.mxu1 %vm631_vm0, %v17167_v37  ;;  %v4296_v37 = vld [vmem:[#allocation2 + $0x145] sm:$0xff] }
 0x43a   : > { %v15356_v2 = vld [vmem:[#allocation2 + $0x148] sm:$0xff] }
 0x43b   : > { %13471 = vmatmul.mubr.msk.f32.gmra.mrb[40].mxu0 %vm631_vm0, %v17474_v24 }
 0x43c   : > { %14092 = vmatmul.mubr.msk.f32.gmra.mrb[6].mxu1 %vm631_vm0, %v17172_v43  ;;  %13473 = vmatprep.mubr.msk.f32.mxu0 %vm631_vm0, %v4290_v19  ;;  %v4298_v43 = vld [vmem:[#allocation2 + $0x165] sm:$0xff] }
 0x43d   : > { %14094 = vmatprep.mubr.msk.f32.mxu1 %vm631_vm0, %v17177_v60  ;;  %v4300_v60 = vld [vmem:[#allocation2 + $0x185] sm:$0xff] }
 0x43e   : > { %v15358_v19 = vld [vmem:[#allocation2 + $0x168] sm:$0xff] }
 0x43f   : > { %13474 = vmatmul.mubr.msk.f32.gmra.mrb[42].mxu0 %vm631_vm0, %v17484_v38 }
 0x440   : > { %14095 = vmatmul.mubr.msk.f32.gmra.mrb[8].mxu1 %vm631_vm0, %v17182_v30  ;;  %13476 = vmatprep.mubr.msk.f32.mxu0 %vm631_vm0, %v4292_v23  ;;  %v4302_v30 = vld [vmem:[#allocation2 + $0x1a5] sm:$0xff]  ;;  %v15359_v23 = vld [vmem:[#allocation2 + $0x170] sm:$0xff] }
 0x441   : > { %14097 = vmatprep.mubr.msk.f32.mxu1 %vm631_vm0, %v17187_v13  ;;  %v4304_v13 = vld [vmem:[#allocation2 + $0x1c5] sm:$0xff] }
 0x443   : > { %13477 = vmatmul.mubr.msk.f32.gmra.mrb[44].mxu0 %vm631_vm0, %v17494_v31 }
 0x444   : > { %14098 = vmatmul.mubr.msk.f32.gmra.mrb[10].mxu1 %vm631_vm0, %v17192_v46  ;;  %13479 = vmatprep.mubr.msk.f32.mxu0 %vm631_vm0, %v4294_v28  ;;  %v17674_v46 = vld [vmem:[#allocation2 + $0x203] sm:$0xff] }
 0x445   : > { %14100 = vmatprep.mubr.msk.f32.mxu1 %vm631_vm0, %v17197_v11  ;;  %v17679_v11 = vld [vmem:[#allocation2 + $0x20b] sm:$0xff] }
 0x446   : > { %v17792_v28 = vld [vmem:[#allocation2 + $0x148] sm:$0xff] }
 0x447   : > { %13480 = vmatmul.mubr.msk.f32.gmra.mrb[46].mxu0 %vm631_vm0, %v17504_v56 }
 0x448   : > { %14101 = vmatmul.mubr.msk.f32.gmra.mrb[12].mxu1 %vm631_vm0, %v17202_v40  ;;  %13482 = vmatprep.mubr.msk.f32.mxu0 %vm631_vm0, %v4296_v37  ;;  %v4306_v40 = vld [vmem:[#allocation2 + $0x1e5] sm:$0xff] }
 0x449   : > { %14103 = vmatprep.mubr.msk.f32.mxu1 %vm631_vm0, %v17207_v54  ;;  %v17685_v54 = vld [vmem:[#allocation2 + $0x223] sm:$0xff] }
 0x44a   : > { %v15360_v37 = vld [vmem:[#allocation2 + $0x188] sm:$0xff] }
 0x44b   : > { %13483 = vmatmul.mubr.msk.f32.gmra.mrb[48].mxu0 %vm631_vm0, %v17514_v22 }
 0x44c   : > { %14104 = vmatmul.mubr.msk.f32.gmra.mrb[14].mxu1 %vm631_vm0, %v17212_v61  ;;  %13485 = vmatprep.mubr.msk.f32.mxu0 %vm631_vm0, %v4298_v43  ;;  %v17690_v61 = vld [vmem:[#allocation2 + $0x22b] sm:$0xff] }
 0x44d   : > { %14106 = vmatprep.mubr.msk.f32.mxu1 %vm631_vm0, %v17217_v63  ;;  %v4308_v63 = vld [vmem:[#allocation2 + $0x205] sm:$0xff]  ;;  %v17797_v43 = vld [vmem:[#allocation2 + $0x150] sm:$0xff] }
 0x44f   : > { %13486 = vmatmul.mubr.msk.f32.gmra.mrb[50].mxu0 %vm631_vm0, %v17524_v20 }
 0x450   : > { %14107 = vmatmul.mubr.msk.f32.gmra.mrb[16].mxu1 %vm631_vm0, %v17223_v17  ;;  %13488 = vmatprep.mubr.msk.f32.mxu0 %vm631_vm0, %v4300_v60  ;;  %v17696_v17 = vld [vmem:[#allocation2 + $0x243] sm:$0xff]  ;;  %v15361_v60 = vld [vmem:[#allocation2 + $0x190] sm:$0xff] }
 0x451   : > { %14109 = vmatprep.mubr.msk.f32.mxu1 %vm631_vm0, %v17229_v9  ;;  %v17701_v9 = vld [vmem:[#allocation2 + $0x20d] sm:$0xff] }
 0x453   : > { %13489 = vmatmul.mubr.msk.f32.gmra.mrb[52].mxu0 %vm631_vm0, %v17534_v50 }
 0x454   : > { %14110 = vmatmul.mubr.msk.f32.gmra.mrb[18].mxu1 %vm631_vm0, %v17234_v14  ;;  %13491 = vmatprep.mubr.msk.f32.mxu0 %vm631_vm0, %v4302_v30  ;;  %v17703_v14 = vld [vmem:[#allocation2 + $0x24b] sm:$0xff] }
 0x455   : > { %14112 = vmatprep.mubr.msk.f32.mxu1 %vm631_vm0, %v17241_v58  ;;  %v4310_v58 = vld [vmem:[#allocation2 + $0x225] sm:$0xff] }
 0x456   : > { %v17802_v30 = vld [vmem:[#allocation2 + $0x168] sm:$0xff] }
 0x457   : > { %13492 = vmatmul.mubr.msk.f32.gmra.mrb[54].mxu0 %vm631_vm0, %v17544_v45 }
 0x458   : > { %14113 = vmatmul.mubr.msk.f32.gmra.mrb[20].mxu1 %vm631_vm0, %v17249_v48  ;;  %13494 = vmatprep.mubr.msk.f32.mxu0 %vm631_vm0, %v4304_v13  ;;  %v17709_v48 = vld [vmem:[#allocation2 + $0x263] sm:$0xff] }
 0x459   : > { %14115 = vmatprep.mubr.msk.f32.mxu1 %vm631_vm0, %v17674_v46  ;;  %v15362_v13 = vld [vmem:[#allocation2 + $0x1a8] sm:$0xff] }
 0x45b   : > { %13495 = vmatmul.mubr.msk.f32.gmra.mrb[56].mxu0 %vm631_vm0, %v17556_v12 }
 0x45c   : > { %14116 = vmatmul.mubr.msk.f32.gmra.mrb[22].mxu1 %vm631_vm0, %v17679_v11  ;;  %13497 = vmatprep.mubr.msk.f32.mxu0 %vm631_vm0, %v4306_v40  ;;  %v17807_v40 = vld [vmem:[#allocation2 + $0x170] sm:$0xff] }
 0x45d   : > { %14118 = vmatprep.mubr.msk.f32.mxu1 %vm631_vm0, %v17685_v54 }
 0x45f   : > { %13498 = vmatmul.mubr.msk.f32.gmra.mrb[58].mxu0 %vm631_vm0, %v17566_v10 }
 0x460   : > { %14119 = vmatmul.mubr.msk.f32.gmra.mrb[24].mxu1 %vm631_vm0, %v17690_v61  ;;  %13500 = vmatprep.mubr.msk.f32.mxu0 %vm631_vm0, %v4308_v63  ;;  %v15363_v63 = vld [vmem:[#allocation2 + $0x1b0] sm:$0xff] }
 0x461   : > { %14121 = vmatprep.mubr.msk.f32.mxu1 %vm631_vm0, %v17696_v17 }
 0x463   : > { %13501 = vmatmul.mubr.msk.f32.gmra.mrb[60].mxu0 %vm631_vm0, %v17701_v9 }
 0x464   : > { %14122 = vmatmul.mubr.msk.f32.gmra.mrb[26].mxu1 %vm631_vm0, %v17703_v14  ;;  %13503 = vmatprep.mubr.msk.f32.mxu0 %vm631_vm0, %v4310_v58  ;;  %v17812_v58 = vld [vmem:[#allocation2 + $0x188] sm:$0xff] }
 0x465   : > { %14124 = vmatprep.mubr.msk.f32.mxu1 %vm631_vm0, %v17709_v48 }
 0x467   : > { %13504 = vmatmul.mubr.msk.f32.gmra.mrb[62].mxu0 %vm631_vm0, %v17714_v18 }
 0x468   : > { %14125 = vmatmul.mubr.msk.f32.gmra.mrb[28].mxu1 %vm631_vm0, %v17716_v21  ;;  %13510 = vmatprep.mubr.msk.f32.mxu0 %vm631_vm0, %v17276_v0  ;;  %v15336_v0 = vld [vmem:[%s18410_s3 + $0x178] sm:$0xff]  }
 0x469   : > { %14127 = vmatprep.mubr.msk.f32.mxu1 %vm631_vm0, %v17722_v35 }
 0x46b   : > { %13511 = vmatmul.mubr.msk.f32.vlgmr.msra.gmra.mrb[32].mxu0 %vm631_vm0, %v17295_v16  ;;  %v15347_v16 = vld [vmem:[#allocation2 + $0xb0] sm:$0xff] }
 0x46c   : > { %14128 = vmatmul.mubr.msk.f32.gmra.mrb[30].mxu1 %vm631_vm0, %v17728_v51  ;;  %13513 = vmatprep.mubr.msk.f32.mxu0 %vm631_vm0, %v17297_v32  ;;  %v17754_v32 = vld [vmem:[%s18410_s3 + $0x1a0] sm:$0xff]  }
 0x46d   : > { %14134 = vmatprep.mubr.msk.f32.mxu1 %vm631_vm0, %v15346_v5  ;;  %13559 = vmatpush3.bf16.msra.mxu0 %v17598_v7  ;;  %v15351_v7 = vld [vmem:[#allocation2 + $0xf0] sm:$0xff] }
 0x46e   : > { %13560 = vmatprep.subr.bf16.mxu0 %v15338_v42  ;;  %v17817_v5 = vld [vmem:[#allocation2 + $0x190] sm:$0xff] }
 0x46f   : > { %13514 = vmatmul.mubr.msk.f32.gmra.mrb[34].mxu0 %vm631_vm0, %v17309_v8  ;;  %v17759_v8 = vld [vmem:[%s18410_s3 + $0x180] sm:$0xff]  }
 0x470   : > { %14135 = vmatmul.mubr.msk.f32.vlgmr.msra.gmra.mrb[0].mxu1 %vm631_vm0, %v15347_v16  ;;  %13516 = vmatprep.mubr.msk.f32.mxu0 %vm631_vm0, %v17311_v33  ;;  %v15350_v33 = vld [vmem:[#allocation2 + $0xe8] sm:$0xff] }
 0x471   : > { %14183 = vmatpush3.bf16.msra.mxu1 %v17603_v4  ;;  %14137 = vmatprep.mubr.msk.f32.mxu1 %vm631_vm0, %v15348_v3  ;;  %v15354_v4 = vld [vmem:[#allocation2 + $0x128] sm:$0xff] }
 0x472   : > { %14184 = vmatprep.subr.bf16.mxu1 %v15336_v0  ;;  %13561 = vmatpush3.bf16.msra.mxu0 %v15338_v42  ;;  %v15364_v42 = vld [vmem:[#allocation2 + $0x1c8] sm:$0xff] }
 0x473   : > { %13517 = vmatmul.mubr.msk.f32.gmra.mrb[36].mxu0 %vm631_vm0, %v17321_v26  ;;  %14338 = vmatprep.subr.bf16.mxu0 %v17754_v32  ;;  %v15352_v26 = vld [vmem:[#allocation2 + $0x108] sm:$0xff] }
 0x474   : > { %14138 = vmatmul.mubr.msk.f32.gmra.mrb[2].mxu1 %vm631_vm0, %v15349_v27  ;;  %13519 = vmatprep.mubr.msk.f32.mxu0 %vm631_vm0, %v17327_v49  ;;  %v15353_v49 = vld [vmem:[#allocation2 + $0x110] sm:$0xff]  ;;  %v17822_v16 = vld [vmem:[#allocation2 + $0x1a8] sm:$0xff] }
 0x475   : > { %14140 = vmatprep.mubr.msk.f32.mxu1 %vm631_vm0, %v15350_v33  ;;  %14185 = vmatpush3.bf16.msra.mxu1 %v15336_v0  ;;  %v15365_v0 = vld [vmem:[#allocation2 + $0x1d0] sm:$0xff]  ;;  %v15366_v3 = vld [vmem:[#allocation2 + $0x1e8] sm:$0xff] }
 0x476   : > { %14234 = vmatprep.subr.bf16.mxu1 %v17759_v8  ;;  %v17827_v27 = vld [vmem:[#allocation2 + $0x1b0] sm:$0xff] }
 0x477   : > { %13520 = vmatmul.mubr.msk.f32.gmra.mrb[38].mxu0 %vm631_vm0, %v17333_v57  ;;  %v15355_v57 = vld [vmem:[#allocation2 + $0x130] sm:$0xff] }
 0x478   : > { %14141 = vmatmul.mubr.msk.f32.gmra.mrb[4].mxu1 %vm631_vm0, %v15351_v7  ;;  %13522 = vmatprep.mubr.msk.f32.mxu0 %vm631_vm0, %v17239_v25  ;;  %v4662_v25 = vld [vmem:[#allocation2 + $0x108] sm:$0xff]  ;;  %v15367_v33 = vld [vmem:[#allocation2 + $0x1f0] sm:$0xff] }
 0x479   : > { %14143 = vmatprep.mubr.msk.f32.mxu1 %vm631_vm0, %v15352_v26  ;;  %v17832_v7 = vld [vmem:[#allocation2 + $0x1c8] sm:$0xff] }
 0x47a   : > { %v15368_v26 = vld [vmem:[#allocation2 + $0x208] sm:$0xff] }
 0x47b   : > { %13523 = vmatmul.mubr.msk.f32.gmra.mrb[40].mxu0 %vm631_vm0, %v17247_v39  ;;  %v4663_v39 = vld [vmem:[#allocation2 + $0x110] sm:$0xff] }
 0x47c   : > { %14144 = vmatmul.mubr.msk.f32.gmra.mrb[6].mxu1 %vm631_vm0, %v15353_v49  ;;  %13525 = vmatprep.mubr.msk.f32.mxu0 %vm631_vm0, %v17258_v36  ;;  %v4664_v36 = vld [vmem:[#allocation2 + $0x128] sm:$0xff]  ;;  %v17837_v49 = vld [vmem:[#allocation2 + $0x1d0] sm:$0xff] }
 0x47d   : > { %14146 = vmatprep.mubr.msk.f32.mxu1 %vm631_vm0, %v15354_v4  ;;  %v15369_v4 = vld [vmem:[#allocation2 + $0x210] sm:$0xff] }
 0x47f   : > { %13526 = vmatmul.mubr.msk.f32.gmra.mrb[42].mxu0 %vm631_vm0, %v17267_v52  ;;  %v4665_v52 = vld [vmem:[#allocation2 + $0x130] sm:$0xff] }
 0x480   : > { %14147 = vmatmul.mubr.msk.f32.gmra.mrb[8].mxu1 %vm631_vm0, %v15355_v57  ;;  %13528 = vmatprep.mubr.msk.f32.mxu0 %vm631_vm0, %v4662_v25  ;;  %v17842_v57 = vld [vmem:[#allocation2 + $0x1e8] sm:$0xff] }
 0x481   : > { %14149 = vmatprep.mubr.msk.f32.mxu1 %vm631_vm0, %v15356_v2  ;;  %v15370_v25 = vld [vmem:[#allocation2 + $0x228] sm:$0xff]  ;;  %v17847_v2 = vld [vmem:[#allocation2 + $0x1f0] sm:$0xff] }
 0x483   : > { %13529 = vmatmul.mubr.msk.f32.gmra.mrb[44].mxu0 %vm631_vm0, %v4663_v39  ;;  %v15371_v39 = vld [vmem:[#allocation2 + $0x230] sm:$0xff] }
 0x484   : > { %14150 = vmatmul.mubr.msk.f32.gmra.mrb[10].mxu1 %vm631_vm0, %v15357_v59  ;;  %13531 = vmatprep.mubr.msk.f32.mxu0 %vm631_vm0, %v4664_v36  ;;  %v17852_v59 = vld [vmem:[#allocation2 + $0x208] sm:$0xff] }
 0x485   : > { %14152 = vmatprep.mubr.msk.f32.mxu1 %vm631_vm0, %v15358_v19  ;;  %v15372_v36 = vld [vmem:[#allocation2 + $0x248] sm:$0xff]  ;;  %v17857_v19 = vld [vmem:[#allocation2 + $0x210] sm:$0xff] }
 0x487   : > { %13532 = vmatmul.mubr.msk.f32.gmra.mrb[46].mxu0 %vm631_vm0, %v4665_v52  ;;  %v15373_v52 = vld [vmem:[#allocation2 + $0x250] sm:$0xff] }
 0x488   : > { %14153 = vmatmul.mubr.msk.f32.gmra.mrb[12].mxu1 %vm631_vm0, %v15359_v23  ;;  %13534 = vmatprep.mubr.msk.f32.mxu0 %vm631_vm0, %v17792_v28  ;;  %v17862_v23 = vld [vmem:[#allocation2 + $0x228] sm:$0xff] }
 0x489   : > { %14155 = vmatprep.mubr.msk.f32.mxu1 %vm631_vm0, %v15360_v37  ;;  %v15374_v37 = vld [vmem:[#allocation2 + $0x268] sm:$0xff] }
 0x48b   : > { %13535 = vmatmul.mubr.msk.f32.gmra.mrb[48].mxu0 %vm631_vm0, %v17797_v43 }
 0x48c   : > { %14156 = vmatmul.mubr.msk.f32.gmra.mrb[14].mxu1 %vm631_vm0, %v15361_v60  ;;  %13537 = vmatprep.mubr.msk.f32.mxu0 %vm631_vm0, %v17802_v30  ;;  %v5020_v60 = vld [vmem:[#allocation2 + $0x4b] sm:$0xff] }
 0x48d   : > { %14158 = vmatprep.mubr.msk.f32.mxu1 %vm631_vm0, %v15362_v13  ;;  %v17867_v13 = vld [vmem:[#allocation2 + $0x230] sm:$0xff] }
 0x48f   : > { %13538 = vmatmul.mubr.msk.f32.gmra.mrb[50].mxu0 %vm631_vm0, %v17807_v40 }
 0x490   : > { %14159 = vmatmul.mubr.msk.f32.gmra.mrb[16].mxu1 %vm631_vm0, %v15363_v63  ;;  %13540 = vmatprep.mubr.msk.f32.mxu0 %vm631_vm0, %v17812_v58  ;;  %v15375_v63 = vld [vmem:[#allocation2 + $0x270] sm:$0xff] }
 0x491   : > { %14161 = vmatprep.mubr.msk.f32.mxu1 %vm631_vm0, %v15364_v42  ;;  %v15376_v42 = vld [vmem:[#allocation2 + $0x288] sm:$0xff] }
 0x493   : > { %13541 = vmatmul.mubr.msk.f32.gmra.mrb[52].mxu0 %vm631_vm0, %v17817_v5 }
 0x494   : > { %14162 = vmatmul.mubr.msk.f32.gmra.mrb[18].mxu1 %vm631_vm0, %v15365_v0  ;;  %13543 = vmatprep.mubr.msk.f32.mxu0 %vm631_vm0, %v17822_v16  ;;  %v5021_v0 = vld [vmem:[#allocation2 + $0x53] sm:$0xff] }
 0x495   : > { %14164 = vmatprep.mubr.msk.f32.mxu1 %vm631_vm0, %v15366_v3  ;;  %v5022_v3 = vld [vmem:[#allocation2 + $0x6b] sm:$0xff] }
 0x497   : > { %13544 = vmatmul.mubr.msk.f32.gmra.mrb[54].mxu0 %vm631_vm0, %v17827_v27 }
 0x498   : > { %14165 = vmatmul.mubr.msk.f32.gmra.mrb[20].mxu1 %vm631_vm0, %v15367_v33  ;;  %13546 = vmatprep.mubr.msk.f32.mxu0 %vm631_vm0, %v17832_v7  ;;  %v17877_v33 = vld [vmem:[%s18410_s3 + $0x1a8] sm:$0xff]  }
 0x499   : > { %14167 = vmatprep.mubr.msk.f32.mxu1 %vm631_vm0, %v15368_v26  ;;  %v15377_v26 = vld [vmem:[#allocation2 + $0x290] sm:$0xff] }
 0x49b   : > { %13547 = vmatmul.mubr.msk.f32.gmra.mrb[56].mxu0 %vm631_vm0, %v17837_v49 }
 0x49c   : > { %14168 = vmatmul.mubr.msk.f32.gmra.mrb[22].mxu1 %vm631_vm0, %v15369_v4  ;;  %13549 = vmatprep.mubr.msk.f32.mxu0 %vm631_vm0, %v17842_v57  ;;  %v5023_v4 = vld [vmem:[#allocation2 + $0x73] sm:$0xff] }
 0x49d   : > { %14170 = vmatprep.mubr.msk.f32.mxu1 %vm631_vm0, %v15370_v25  ;;  %v15340_v25 = vld [vmem:[%s18410_s3 + $0x188] sm:$0xff]  }
 0x49f   : > { %13550 = vmatmul.mubr.msk.f32.gmra.mrb[58].mxu0 %vm631_vm0, %v17847_v2 }
 0x4a0   : > { %14171 = vmatmul.mubr.msk.f32.gmra.mrb[24].mxu1 %vm631_vm0, %v15371_v39  ;;  %13552 = vmatprep.mubr.msk.f32.mxu0 %vm631_vm0, %v17852_v59  ;;  %v5024_v39 = vld [vmem:[#allocation2 + $0x8b] sm:$0xff] }
 0x4a1   : > { %14173 = vmatprep.mubr.msk.f32.mxu1 %vm631_vm0, %v15372_v36  ;;  %v17900_v36 = vld [vmem:[%s18410_s3 + $0x190] sm:$0xff]  }
 0x4a3   : > { %13553 = vmatmul.mubr.msk.f32.gmra.mrb[60].mxu0 %vm631_vm0, %v17857_v19 }
 0x4a4   : > { %14174 = vmatmul.mubr.msk.f32.gmra.mrb[26].mxu1 %vm631_vm0, %v15373_v52  ;;  %13555 = vmatprep.mubr.msk.f32.mxu0 %vm631_vm0, %v17862_v23  ;;  %v5031_v52 = vld [vmem:[#allocation2 + $0xf3] sm:$0xff] }
 0x4a5   : > { %14176 = vmatprep.mubr.msk.f32.mxu1 %vm631_vm0, %v15374_v37  ;;  %v5037_v37 = vld [vmem:[#allocation2 + $0x153] sm:$0xff] }
 0x4a7   : > { %13556 = vmatmul.mubr.msk.f32.gmra.mrb[62].mxu0 %vm631_vm0, %v17867_v13 }
 0x4a8   : > { %14177 = vmatmul.mubr.msk.f32.gmra.mrb[28].mxu1 %vm631_vm0, %v15375_v63  ;;  %13562 = vmatprep.mubr.msk.f32.mxu0 %vm631_vm0, %v5020_v60  ;;  %v17942_v60 = vld [vmem:[#allocation2 + $0x16b] sm:$0xff]  ;;  %v5039_v63 = vld [vmem:[#allocation2 + $0x173] sm:$0xff] }
 0x4a9   : > { %14179 = vmatprep.mubr.msk.f32.mxu1 %vm631_vm0, %v15376_v42  ;;  %v18665_v42 = vld [vmem:[#allocation35_spill] sm:$0xff] }
 0x4ab   : > { %13563 = vmatmul.mubr.msk.f32.vlgmr.msra.gmra.mrb[32].mxu0 %vm631_vm0, %v5021_v0  ;;  %v17951_v0 = vld [vmem:[#allocation2 + $0x18b] sm:$0xff] }
 0x4ac   : > { %14180 = vmatmul.mubr.msk.f32.gmra.mrb[30].mxu1 %vm631_vm0, %v15377_v26  ;;  %13565 = vmatprep.mubr.msk.f32.mxu0 %vm631_vm0, %v5022_v3  ;;  %v5041_v3 = vld [vmem:[#allocation2 + $0x193] sm:$0xff]  ;;  %v17960_v26 = vld [vmem:[#allocation2 + $0x1ab] sm:$0xff] }
 0x4ad   : > { %14186 = vmatprep.mubr.msk.f32.mxu1 %vm631_vm0, %v17464_v6  ;;  %14339 = vmatpush3.bf16.msra.mxu0 %v17754_v32  ;;  %v5025_v6 = vld [vmem:[#allocation2 + $0x93] sm:$0xff] }
 0x4ae   : > { %14340 = vmatprep.subr.bf16.mxu0 %v17877_v33 }
 0x4af   : > { %13566 = vmatmul.mubr.msk.f32.gmra.mrb[34].mxu0 %vm631_vm0, %v5023_v4  ;;  %v5043_v4 = vld [vmem:[#allocation2 + $0x1b3] sm:$0xff] }
 0x4b0   : > { %14187 = vmatmul.mubr.msk.f32.vlgmr.msra.gmra.mrb[0].mxu1 %vm631_vm0, %v17469_v15  ;;  %13568 = vmatprep.mubr.msk.f32.mxu0 %vm631_vm0, %v5024_v39  ;;  %v5026_v15 = vld [vmem:[#allocation2 + $0xab] sm:$0xff]  ;;  %v5045_v39 = vld [vmem:[#allocation2 + $0x1d3] sm:$0xff] }
 0x4b1   : > { %14235 = vmatpush3.bf16.msra.mxu1 %v17759_v8  ;;  %14189 = vmatprep.mubr.msk.f32.mxu1 %vm631_vm0, %v17474_v24  ;;  %v5027_v24 = vld [vmem:[#allocation2 + $0xb3] sm:$0xff]  ;;  %v5028_v8 = vld [vmem:[#allocation2 + $0xcb] sm:$0xff] }
 0x4b2   : > { %14236 = vmatprep.subr.bf16.mxu1 %v15340_v25  ;;  %14341 = vmatpush3.bf16.msra.mxu0 %v17877_v33 }
 0x4b3   : > { %13569 = vmatmul.mubr.msk.f32.gmra.mrb[36].mxu0 %vm631_vm0, %v5025_v6  ;;  %v17972_v6 = vld [vmem:[#allocation2 + $0x215] sm:$0xff] }
 0x4b4   : > { %14190 = vmatmul.mubr.msk.f32.gmra.mrb[2].mxu1 %vm631_vm0, %v17479_v29  ;;  %13571 = vmatprep.mubr.msk.f32.mxu0 %vm631_vm0, %v5026_v15  ;;  %v5029_v29 = vld [vmem:[#allocation2 + $0xd3] sm:$0xff]  ;;  %v5046_v15 = vld [vmem:[#allocation2 + $0x1eb] sm:$0xff] }
 0x4b5   : > { %14192 = vmatprep.mubr.msk.f32.mxu1 %vm631_vm0, %v17484_v38  ;;  %14237 = vmatpush3.bf16.msra.mxu1 %v15340_v25  ;;  %v5030_v38 = vld [vmem:[#allocation2 + $0xeb] sm:$0xff] }
 0x4b6   : > { %14286 = vmatprep.subr.bf16.mxu1 %v17900_v36  ;;  %v5044_v25 = vld [vmem:[#allocation2 + $0x1cb] sm:$0xff] }
 0x4b7   : > { %13572 = vmatmul.mubr.msk.f32.gmra.mrb[38].mxu0 %vm631_vm0, %v5027_v24  ;;  %v5047_v24 = vld [vmem:[#allocation2 + $0x1f3] sm:$0xff] }
 0x4b8   : > { %14193 = vmatmul.mubr.msk.f32.gmra.mrb[4].mxu1 %vm631_vm0, %v17489_v44  ;;  %13574 = vmatprep.mubr.msk.f32.mxu0 %vm631_vm0, %v5028_v8  ;;  %v5032_v44 = vld [vmem:[#allocation2 + $0x10b] sm:$0xff]  ;;  %v9230_v8 = vld [vmem:[#allocation2 + $0x235] sm:$0xff] }
 0x4b9   : > { %14195 = vmatprep.mubr.msk.f32.mxu1 %vm631_vm0, %v17494_v31  ;;  %v5033_v31 = vld [vmem:[#allocation2 + $0x113] sm:$0xff] }
 0x4bb   : > { %13575 = vmatmul.mubr.msk.f32.gmra.mrb[40].mxu0 %vm631_vm0, %v5029_v29  ;;  %v9231_v29 = vld [vmem:[#allocation2 + $0x24d] sm:$0xff] }
 0x4bc   : > { %14196 = vmatmul.mubr.msk.f32.gmra.mrb[6].mxu1 %vm631_vm0, %v17499_v55  ;;  %13577 = vmatprep.mubr.msk.f32.mxu0 %vm631_vm0, %v5030_v38  ;;  %v5034_v55 = vld [vmem:[#allocation2 + $0x12b] sm:$0xff]  ;;  %v5049_v38 = vld [vmem:[#allocation2 + $0x213] sm:$0xff] }
 0x4bd   : > { %14198 = vmatprep.mubr.msk.f32.mxu1 %vm631_vm0, %v17504_v56  ;;  %v5035_v56 = vld [vmem:[#allocation2 + $0x133] sm:$0xff] }
 0x4bf   : > { %13578 = vmatmul.mubr.msk.f32.gmra.mrb[42].mxu0 %vm631_vm0, %v5031_v52  ;;  %v9232_v52 = vld [vmem:[#allocation2 + $0x255] sm:$0xff] }
 0x4c0   : > { %14199 = vmatmul.mubr.msk.f32.gmra.mrb[8].mxu1 %vm631_vm0, %v17509_v62  ;;  %13580 = vmatprep.mubr.msk.f32.mxu0 %vm631_vm0, %v5032_v44  ;;  %v5036_v62 = vld [vmem:[#allocation2 + $0x14b] sm:$0xff] }
 0x4c1   : > { %14201 = vmatprep.mubr.msk.f32.mxu1 %vm631_vm0, %v17514_v22  ;;  %v9233_v44 = vld [vmem:[#allocation2 + $0x26d] sm:$0xff] }
 0x4c3   : > { %13581 = vmatmul.mubr.msk.f32.gmra.mrb[44].mxu0 %vm631_vm0, %v5033_v31  ;;  %v5051_v31 = vld [vmem:[#allocation2 + $0x233] sm:$0xff] }
 0x4c4   : > { %14202 = vmatmul.mubr.msk.f32.gmra.mrb[10].mxu1 %vm631_vm0, %v17519_v1  ;;  %13583 = vmatprep.mubr.msk.f32.mxu0 %vm631_vm0, %v5034_v55  ;;  %v9234_v55 = vld [vmem:[#allocation2 + $0x275] sm:$0xff] }
 0x4c5   : > { %14204 = vmatprep.mubr.msk.f32.mxu1 %vm631_vm0, %v17524_v20 }
 0x4c7   : > { %13584 = vmatmul.mubr.msk.f32.gmra.mrb[46].mxu0 %vm631_vm0, %v5035_v56  ;;  %v9235_v56 = vld [vmem:[#allocation2 + $0x28d] sm:$0xff] }
 0x4c8   : > { %14205 = vmatmul.mubr.msk.f32.gmra.mrb[12].mxu1 %vm631_vm0, %v17529_v34  ;;  %13586 = vmatprep.mubr.msk.f32.mxu0 %vm631_vm0, %v5036_v62 }
 0x4c9   : > { %14207 = vmatprep.mubr.msk.f32.mxu1 %vm631_vm0, %v17534_v50 }
 0x4cb   : > { %13587 = vmatmul.mubr.msk.f32.gmra.mrb[48].mxu0 %vm631_vm0, %v5037_v37  ;;  %v9236_v37 = vld [vmem:[#allocation2 + $0x295] sm:$0xff] }
 0x4cc   : > { %14208 = vmatmul.mubr.msk.f32.gmra.mrb[14].mxu1 %vm631_vm0, %v17539_v47  ;;  %13589 = vmatprep.mubr.msk.f32.mxu0 %vm631_vm0, %v17942_v60 }
 0x4cd   : > { %14210 = vmatprep.mubr.msk.f32.mxu1 %vm631_vm0, %v17544_v45 }
 0x4cf   : > { %13590 = vmatmul.mubr.msk.f32.gmra.mrb[50].mxu0 %vm631_vm0, %v5039_v63  ;;  %v9576_v63 = vld [vmem:[#allocation2 + $0x143] sm:$0xff] }
 0x4d0   : > { %14211 = vmatmul.mubr.msk.f32.gmra.mrb[16].mxu1 %vm631_vm0, %v18665_v42  ;;  %13592 = vmatprep.mubr.msk.f32.mxu0 %vm631_vm0, %v17951_v0 }
 0x4d1   : > { %14213 = vmatprep.mubr.msk.f32.mxu1 %vm631_vm0, %v17556_v12 }
 0x4d3   : > { %13593 = vmatmul.mubr.msk.f32.gmra.mrb[52].mxu0 %vm631_vm0, %v5041_v3  ;;  %v15344_v3 = vld [vmem:[%s18410_s3 + $0x198] sm:$0xff]  }
 0x4d4   : > { %14214 = vmatmul.mubr.msk.f32.gmra.mrb[18].mxu1 %vm631_vm0, %v17561_v41  ;;  %13595 = vmatprep.mubr.msk.f32.mxu0 %vm631_vm0, %v17960_v26 }
 0x4d5   : > { %14216 = vmatprep.mubr.msk.f32.mxu1 %vm631_vm0, %v17566_v10 }
 0x4d7   : > { %13596 = vmatmul.mubr.msk.f32.gmra.mrb[54].mxu0 %vm631_vm0, %v5043_v4 }
 0x4d8   : > { %14217 = vmatmul.mubr.msk.f32.gmra.mrb[20].mxu1 %vm631_vm0, %v17571_v53  ;;  %13598 = vmatprep.mubr.msk.f32.mxu0 %vm631_vm0, %v5044_v25 }
 0x4d9   : > { %14219 = vmatprep.mubr.msk.f32.mxu1 %vm631_vm0, %v17701_v9 }
 0x4db   : > { %13599 = vmatmul.mubr.msk.f32.gmra.mrb[56].mxu0 %vm631_vm0, %v5045_v39 }
 0x4dc   : > { %14220 = vmatmul.mubr.msk.f32.gmra.mrb[22].mxu1 %vm631_vm0, %v17972_v6  ;;  %13601 = vmatprep.mubr.msk.f32.mxu0 %vm631_vm0, %v5046_v15 }
 0x4dd   : > { %14222 = vmatprep.mubr.msk.f32.mxu1 %vm631_vm0, %v17714_v18 }
 0x4df   : > { %13602 = vmatmul.mubr.msk.f32.gmra.mrb[58].mxu0 %vm631_vm0, %v5047_v24 }
 0x4e0   : > { %14223 = vmatmul.mubr.msk.f32.gmra.mrb[24].mxu1 %vm631_vm0, %v9230_v8  ;;  %13604 = vmatprep.mubr.msk.f32.mxu0 %vm631_vm0, %v17679_v11 }
 0x4e1   : > { %14225 = vmatprep.mubr.msk.f32.mxu1 %vm631_vm0, %v9231_v29 }
 0x4e3   : > { %13605 = vmatmul.mubr.msk.f32.gmra.mrb[60].mxu0 %vm631_vm0, %v5049_v38 }
 0x4e4   : > { %14226 = vmatmul.mubr.msk.f32.gmra.mrb[26].mxu1 %vm631_vm0, %v9232_v52  ;;  %13607 = vmatprep.mubr.msk.f32.mxu0 %vm631_vm0, %v17690_v61 }
 0x4e5   : > { %14228 = vmatprep.mubr.msk.f32.mxu1 %vm631_vm0, %v9233_v44 }
 0x4e7   : > { %13608 = vmatmul.mubr.msk.f32.gmra.mrb[62].mxu0 %vm631_vm0, %v5051_v31 }
 0x4e8   : > { %14229 = vmatmul.mubr.msk.f32.gmra.mrb[28].mxu1 %vm631_vm0, %v9234_v55  ;;  %14342 = vmatprep.mubr.msk.f32.mxu0 %vm631_vm0, %v17514_v22  ;;  %v9578_v22 = vld [vmem:[#allocation2 + $0x163] sm:$0xff] }
 0x4e9   : > { %14231 = vmatprep.mubr.msk.f32.mxu1 %vm631_vm0, %v9235_v56 }
 0x4eb   : > { %14343 = vmatmul.mubr.msk.f32.vlgmr.msra.gmra.mrb[64].mxu0 %vm631_vm0, %v17519_v1  ;;  %v9580_v1 = vld [vmem:[#allocation2 + $0x183] sm:$0xff] }
 0x4ec   : > { %14232 = vmatmul.mubr.msk.f32.gmra.mrb[30].mxu1 %vm631_vm0, %v9236_v37  ;;  %14345 = vmatprep.mubr.msk.f32.mxu0 %vm631_vm0, %v17524_v20  ;;  %v9582_v20 = vld [vmem:[#allocation2 + $0x1a3] sm:$0xff] }
 0x4ed   : > { %14238 = vmatprep.mubr.msk.f32.mxu1 %vm631_vm0, %v9576_v63 }
 0x4ef   : > { %14346 = vmatmul.mubr.msk.f32.gmra.mrb[66].mxu0 %vm631_vm0, %v17529_v34  ;;  %v9584_v34 = vld [vmem:[#allocation2 + $0x1c3] sm:$0xff] }
 0x4f0   : > { %14239 = vmatmul.mubr.msk.f32.vlgmr.msra.gmra.mrb[0].mxu1 %vm631_vm0, %v5036_v62  ;;  %14348 = vmatprep.mubr.msk.f32.mxu0 %vm631_vm0, %v17534_v50  ;;  %v9586_v50 = vld [vmem:[#allocation2 + $0x1e3] sm:$0xff] }
 0x4f1   : > { %14287 = vmatpush3.bf16.msra.mxu1 %v17900_v36  ;;  %14241 = vmatprep.mubr.msk.f32.mxu1 %vm631_vm0, %v9578_v22 }
 0x4f2   : > { %14288 = vmatprep.subr.bf16.mxu1 %v15344_v3 }
 0x4f3   : > { %14349 = vmatmul.mubr.msk.f32.gmra.mrb[68].mxu0 %vm631_vm0, %v17539_v47  ;;  %v10338_v47 = vld [vmem:[#allocation2 + $0x2ad] sm:$0xff] }
 0x4f4   : > { %14242 = vmatmul.mubr.msk.f32.gmra.mrb[2].mxu1 %vm631_vm0, %v17942_v60  ;;  %14351 = vmatprep.mubr.msk.f32.mxu0 %vm631_vm0, %v17544_v45  ;;  %v10339_v45 = vld [vmem:[#allocation2 + $0x2b5] sm:$0xff] }
 0x4f5   : > { %14244 = vmatprep.mubr.msk.f32.mxu1 %vm631_vm0, %v9580_v1  ;;  %14289 = vmatpush3.bf16.msra.mxu1 %v15344_v3 }
 0x4f6   : > { %14390 = vmatprep.subr.bf16.mxu1 %v17754_v32 }
 0x4f7   : > { %14352 = vmatmul.mubr.msk.f32.gmra.mrb[70].mxu0 %vm631_vm0, %v18665_v42 }
 0x4f8   : > { %14245 = vmatmul.mubr.msk.f32.gmra.mrb[4].mxu1 %vm631_vm0, %v17951_v0  ;;  %14354 = vmatprep.mubr.msk.f32.mxu0 %vm631_vm0, %v17556_v12  ;;  %v10340_v12 = vld [vmem:[#allocation2 + $0x2cd] sm:$0xff] }
 0x4f9   : > { %14247 = vmatprep.mubr.msk.f32.mxu1 %vm631_vm0, %v9582_v20 }
 0x4fb   : > { %14355 = vmatmul.mubr.msk.f32.gmra.mrb[72].mxu0 %vm631_vm0, %v17561_v41  ;;  %v9599_v41 = vld [vmem:[#allocation2 + $0x2ab] sm:$0xff] }
 0x4fc   : > { %14248 = vmatmul.mubr.msk.f32.gmra.mrb[6].mxu1 %vm631_vm0, %v17960_v26  ;;  %14357 = vmatprep.mubr.msk.f32.mxu0 %vm631_vm0, %v17566_v10  ;;  %v10341_v10 = vld [vmem:[#allocation2 + $0x2d5] sm:$0xff] }
 0x4fd   : > { %14250 = vmatprep.mubr.msk.f32.mxu1 %vm631_vm0, %v9584_v34 }
 0x4ff   : > { %14358 = vmatmul.mubr.msk.f32.gmra.mrb[74].mxu0 %vm631_vm0, %v17571_v53  ;;  %v9598_v53 = vld [vmem:[#allocation2 + $0x2a3] sm:$0xff] }
 0x500   : > { %14251 = vmatmul.mubr.msk.f32.gmra.mrb[8].mxu1 %vm631_vm0, %v5044_v25  ;;  %14360 = vmatprep.mubr.msk.f32.mxu0 %vm631_vm0, %v17701_v9  ;;  %v10344_v9 = vld [vmem:[#allocation2 + $0x30d] sm:$0xff] }
 0x501   : > { %14253 = vmatprep.mubr.msk.f32.mxu1 %vm631_vm0, %v9586_v50 }
 0x503   : > { %14361 = vmatmul.mubr.msk.f32.gmra.mrb[76].mxu0 %vm631_vm0, %v17972_v6 }
 0x504   : > { %14254 = vmatmul.mubr.msk.f32.gmra.mrb[10].mxu1 %vm631_vm0, %v5046_v15  ;;  %14363 = vmatprep.mubr.msk.f32.mxu0 %vm631_vm0, %v17714_v18  ;;  %v9604_v18 = vld [vmem:[#allocation2 + $0x303] sm:$0xff] }
 0x505   : > { %14256 = vmatprep.mubr.msk.f32.mxu1 %vm631_vm0, %v17674_v46  ;;  %v9600_v46 = vld [vmem:[#allocation2 + $0x2c3] sm:$0xff] }
 0x507   : > { %14364 = vmatmul.mubr.msk.f32.gmra.mrb[78].mxu0 %vm631_vm0, %v9230_v8 }
 0x508   : > { %14257 = vmatmul.mubr.msk.f32.gmra.mrb[12].mxu1 %vm631_vm0, %v17679_v11  ;;  %14366 = vmatprep.mubr.msk.f32.mxu0 %vm631_vm0, %v9231_v29  ;;  %v10342_v11 = vld [vmem:[#allocation2 + $0x2ed] sm:$0xff] }
 0x509   : > { %14259 = vmatprep.mubr.msk.f32.mxu1 %vm631_vm0, %v17685_v54  ;;  %v9601_v54 = vld [vmem:[#allocation2 + $0x2cb] sm:$0xff] }
 0x50b   : > { %14367 = vmatmul.mubr.msk.f32.gmra.mrb[80].mxu0 %vm631_vm0, %v9232_v52 }
 0x50c   : > { %14260 = vmatmul.mubr.msk.f32.gmra.mrb[14].mxu1 %vm631_vm0, %v17690_v61  ;;  %14369 = vmatprep.mubr.msk.f32.mxu0 %vm631_vm0, %v9233_v44  ;;  %v10343_v61 = vld [vmem:[#allocation2 + $0x2f5] sm:$0xff] }
 0x50d   : > { %14262 = vmatprep.mubr.msk.f32.mxu1 %vm631_vm0, %v17696_v17  ;;  %v9602_v17 = vld [vmem:[#allocation2 + $0x2e3] sm:$0xff] }
 0x50f   : > { %14370 = vmatmul.mubr.msk.f32.gmra.mrb[82].mxu0 %vm631_vm0, %v9234_v55 }
 0x510   : > { %14263 = vmatmul.mubr.msk.f32.gmra.mrb[16].mxu1 %vm631_vm0, %v17703_v14  ;;  %14372 = vmatprep.mubr.msk.f32.mxu0 %vm631_vm0, %v9235_v56  ;;  %v9603_v14 = vld [vmem:[#allocation2 + $0x2eb] sm:$0xff] }
 0x511   : > { %14265 = vmatprep.mubr.msk.f32.mxu1 %vm631_vm0, %v17709_v48  ;;  %v10345_v48 = vld [vmem:[#allocation2 + $0x315] sm:$0xff] }
 0x513   : > { %14373 = vmatmul.mubr.msk.f32.gmra.mrb[84].mxu0 %vm631_vm0, %v9236_v37 }
 0x514   : > { %14266 = vmatmul.mubr.msk.f32.gmra.mrb[18].mxu1 %vm631_vm0, %v17716_v21  ;;  %14375 = vmatprep.mubr.msk.f32.mxu0 %vm631_vm0, %v10338_v47  ;;  %v9605_v21 = vld [vmem:[#allocation2 + $0x30b] sm:$0xff] }
 0x515   : > { %14268 = vmatprep.mubr.msk.f32.mxu1 %vm631_vm0, %v17722_v35  ;;  %v9606_v35 = vld [vmem:[#allocation2 + $0x323] sm:$0xff] }
 0x517   : > { %14376 = vmatmul.mubr.msk.f32.gmra.mrb[86].mxu0 %vm631_vm0, %v10339_v45 }
 0x518   : > { %14269 = vmatmul.mubr.msk.f32.gmra.mrb[20].mxu1 %vm631_vm0, %v17728_v51  ;;  %14378 = vmatprep.mubr.msk.f32.mxu0 %vm631_vm0, %v10340_v12  ;;  %v9607_v51 = vld [vmem:[#allocation2 + $0x32b] sm:$0xff] }
 0x519   : > { %14271 = vmatprep.mubr.msk.f32.mxu1 %vm631_vm0, %v9598_v53 }
 0x51b   : > { %14379 = vmatmul.mubr.msk.f32.gmra.mrb[88].mxu0 %vm631_vm0, %v10341_v10 }
 0x51c   : > { %14272 = vmatmul.mubr.msk.f32.gmra.mrb[22].mxu1 %vm631_vm0, %v9599_v41  ;;  %14381 = vmatprep.mubr.msk.f32.mxu0 %vm631_vm0, %v10342_v11 }
 0x51d   : > { %14274 = vmatprep.mubr.msk.f32.mxu1 %vm631_vm0, %v9600_v46 }
 0x51f   : > { %14382 = vmatmul.mubr.msk.f32.gmra.mrb[90].mxu0 %vm631_vm0, %v10343_v61 }
 0x520   : > { %14275 = vmatmul.mubr.msk.f32.gmra.mrb[24].mxu1 %vm631_vm0, %v9601_v54  ;;  %14384 = vmatprep.mubr.msk.f32.mxu0 %vm631_vm0, %v10344_v9 }
 0x521   : > { %14277 = vmatprep.mubr.msk.f32.mxu1 %vm631_vm0, %v9602_v17 }
 0x523   : > { %14385 = vmatmul.mubr.msk.f32.gmra.mrb[92].mxu0 %vm631_vm0, %v10345_v48 }
 0x524   : > { %14278 = vmatmul.mubr.msk.f32.gmra.mrb[26].mxu1 %vm631_vm0, %v9603_v14 }
 0x525   : > { %14280 = vmatprep.mubr.msk.f32.mxu1 %vm631_vm0, %v9604_v18 }
 0x528   : > { %14281 = vmatmul.mubr.msk.f32.gmra.mrb[28].mxu1 %vm631_vm0, %v9605_v21 }
 0x529   : > { %14283 = vmatprep.mubr.msk.f32.mxu1 %vm631_vm0, %v9606_v35 }
 0x52c   : > { %14284 = vmatmul.mubr.msk.f32.gmra.mrb[30].mxu1 %vm631_vm0, %v9607_v51 }
 0x52d   : > { %14290 = vmatprep.mubr.msk.f32.mxu1 %vm631_vm0, %v17792_v28  ;;  %v9963_v28 = vld [vmem:[#allocation2 + $0x250] sm:$0xff] }
 0x530   : > { %14291 = vmatmul.mubr.msk.f32.vlgmr.msra.gmra.mrb[0].mxu1 %vm631_vm0, %v17797_v43  ;;  %v9964_v43 = vld [vmem:[#allocation2 + $0x268] sm:$0xff] }
 0x531   : > { %14392 = vmatpush3.bf16.msra.mxu1 %v17754_v32  ;;  %14293 = vmatprep.mubr.msk.f32.mxu1 %vm631_vm0, %v17802_v30  ;;  %v9962_v32 = vld [vmem:[#allocation2 + $0x248] sm:$0xff]  ;;  %v9965_v30 = vld [vmem:[#allocation2 + $0x270] sm:$0xff] }
 0x532   : > { %14391 = vmatprep.subr.bf16.mxu1 %v17877_v33 }
 0x534   : > { %14294 = vmatmul.mubr.msk.f32.gmra.mrb[2].mxu1 %vm631_vm0, %v17807_v40  ;;  %v9966_v40 = vld [vmem:[#allocation2 + $0x288] sm:$0xff] }
 0x535   : > { %14296 = vmatprep.mubr.msk.f32.mxu1 %vm631_vm0, %v17812_v58  ;;  %14393 = vmatpush3.bf16.msra.mxu1 %v17877_v33  ;;  %v9968_v58 = vld [vmem:[#allocation2 + $0x2a8] sm:$0xff]  ;;  %v10347_v33 = vld [vmem:[#allocation2 + $0x335] sm:$0xff] }
 0x538   : > { %14297 = vmatmul.mubr.msk.f32.gmra.mrb[4].mxu1 %vm631_vm0, %v17817_v5  ;;  %v9967_v5 = vld [vmem:[#allocation2 + $0x290] sm:$0xff] }
 0x539   : > { %14299 = vmatprep.mubr.msk.f32.mxu1 %vm631_vm0, %v17822_v16  ;;  %v9969_v16 = vld [vmem:[#allocation2 + $0x2b0] sm:$0xff] }
 0x53c   : > { %14300 = vmatmul.mubr.msk.f32.gmra.mrb[6].mxu1 %vm631_vm0, %v17827_v27  ;;  %v9970_v27 = vld [vmem:[#allocation2 + $0x2c8] sm:$0xff] }
 0x53d   : > { %14302 = vmatprep.mubr.msk.f32.mxu1 %vm631_vm0, %v17832_v7  ;;  %v9971_v7 = vld [vmem:[#allocation2 + $0x2d0] sm:$0xff] }
 0x540   : > { %14303 = vmatmul.mubr.msk.f32.gmra.mrb[8].mxu1 %vm631_vm0, %v17837_v49  ;;  %v9972_v49 = vld [vmem:[#allocation2 + $0x2e8] sm:$0xff] }
 0x541   : > { %14305 = vmatprep.mubr.msk.f32.mxu1 %vm631_vm0, %v17842_v57  ;;  %v9973_v57 = vld [vmem:[#allocation2 + $0x2f0] sm:$0xff] }
 0x544   : > { %14306 = vmatmul.mubr.msk.f32.gmra.mrb[10].mxu1 %vm631_vm0, %v17847_v2  ;;  %v9974_v2 = vld [vmem:[#allocation2 + $0x308] sm:$0xff] }
 0x545   : > { %14308 = vmatprep.mubr.msk.f32.mxu1 %vm631_vm0, %v17852_v59  ;;  %v9975_v59 = vld [vmem:[#allocation2 + $0x310] sm:$0xff] }
 0x548   : > { %14309 = vmatmul.mubr.msk.f32.gmra.mrb[12].mxu1 %vm631_vm0, %v17857_v19  ;;  %v9976_v19 = vld [vmem:[#allocation2 + $0x328] sm:$0xff] }
 0x549   : > { %14311 = vmatprep.mubr.msk.f32.mxu1 %vm631_vm0, %v17862_v23  ;;  %v9977_v23 = vld [vmem:[#allocation2 + $0x330] sm:$0xff] }
 0x54c   : > { %14312 = vmatmul.mubr.msk.f32.gmra.mrb[14].mxu1 %vm631_vm0, %v17867_v13  ;;  %v10346_v13 = vld [vmem:[#allocation2 + $0x32d] sm:$0xff] }
 0x54d   : > { %14314 = vmatprep.mubr.msk.f32.mxu1 %vm631_vm0, %v9962_v32 }
 0x550   : > { %14315 = vmatmul.mubr.msk.f32.gmra.mrb[16].mxu1 %vm631_vm0, %v9963_v28 }
 0x551   : > { %14317 = vmatprep.mubr.msk.f32.mxu1 %vm631_vm0, %v9964_v43 }
 0x554   : > { %14318 = vmatmul.mubr.msk.f32.gmra.mrb[18].mxu1 %vm631_vm0, %v9965_v30 }
 0x555   : > { %14320 = vmatprep.mubr.msk.f32.mxu1 %vm631_vm0, %v9966_v40 }
 0x558   : > { %14321 = vmatmul.mubr.msk.f32.gmra.mrb[20].mxu1 %vm631_vm0, %v9967_v5 }
 0x559   : > { %14323 = vmatprep.mubr.msk.f32.mxu1 %vm631_vm0, %v9968_v58 }
 0x55c   : > { %14324 = vmatmul.mubr.msk.f32.gmra.mrb[22].mxu1 %vm631_vm0, %v9969_v16 }
 0x55d   : > { %14326 = vmatprep.mubr.msk.f32.mxu1 %vm631_vm0, %v9970_v27 }
 0x560   : > { %14327 = vmatmul.mubr.msk.f32.gmra.mrb[24].mxu1 %vm631_vm0, %v9971_v7 }
 0x561   : > { %14329 = vmatprep.mubr.msk.f32.mxu1 %vm631_vm0, %v9972_v49 }
 0x564   : > { %14330 = vmatmul.mubr.msk.f32.gmra.mrb[26].mxu1 %vm631_vm0, %v9973_v57 }
 0x565   : > { %14332 = vmatprep.mubr.msk.f32.mxu1 %vm631_vm0, %v9974_v2 }
 0x568   : > { %14333 = vmatmul.mubr.msk.f32.gmra.mrb[28].mxu1 %vm631_vm0, %v9975_v59 }
 0x569   : > { %14335 = vmatprep.mubr.msk.f32.mxu1 %vm631_vm0, %v9976_v19 }
 0x56c   : > { %14336 = vmatmul.mubr.msk.f32.gmra.mrb[30].mxu1 %vm631_vm0, %v9977_v23 }
 0x56d   : > { %14387 = vmatprep.mubr.msk.f32.mxu1 %vm631_vm0, %v10346_v13 }
 0x574   : > { %14388 = vmatmul.mubr.msk.f32.vlgmr.msra.gmra.mrb[30].mxu1 %vm631_vm0, %v10347_v33 }
 0x57e   : > { %v18142_v36 = vpop.f32.mrb[32].mxu0 }
 0x57f   : > { %v18144_v62 = vpop.f32.mrb[33].mxu0 }
 0x582   : > { %v18146_v60 = vpop.f32.mrb[34].mxu0 }
 0x583   : > { %v18148_v42 = vpop.f32.mrb[35].mxu0 }
 0x586   : > { %v18150_v0 = vpop.f32.mrb[36].mxu0 }
 0x587   : > { %v18152_v26 = vpop.f32.mrb[37].mxu0 }
 0x58a   : > { %v18154_v4 = vpop.f32.mrb[38].mxu0 }
 0x58b   : > { %v18156_v25 = vpop.f32.mrb[39].mxu0 }
 0x58e   : > { %v18158_v39 = vpop.f32.mrb[40].mxu0 }
 0x58f   : > { %v18160_v6 = vpop.f32.mrb[41].mxu0 }
 0x592   : > { %v18162_v15 = vpop.f32.mrb[42].mxu0 }
 0x593   : > { %v18164_v24 = vpop.f32.mrb[43].mxu0 }
 0x596   : > { %v18166_v8 = vpop.f32.mrb[44].mxu0 }
 0x597   : > { %v18168_v29 = vpop.f32.mrb[45].mxu0 }
 0x59a   : > { %v18170_v38 = vpop.f32.mrb[46].mxu0 }
 0x59b   : > { %v18172_v52 = vpop.f32.mrb[47].mxu0 }
 0x59e   : > { %v18174_v44 = vpop.f32.mrb[48].mxu0 }
 0x59f   : > { %v18176_v31 = vpop.f32.mrb[49].mxu0 }
 0x5a2   : > { %v18178_v55 = vpop.f32.mrb[50].mxu0 }
 0x5a3   : > { %v18180_v56 = vpop.f32.mrb[51].mxu0 }
 0x5a6   : > { %v18182_v37 = vpop.f32.mrb[52].mxu0 }
 0x5a7   : > { %v18184_v63 = vpop.f32.mrb[53].mxu0 }
 0x5aa   : > { %v18186_v3 = vpop.f32.mrb[54].mxu0 }
 0x5ab   : > { %v18188_v22 = vpop.f32.mrb[55].mxu0 }
 0x5ae   : > { %v18190_v1 = vpop.f32.mrb[56].mxu0 }
 0x5af   : > { %v18192_v20 = vpop.f32.mrb[57].mxu0 }
 0x5b2   : > { %v18194_v34 = vpop.f32.mrb[58].mxu0 }
 0x5b3   : > { %18666 = vst [vmem:[#allocation6_spill] sm:$0xff] %v18194_v34  ;;  %v18196_v50 = vpop.f32.mrb[59].mxu0 }
 0x5b4   : > { %18667 = vst [vmem:[#allocation7_spill] sm:$0xff] %v18196_v50 }
 0x5b6   : > { %v18198_v47 = vpop.f32.mrb[60].mxu0 }
 0x5b7   : > { %18668 = vst [vmem:[#allocation8_spill] sm:$0xff] %v18198_v47  ;;  %v18200_v45 = vpop.f32.mrb[61].mxu0 }
 0x5b8   : > { %18669 = vst [vmem:[#allocation9_spill] sm:$0xff] %v18200_v45 }
 0x5ba   : > { %v18202_v53 = vpop.f32.mrb[62].mxu0 }
 0x5bb   : > { %18670 = vst [vmem:[#allocation10_spill] sm:$0xff] %v18202_v53  ;;  %v18204_v12 = vpop.f32.mrb[63].mxu0 }
 0x5bc   : > { %18671 = vst [vmem:[#allocation11_spill] sm:$0xff] %v18204_v12 }
 0x5be   : > { %v14344_v41 = vpop.f32.mrb[64].mxu0 }
 0x5bf   : > { %v10495_v10 = vpop.f32.mrb[65].mxu0 }
 0x5c2   : > { %v14347_v46 = vpop.f32.mrb[66].mxu0 }
 0x5c3   : > { %v10505_v11 = vpop.f32.mrb[67].mxu0 }
 0x5c6   : > { %v14350_v54 = vpop.f32.mrb[68].mxu0 }
 0x5c7   : > { %v10515_v61 = vpop.f32.mrb[69].mxu0 }
 0x5ca   : > { %v14353_v17 = vpop.f32.mrb[70].mxu0 }
 0x5cb   : > { %v10525_v9 = vpop.f32.mrb[71].mxu0 }
 0x5ce   : > { %v14356_v14 = vpop.f32.mrb[72].mxu0 }
 0x5cf   : > { %v10535_v48 = vpop.f32.mrb[73].mxu0 }
 0x5d2   : > { %v14359_v18 = vpop.f32.mrb[74].mxu0 }
 0x5d3   : > { %v10545_v21 = vpop.f32.mrb[75].mxu0 }
 0x5d6   : > { %v14362_v35 = vpop.f32.mrb[76].mxu0 }
 0x5d7   : > { %v10555_v51 = vpop.f32.mrb[77].mxu0 }
 0x5da   : > { %v18206_v32 = vpop.f32.mrb[78].mxu0 }
 0x5db   : > { %v18208_v28 = vpop.f32.mrb[79].mxu0 }
 0x5de   : > { %v18210_v43 = vpop.f32.mrb[80].mxu0 }
 0x5df   : > { %v18212_v30 = vpop.f32.mrb[81].mxu0 }
 0x5e2   : > { %v18214_v40 = vpop.f32.mrb[82].mxu0 }
 0x5e3   : > { %v18216_v58 = vpop.f32.mrb[83].mxu0 }
 0x5e6   : > { %v18218_v5 = vpop.f32.mrb[84].mxu0 }
 0x5e7   : > { %v18220_v16 = vpop.f32.mrb[85].mxu0 }
 0x5ea   : > { %v18222_v27 = vpop.f32.mrb[86].mxu0 }
 0x5eb   : > { %v18224_v7 = vpop.f32.mrb[87].mxu0 }
 0x5ee   : > { %v18226_v49 = vpop.f32.mrb[88].mxu0 }
 0x5ef   : > { %v18228_v57 = vpop.f32.mrb[89].mxu0 }
 0x5f0   : > { %18672 = vst [vmem:[#allocation12_spill] sm:$0xff] %v18228_v57 }
 0x5f2   : > { %v18230_v2 = vpop.f32.mrb[90].mxu0 }
 0x5f3   : > { %18673 = vst [vmem:[#allocation13_spill] sm:$0xff] %v18230_v2  ;;  %v18232_v59 = vpop.f32.mrb[91].mxu0 }
 0x5f4   : > { %18674 = vst [vmem:[#allocation14_spill] sm:$0xff] %v18232_v59 }
 0x5f6   : > { %v18234_v19 = vpop.f32.mrb[92].mxu0 }
 0x5f7   : > { %18675 = vst [vmem:[#allocation15_spill] sm:$0xff] %v18234_v19  ;;  %v18236_v23 = vpop.f32.mrb[93].mxu0 }
 0x5f8   : > { %18676 = vst [vmem:[#allocation16_spill] sm:$0xff] %v18236_v23 }
 0x603   : > { %v14292_v13 = vpop.f32.mrb[0].mxu1 }
 0x604   : > { %v14394_v33 = vadd.f32 %v14292_v13, %v18142_v36  ;;  %v10125_v12 = vpop.f32.mrb[1].mxu1 }
 0x605   : > { %v14396_v53 = vadd.f32 %v10125_v12, %v18144_v62 }
 0x606   : > { %v18240_v45 = vadd.f32 %v14394_v33, %v14344_v41 }
 0x607   : > { %v18242_v47 = vadd.f32 %v14396_v53, %v10495_v10  ;;  %v14295_v50 = vpop.f32.mrb[2].mxu1 }
 0x608   : > { %v14398_v34 = vadd.f32 %v14295_v50, %v18146_v60  ;;  %v10135_v2 = vpop.f32.mrb[3].mxu1 }
 0x609   : > { %v14400_v59 = vadd.f32 %v10135_v2, %v18148_v42 }
 0x60a   : > { %v18246_v57 = vadd.f32 %v14398_v34, %v14347_v46 }
 0x60b   : > { %v18248_v19 = vadd.f32 %v14400_v59, %v10505_v11  ;;  %v14298_v23 = vpop.f32.mrb[4].mxu1 }
 0x60c   : > { %v14402_v36 = vadd.f32 %v14298_v23, %v18150_v0  ;;  %v10145_v13 = vpop.f32.mrb[5].mxu1 }
 0x60d   : > { %v14404_v62 = vadd.f32 %v10145_v13, %v18152_v26 }
 0x60e   : > { %v18252_v12 = vadd.f32 %v14402_v36, %v14350_v54 }
 0x60f   : > { %v18254_v53 = vadd.f32 %v14404_v62, %v10515_v61  ;;  %v14301_v41 = vpop.f32.mrb[6].mxu1 }
 0x610   : > { %v14406_v60 = vadd.f32 %v14301_v41, %v18154_v4  ;;  %v10155_v50 = vpop.f32.mrb[7].mxu1 }
 0x611   : > { %v14408_v42 = vadd.f32 %v10155_v50, %v18156_v25 }
 0x612   : > { %v18258_v34 = vadd.f32 %v14406_v60, %v14353_v17 }
 0x613   : > { %v18260_v10 = vadd.f32 %v14408_v42, %v10525_v9  ;;  %v14304_v46 = vpop.f32.mrb[8].mxu1 }
 0x614   : > { %v14410_v0 = vadd.f32 %v14304_v46, %v18158_v39  ;;  %v10165_v11 = vpop.f32.mrb[9].mxu1 }
 0x615   : > { %v14412_v26 = vadd.f32 %v10165_v11, %v18160_v6 }
 0x616   : > { %v14411_v54 = vadd.f32 %v14410_v0, %v14356_v14 }
 0x617   : > { %v14413_v2 = vadd.f32 %v14412_v26, %v10535_v48  ;;  %v14307_v61 = vpop.f32.mrb[10].mxu1 }
 0x618   : > { %v14414_v59 = vadd.f32 %v14307_v61, %v18162_v15  ;;  %v10175_v23 = vpop.f32.mrb[11].mxu1  ;;  %10696 = vrot.lane.b32.xlu1 %v14411_v54, %s15443_s27  ;;  %v18678_v61 = vld [vmem:[#allocation6_spill] sm:$0xff] }
 0x619   : > { %v14416_v4 = vadd.f32 %v10175_v23, %v18164_v24  ;;  %10694 = vrot.lane.b32.xlu0 %v14413_v2, %s15443_s27  ;;  %v18680_v23 = vld [vmem:[#allocation13_spill] sm:$0xff] }
 0x61a   : > { %v14415_v25 = vadd.f32 %v14414_v59, %v14359_v18 }
 0x61b   : > { %v14417_v17 = vadd.f32 %v14416_v4, %v10545_v21  ;;  %v14310_v9 = vpop.f32.mrb[12].mxu1  ;;  %v18681_v4 = vld [vmem:[#allocation14_spill] sm:$0xff] }
 0x61c   : > { %v14418_v39 = vadd.f32 %v14310_v9, %v18166_v8  ;;  %v10185_v33 = vpop.f32.mrb[13].mxu1  ;;  %10700 = vrot.lane.b32.xlu1 %v14415_v25, %s15443_s27 }
 0x61d   : > { %v14420_v6 = vadd.f32 %v10185_v33, %v18168_v29  ;;  %10698 = vrot.lane.b32.xlu0 %v14417_v17, %s15443_s27 }
 0x61e   : > { %v14419_v15 = vadd.f32 %v14418_v39, %v14362_v35 }
 0x61f   : > { %v14421_v14 = vadd.f32 %v14420_v6, %v10555_v51  ;;  %v14313_v48 = vpop.f32.mrb[14].mxu1  ;;  %v18684_v6 = vld [vmem:[#allocation15_spill] sm:$0xff] }
 0x620   : > { %v14422_v36 = vadd.f32 %v14313_v48, %v18170_v38  ;;  %v10195_v24 = vpop.f32.mrb[15].mxu1  ;;  %10704 = vrot.lane.b32.xlu1 %v14419_v15, %s15443_s27 }
 0x621   : > { %v14424_v18 = vadd.f32 %v10195_v24, %v18172_v52  ;;  %10702 = vrot.lane.b32.xlu0 %v14421_v14, %s15443_s27  ;;  %v18685_v14 = vld [vmem:[#allocation16_spill] sm:$0xff]  ;;  %v18686_v24 = vld [vmem:[#allocation10_spill] sm:$0xff] }
 0x622   : > { %v14423_v8 = vadd.f32 %v14422_v36, %v18206_v32 }
 0x623   : > { %v14425_v21 = vadd.f32 %v14424_v18, %v18208_v28  ;;  %v14316_v13 = vpop.f32.mrb[16].mxu1 }
 0x624   : > { %v14426_v29 = vadd.f32 %v14316_v13, %v18174_v44  ;;  %v10205_v62 = vpop.f32.mrb[17].mxu1  ;;  %10708 = vrot.lane.b32.xlu1 %v14423_v8, %s15443_s27 }
 0x625   : > { %v14428_v35 = vadd.f32 %v10205_v62, %v18176_v31  ;;  %10706 = vrot.lane.b32.xlu0 %v14425_v21, %s15443_s27  ;;  %s15445_s27 = smov 96   ;;  %v18687_v21 = vld [vmem:[#allocation11_spill] sm:$0xff] }
 0x626   : > { %v14427_v38 = vadd.f32 %v14426_v29, %v18210_v43 }
 0x627   : > { %v14429_v52 = vadd.f32 %v14428_v35, %v18212_v30  ;;  %v14319_v51 = vpop.f32.mrb[18].mxu1 }
 0x628   : > { %v14430_v41 = vadd.f32 %v14319_v51, %v18178_v55  ;;  %v10215_v32 = vpop.f32.mrb[19].mxu1  ;;  %10728 = vrot.lane.b32.xlu1 %v14427_v38, %s15444_s14 }
 0x629   : > { %v14432_v28 = vadd.f32 %v10215_v32, %v18180_v56  ;;  %10726 = vrot.lane.b32.xlu0 %v14429_v52, %s15444_s14 }
 0x62a   : > { %v14431_v44 = vadd.f32 %v14430_v41, %v18214_v40 }
 0x62b   : > { %v14433_v60 = vadd.f32 %v14432_v28, %v18216_v58  ;;  %v14322_v31 = vpop.f32.mrb[20].mxu1 }
 0x62c   : > { %v14434_v50 = vadd.f32 %v14322_v31, %v18182_v37  ;;  %v10225_v42 = vpop.f32.mrb[21].mxu1  ;;  %10732 = vrot.lane.b32.xlu1 %v14431_v44, %s15444_s14 }
 0x62d   : > { %v14436_v43 = vadd.f32 %v10225_v42, %v18184_v63  ;;  %10730 = vrot.lane.b32.xlu0 %v14433_v60, %s15444_s14 }
 0x62e   : > { %v14435_v55 = vadd.f32 %v14434_v50, %v18218_v5 }
 0x62f   : > { %v14437_v30 = vadd.f32 %v14436_v43, %v18220_v16  ;;  %v14325_v46 = vpop.f32.mrb[22].mxu1 }
 0x630   : > { %v14438_v56 = vadd.f32 %v14325_v46, %v18186_v3  ;;  %v10235_v0 = vpop.f32.mrb[23].mxu1  ;;  %10736 = vrot.lane.b32.xlu1 %v14435_v55, %s15444_s14  ;;  %v18677_v3 = vld [vmem:[#allocation12_spill] sm:$0xff] }
 0x631   : > { %v14440_v40 = vadd.f32 %v10235_v0, %v18188_v22  ;;  %10734 = vrot.lane.b32.xlu0 %v14437_v30, %s15444_s14 }
 0x632   : > { %v14439_v58 = vadd.f32 %v14438_v56, %v18222_v27  ;;  %v18679_v27 = vld [vmem:[#allocation7_spill] sm:$0xff] }
 0x633   : > { %v14441_v37 = vadd.f32 %v14440_v40, %v18224_v7  ;;  %v14328_v11 = vpop.f32.mrb[24].mxu1 }
 0x634   : > { %v14442_v63 = vadd.f32 %v14328_v11, %v18190_v1  ;;  %v10245_v26 = vpop.f32.mrb[25].mxu1  ;;  %10740 = vrot.lane.b32.xlu1 %v14439_v58, %s15444_s14 }
 0x635   : > { %v14444_v5 = vadd.f32 %v10245_v26, %v18192_v20  ;;  %10738 = vrot.lane.b32.xlu0 %v14441_v37, %s15444_s14  ;;  %v18682_v20 = vld [vmem:[#allocation8_spill] sm:$0xff] }
 0x636   : > { %v14443_v16 = vadd.f32 %v14442_v63, %v18226_v49  ;;  %v18683_v49 = vld [vmem:[#allocation9_spill] sm:$0xff] }
 0x637   : > { %v14445_v54 = vadd.f32 %v14444_v5, %v18677_v3  ;;  %v14331_v2 = vpop.f32.mrb[26].mxu1 }
 0x638   : > { %v14446_v22 = vadd.f32 %v14331_v2, %v18678_v61  ;;  %v10255_v59 = vpop.f32.mrb[27].mxu1  ;;  %10760 = vrot.lane.b32.xlu1 %v14443_v16, %s15445_s27 }
 0x639   : > { %v14448_v7 = vadd.f32 %v10255_v59, %v18679_v27  ;;  %10758 = vrot.lane.b32.xlu0 %v14445_v54, %s15445_s27 }
 0x63a   : > { %v14447_v1 = vadd.f32 %v14446_v22, %v18680_v23 }
 0x63b   : > { %v14449_v25 = vadd.f32 %v14448_v7, %v18681_v4  ;;  %v14334_v17 = vpop.f32.mrb[28].mxu1 }
 0x63c   : > { %v14450_v9 = vadd.f32 %v14334_v17, %v18682_v20  ;;  %v10265_v39 = vpop.f32.mrb[29].mxu1  ;;  %10764 = vrot.lane.b32.xlu1 %v14447_v1, %s15445_s27 }
 0x63d   : > { %v14452_v33 = vadd.f32 %v10265_v39, %v18683_v49  ;;  %10762 = vrot.lane.b32.xlu0 %v14449_v25, %s15445_s27 }
 0x63e   : > { %v14451_v15 = vadd.f32 %v14450_v9, %v18684_v6 }
 0x63f   : > { %v14453_v48 = vadd.f32 %v14452_v33, %v18685_v14 }
 0x640   : > { %10768 = vrot.lane.b32.xlu1 %v14451_v15, %s15445_s27 }
 0x641   : > { %10766 = vrot.lane.b32.xlu0 %v14453_v48, %s15445_s27 }
 0x647   : > { %v14389_v36 = vpop.f32.mrb[30].mxu1 }
 0x648   : > { %v14454_v18 = vadd.f32 %v14389_v36, %v18686_v24  ;;  %v10645_v8 = vpop.f32.mrb[31].mxu1 }
 0x649   : > { %v14455_v13 = vadd.f32 %v10645_v8, %v18687_v21 }
 0x64a   : > { %10772 = vrot.lane.b32.xlu1 %v14454_v18, %s15445_s27 }
 0x64b   : > { %10770 = vrot.lane.b32.xlu0 %v14455_v13, %s15445_s27 }
 0x68a   : > { %v10697_v29 = vpop.permute.xlu1 %10696 }
 0x68b   : > { %v10695_v62 = vpop.permute.xlu0 %10694  ;;  %v10783_v30 = vsel %vm631_vm0, %v18240_v45, %v10697_v29 }
 0x68c   : > { %v10782_v46 = vsel %vm631_vm0, %v18242_v47, %v10695_v62 }
 0x68e   : > { %v10701_v35 = vpop.permute.xlu1 %10700 }
 0x68f   : > { %v10699_v38 = vpop.permute.xlu0 %10698  ;;  %v10785_v47 = vsel %vm631_vm0, %v18246_v57, %v10701_v35 }
 0x690   : > { %v10784_v11 = vsel %vm631_vm0, %v18248_v19, %v10699_v38 }
 0x692   : > { %v10705_v52 = vpop.permute.xlu1 %10704 }
 0x693   : > { %v10703_v51 = vpop.permute.xlu0 %10702  ;;  %v10787_v57 = vsel %vm631_vm0, %v18252_v12, %v10705_v52 }
 0x694   : > { %v10786_v19 = vsel %vm631_vm0, %v18254_v53, %v10703_v51 }
 0x696   : > { %v10709_v41 = vpop.permute.xlu1 %10708 }
 0x697   : > { %v10707_v32 = vpop.permute.xlu0 %10706  ;;  %v10789_v12 = vsel %vm631_vm0, %v18258_v34, %v10709_v41 }
 0x698   : > { %v10788_v53 = vsel %vm631_vm0, %v18260_v10, %v10707_v32 }
 0x69a   : > { %v10729_v28 = vpop.permute.xlu1 %10728 }
 0x69b   : > { %v10727_v44 = vpop.permute.xlu0 %10726  ;;  %v10791_v56 = vsel %vm712_vm3, %v10783_v30, %v10729_v28 }
 0x69c   : > { %v10790_v40 = vsel %vm712_vm3, %v10782_v46, %v10727_v44 }
 0x69e   : > { %v10733_v60 = vpop.permute.xlu1 %10732 }
 0x69f   : > { %v10731_v31 = vpop.permute.xlu0 %10730  ;;  %v10793_v63 = vsel %vm712_vm3, %v10785_v47, %v10733_v60 }
 0x6a0   : > { %v10792_v5 = vsel %vm712_vm3, %v10784_v11, %v10731_v31 }
 0x6a2   : > { %v10737_v50 = vpop.permute.xlu1 %10736 }
 0x6a3   : > { %v10735_v42 = vpop.permute.xlu0 %10734  ;;  %v10795_v2 = vsel %vm712_vm3, %v10787_v57, %v10737_v50 }
 0x6a4   : > { %v10794_v22 = vsel %vm712_vm3, %v10786_v19, %v10735_v42 }
 0x6a6   : > { %v10741_v43 = vpop.permute.xlu1 %10740 }
 0x6a7   : > { %v10739_v55 = vpop.permute.xlu0 %10738  ;;  %v10797_v23 = vsel %vm712_vm3, %v10789_v12, %v10741_v43 }
 0x6a8   : > { %v10796_v4 = vsel %vm712_vm3, %v10788_v53, %v10739_v55 }
 0x6aa   : > { %v10761_v0 = vpop.permute.xlu1 %10760 }
 0x6ab   : > { %v10800_v58 = vsel %vm10798_vm4, %v10791_v56, %v10761_v0  ;;  %v10759_v37 = vpop.permute.xlu0 %10758 }
 0x6ac   : > { %10808 = vst [vmem:[%s18320_s23 + $0x8] sm:$0xff] %v10800_v58  ;;  %v10799_v45 = vsel %vm10798_vm4, %v10790_v40, %v10759_v37 }
 0x6ad   : > { %10807 = vst [vmem:[%s18320_s23] sm:$0xff] %v10799_v45 }
 0x6ae   : > { %v10765_v26 = vpop.permute.xlu1 %10764 }
 0x6af   : > { %v10802_v16 = vsel %vm10798_vm4, %v10793_v63, %v10765_v26  ;;  %v10763_v3 = vpop.permute.xlu0 %10762 }
 0x6b0   : > { %10810 = vst [vmem:[%s18320_s23 + $0x18] sm:$0xff] %v10802_v16  ;;  %v10801_v54 = vsel %vm10798_vm4, %v10792_v5, %v10763_v3 }
 0x6b1   : > { %10809 = vst [vmem:[%s18320_s23 + $0x10] sm:$0xff] %v10801_v54 }
 0x6b2   : > { %v10769_v61 = vpop.permute.xlu1 %10768 }
 0x6b3   : > { %v10804_v59 = vsel %vm10798_vm4, %v10795_v2, %v10769_v61  ;;  %v10767_v27 = vpop.permute.xlu0 %10766 }
 0x6b4   : > { %10812 = vst [vmem:[%s18320_s23 + $0x28] sm:$0xff] %v10804_v59  ;;  %v10803_v7 = vsel %vm10798_vm4, %v10794_v22, %v10767_v27 }
 0x6b5   : > { %10811 = vst [vmem:[%s18320_s23 + $0x20] sm:$0xff] %v10803_v7 }
 0x6bc   : > { %v10773_v1 = vpop.permute.xlu1 %10772 }
 0x6bd   : > { %v10806_v34 = vsel %vm10798_vm4, %v10797_v23, %v10773_v1  ;;  %v10771_v25 = vpop.permute.xlu0 %10770 }
 0x6be   : > { %10814 = vst [vmem:[%s18320_s23 + $0x38] sm:$0xff] %v10806_v34  ;;  %v10805_v10 = vsel %vm10798_vm4, %v10796_v4, %v10771_v25 }
 0x6bf   : > { %10813 = vst [vmem:[%s18320_s23 + $0x30] sm:$0xff] %v10805_v10 }
 0x6c0   : > { %15391 = shalt.err (!%p15388_p3)
}
 0x6c1   : > { %s15392_s11 = scalar_lea.hbm %s18355_s6, 1024  ;;  %s15396_s14 = scalar_lea.hbm %s18411_s4, 4096 }
 0x6c2   : > { %p15393_p4 = scmp.ne.s32.totalorder %s18355_s6, %s15392_s11  ;;  %p15397_p9 = scmp.lt.u32.totalorder %s18355_s6, %s18411_s4 }
 0x6c3   : > { %p15398_p10 = scmp.lt.u32.totalorder %s15396_s14, %s15392_s11  ;;  %p15400_p12 = scmp.lt.u32.totalorder %s15392_s11, %s18355_s6 }
 0x6c4   : > { %p15394_p7 = pnand %p15393_p4, %p15512_p5 }
 0x6c5   : > { %p15399_p11 = por %p15398_p10, %p15397_p9 }
 0x6c6   : > { %p15395_p8 = pneg %p15394_p7 }
 0x6c7   : > { %p15401_p13 = por %p15400_p12, %p15399_p11 }
 0x6c9   : > { %p15402_p0 = pnand %p15401_p13, %p15395_p8 }
 0x6cb   : > { %15405 = shalt.err (!%p15402_p0)
}
 0x6cc   : > { %s15447_s22 = smov 128   ;;  %s15448_s23 = smov 8  }
 0x6cd   : > { %15226 = dma.vmem_to_hbm [thread:$0]  (%p15512_p5), %s18357_s29, 1024, %s18355_s6, %s18366_s19, %s15447_s22, %s15447_s22, %s15448_s23  }
 0x6ce PF: > { %p15232_p1 = scmp.ge.s32.totalorder %s15440_s18, 2  ;;  %s10844_s28 = sand.u32 1, %s15428_s15  }
 0x6cf   : > { %s10845_s30 = scalar_lea.sflag [#allocation4], %s10844_s28 }
 0x6d0   : > { %p15229_p2 = pnand %p15232_p1, %p15516_p6 }
 0x6d2   : > { %15423 = dma.done.wait (!%p15229_p2), %s10845_s30, 1024  }
 0x6d3   : > { %15425 = vsyncadd (!%p15229_p2), %s10845_s30, 4294966272  ;;  %p14_p3 = scmp.ge.s32.totalorder %s15499_s21, 6   ;;  %s18688_s15 = smov %s15432_s16 }
 0x6d4   : > { %s18689_s16 = smov %s15436_s17  ;;  %s18690_s17 = smov %s15510_s24 }
 0x6d5   : > { %s18691_s18 = smov %s15499_s21  ;;  %16 = sbr.rel (!%p14_p3) target bundleno = 3 (0x3), region = 107 }
 0x6dc   :  { %10850 = vsyncpa [#allocation4], 1 }
 0x6dd   :  { %10852 = vsyncpa [#allocation4 + $0x1], 1 }

</bundles_post_ra>
